<compile_context>
chip_gen: v5e
topology: v5e:2x2
jax: 0.10.0
libtpu: 0.0.40
codegen_flags: <defaults>
</compile_context>

<pallas_src>
import math
import functools

import jax
import jax.numpy as jnp
from jax.experimental import pallas as pl
from jax.experimental.pallas import tpu as pltpu


# ----------------------------- in-kernel helpers -----------------------------

_GELU_C = math.sqrt(2.0 / math.pi)


def _layer_norm(x, g, b, eps):
    mean = jnp.mean(x, axis=-1, keepdims=True)
    xc = x - mean
    var = jnp.mean(xc * xc, axis=-1, keepdims=True)   # biased variance (PyTorch LN)
    return xc * jax.lax.rsqrt(var + eps) * g + b


def _gelu(y):
    return 0.5 * y * (1.0 + jnp.tanh(_GELU_C * (y + 0.044715 * y * y * y)))


def _bf16(a):
    return a.astype(jnp.bfloat16)


# ----------------------------- fused model kernel -----------------------------

def _fused_model_kernel(x_ref, pe_ref, *rest, nhead, num_layers, eps_attn, eps_mlp):
    """Entire AtmosphericModel forward for one batch tile of Bt sequences.

    rest = [w_in, b_in,
            (wqkv, bqkv, wo, bo, g1, be1, g2, be2,
             wf1, bf1, wf2, bf2, wm1, bm1, wm2, bm2, gm, bem) * num_layers,
            w_out, b_out,            # inputs
            o_ref,                   # output
            ctx_ref]                 # VMEM scratch (Bt*S, D) f32
    """
    nlr = 18 * num_layers
    win_ref, bin_ref = rest[0], rest[1]
    layer_refs = rest[2:2 + nlr]
    wout_ref, bout_ref = rest[2 + nlr], rest[3 + nlr]
    o_ref = rest[4 + nlr]
    ctx_ref = rest[5 + nlr]

    Bt, S, nx = x_ref.shape
    D = win_ref.shape[1]
    dh = D // nhead
    scale = 1.0 / math.sqrt(dh)
    M = Bt * S

    # ---- input projection + sinusoidal positional encoding (rows flattened) ----
    xf = x_ref[...].reshape(M, nx)
    h = jnp.dot(_bf16(xf), win_ref[...], preferred_element_type=jnp.float32) + bin_ref[...]
    h = (h.reshape(Bt, S, D) + pe_ref[...]).reshape(M, D)

    # ---- encoder stack: [TransformerEncoderLayer (norm_first) + ResidualMLPBlock] * L ----
    for l in range(num_layers):
        (wqkv, bqkv, wo, bo, g1, be1, g2, be2,
         wf1, bf1, wf2, bf2, wm1, bm1, wm2, bm2, gm, bem) = layer_refs[18 * l:18 * (l + 1)]

        # self-attention sublayer (pre-norm)
        n1 = _layer_norm(h, g1[...], be1[...], eps_attn)
        qkv = jnp.dot(_bf16(n1), wqkv[...], preferred_element_type=jnp.float32) + bqkv[...]
        for hh in range(nhead):                      # static loop over heads
            lo = hh * dh
            qh = (qkv[:, lo:lo + dh] * scale).reshape(Bt, S, dh)
            kh = qkv[:, D + lo:D + lo + dh].reshape(Bt, S, dh)
            vh = qkv[:, 2 * D + lo:2 * D + lo + dh].reshape(Bt, S, dh)
            # scores / context batched over the Bt batch elements (one batch dim)
            s = jnp.einsum('bqd,bkd->bqk', _bf16(qh), _bf16(kh),
                           preferred_element_type=jnp.float32)
            m = jnp.max(s, axis=-1, keepdims=True)
            p = jnp.exp(s - m)
            p = p * pl.reciprocal(jnp.sum(p, axis=-1, keepdims=True), approx=True)
            ctx = jnp.einsum('bqk,bkd->bqd', _bf16(p), _bf16(vh),
                             preferred_element_type=jnp.float32)
            # scatter head context into its static lane slice of the scratch
            ctx_ref[:, lo:lo + dh] = ctx.reshape(M, dh)
        # single full-width output projection over all heads
        attn = jnp.dot(_bf16(ctx_ref[...]), wo[...],
                       preferred_element_type=jnp.float32) + bo[...]
        h = h + attn

        # feed-forward sublayer (pre-norm), activation = gelu
        n2 = _layer_norm(h, g2[...], be2[...], eps_attn)
        ff = jnp.dot(_bf16(n2), wf1[...], preferred_element_type=jnp.float32) + bf1[...]
        ff = _gelu(ff)
        ff = jnp.dot(_bf16(ff), wf2[...], preferred_element_type=jnp.float32) + bf2[...]
        h = h + ff

        # ResidualMLPBlock: LayerNorm(Linear(ReLU(Linear(h))) + h)
        hm = jnp.dot(_bf16(h), wm1[...], preferred_element_type=jnp.float32) + bm1[...]
        hm = jnp.maximum(hm, 0.0)
        hm = jnp.dot(_bf16(hm), wm2[...], preferred_element_type=jnp.float32) + bm2[...]
        h = _layer_norm(hm + h, gm[...], bem[...], eps_mlp)

    # ---- output projection (lane-padded to ny_pad for unmasked stores) ----
    y = jnp.dot(_bf16(h), wout_ref[...], preferred_element_type=jnp.float32) + bout_ref[...]
    o_ref[...] = y.reshape(Bt, S, -1)


# ----------------------------- wrapper -----------------------------

def _pick_bt(B, S):
    """Batch-tile size: aim for >= ~128 GEMM rows per grid step, divide B evenly."""
    target = max(1, 128 // max(S, 1))
    bt = max(1, min(B, target))
    while B % bt:
        bt -= 1
    return max(bt, 1)


def sinusoidal_pe(seq_len, d_model):
    position = jnp.arange(seq_len, dtype=jnp.float32)[:, None]
    div_term = jnp.exp(
        -math.log(10000.0) * jnp.arange(0, d_model, 2, dtype=jnp.float32) / d_model)
    pe = jnp.zeros((seq_len, d_model), jnp.float32)
    pe = pe.at[:, 0::2].set(jnp.sin(position * div_term))
    pe = pe.at[:, 1::2].set(jnp.cos(position * div_term))
    return pe


def atmospheric_model_forward(params, x, *, nhead, layer_norm_eps=1e-6):
    B, S, nx = x.shape
    w_in, b_in = params["in_proj"]
    D = w_in.shape[1]
    w_out, b_out = params["out_proj"]
    ny = w_out.shape[1]
    ny_pad = ((ny + 127) // 128) * 128
    layers = params["layers"]
    num_layers = len(layers)
    F = layers[0]["ff1"][0].shape[1]
    Hm = layers[0]["mlp1"][0].shape[1]

    pe = sinusoidal_pe(S, D)
    Bt = _pick_bt(B, S)
    grid = (B // Bt,)

    def row(v):
        return v.reshape(1, -1).astype(jnp.float32)

    # Weight matrices stored/DMA'd as bf16; biases and LN params stay f32.
    operands = [x, pe, _bf16(w_in), row(b_in)]
    for p in layers:
        wqkv, bqkv = p["attn_in"]
        wo, bo = p["attn_out"]
        g1, be1 = p["norm1"]
        g2, be2 = p["norm2"]
        wf1, bf1 = p["ff1"]
        wf2, bf2 = p["ff2"]
        wm1, bm1 = p["mlp1"]
        wm2, bm2 = p["mlp2"]
        gm, bem = p["mlp_ln"]
        operands += [_bf16(wqkv), row(bqkv), _bf16(wo), row(bo),
                     row(g1), row(be1), row(g2), row(be2),
                     _bf16(wf1), row(bf1), _bf16(wf2), row(bf2),
                     _bf16(wm1), row(bm1), _bf16(wm2), row(bm2),
                     row(gm), row(bem)]
    w_out_p = jnp.pad(w_out, ((0, 0), (0, ny_pad - ny)))
    b_out_p = jnp.pad(b_out, (0, ny_pad - ny))
    operands += [_bf16(w_out_p), row(b_out_p)]

    # BlockSpecs: x / output gridded over batch tiles; everything else resident
    # (same block every grid step -> single DMA, stays in VMEM).
    x_spec = pl.BlockSpec((Bt, S, nx), lambda bi: (bi, 0, 0))
    out_spec = pl.BlockSpec((Bt, S, ny_pad), lambda bi: (bi, 0, 0))

    def resident(a):
        return pl.BlockSpec(a.shape, lambda bi: (0, 0))

    in_specs = [x_spec] + [resident(a) for a in operands[1:]]

    # Advisory cost hint for XLA scheduling around the custom call.
    flops = int(2 * B * S * (nx * D + D * ny_pad)
                + num_layers * (2 * B * S * (3 * D * D + D * D + 2 * D * F + 2 * D * Hm)
                                + 4 * B * nhead * S * S * (D // nhead)))
    transcendentals = int(num_layers * B * S * (F + nhead * S + 6))
    bytes_accessed = int(sum(a.size * a.dtype.itemsize for a in operands)
                         + B * S * ny_pad * 4)

    # Explicit VMEM budget: resident operands (x2 for default double-buffering) +
    # gridded x/out blocks + scratch + headroom for in-body temporaries.
    resident_bytes = sum(a.size * a.dtype.itemsize for a in operands[1:])
    block_bytes = 2 * (Bt * S * nx * 4 + Bt * S * ny_pad * 4)
    scratch_bytes = Bt * S * D * 4
    vmem_limit = min(2 * resident_bytes + 2 * block_bytes + scratch_bytes + (8 << 20),
                     64 << 20)

    kernel = functools.partial(_fused_model_kernel, nhead=nhead, num_layers=num_layers,
                               eps_attn=layer_norm_eps, eps_mlp=1e-5)

    y = pl.pallas_call(
        kernel,
        out_shape=jax.ShapeDtypeStruct((B, S, ny_pad), jnp.float32),
        grid=grid,
        in_specs=in_specs,
        out_specs=out_spec,
        scratch_shapes=[pltpu.VMEM((Bt * S, D), jnp.float32)],
        compiler_params=pltpu.CompilerParams(
            dimension_semantics=("parallel",),
            vmem_limit_bytes=int(vmem_limit)),
        cost_estimate=pl.CostEstimate(flops=flops,
                                      transcendentals=transcendentals,
                                      bytes_accessed=bytes_accessed),
    )(*operands)
    return y[..., :ny]


# ----------------------------- params -----------------------------

def init_params(key, nx, ny, d_model, num_layers, dim_ff, mlp_hidden):
    def lin(k, din, dout, scale=0.05):
        kw, kb = jax.random.split(k)
        return (jax.random.normal(kw, (din, dout), jnp.float32) * scale,
                jax.random.normal(kb, (dout,), jnp.float32) * scale)

    keys = jax.random.split(key, 2 + num_layers)
    params = {
        "in_proj": lin(keys[0], nx, d_model),
        "out_proj": lin(keys[1], d_model, ny),
        "layers": [],
    }
    for li in range(num_layers):
        lk = jax.random.split(keys[2 + li], 6)
        params["layers"].append({
            "attn_in": lin(lk[0], d_model, 3 * d_model),
            "attn_out": lin(lk[1], d_model, d_model),
            "ff1": lin(lk[2], d_model, dim_ff),
            "ff2": lin(lk[3], dim_ff, d_model),
            "norm1": (jnp.ones((d_model,), jnp.float32), jnp.zeros((d_model,), jnp.float32)),
            "norm2": (jnp.ones((d_model,), jnp.float32), jnp.zeros((d_model,), jnp.float32)),
            "mlp1": lin(lk[4], d_model, mlp_hidden),
            "mlp2": lin(lk[5], mlp_hidden, d_model),
            "mlp_ln": (jnp.ones((d_model,), jnp.float32), jnp.zeros((d_model,), jnp.float32)),
        })
    return params


# ----------------------------- main -----------------------------

if __name__ == "__main__":
    # Small shapes consistent with the module's forward contract.
    # d_model chosen as a multiple of 128 so every activation / store is lane-dense.
    B, S = 2, 8
    nx, ny = 16, 8
    d_model, nhead = 128, 4
    num_layers, dim_ff = 2, 256
    mlp_hidden = max(64, d_model // 2)

    key = jax.random.PRNGKey(0)
    pkey, xkey = jax.random.split(key)
    params = init_params(pkey, nx, ny, d_model, num_layers, dim_ff, mlp_hidden)
    inputs_main = jax.random.normal(xkey, (B, S, nx), jnp.float32)

    fwd = jax.jit(functools.partial(atmospheric_model_forward, nhead=nhead,
                                    layer_norm_eps=1e-6))
    y = fwd(params, inputs_main)
    y = jax.block_until_ready(y)
    assert y.shape == (B, S, ny), y.shape
    assert jnp.all(jnp.isfinite(y))
    print("KERNEL_OK")
</pallas_src>

<mosaic_0001>
module attributes {stable_mosaic.version = 11 : i64} {
  func.func @_fused_model_kernel(%arg0: i32, %arg1: memref<2x8x16xf32, #tpu.memory_space<vmem>>, %arg2: memref<8x128xf32, #tpu.memory_space<vmem>>, %arg3: memref<16x128xbf16, #tpu.memory_space<vmem>>, %arg4: memref<1x128xf32, #tpu.memory_space<vmem>>, %arg5: memref<128x384xbf16, #tpu.memory_space<vmem>>, %arg6: memref<1x384xf32, #tpu.memory_space<vmem>>, %arg7: memref<128x128xbf16, #tpu.memory_space<vmem>>, %arg8: memref<1x128xf32, #tpu.memory_space<vmem>>, %arg9: memref<1x128xf32, #tpu.memory_space<vmem>>, %arg10: memref<1x128xf32, #tpu.memory_space<vmem>>, %arg11: memref<1x128xf32, #tpu.memory_space<vmem>>, %arg12: memref<1x128xf32, #tpu.memory_space<vmem>>, %arg13: memref<128x256xbf16, #tpu.memory_space<vmem>>, %arg14: memref<1x256xf32, #tpu.memory_space<vmem>>, %arg15: memref<256x128xbf16, #tpu.memory_space<vmem>>, %arg16: memref<1x128xf32, #tpu.memory_space<vmem>>, %arg17: memref<128x64xbf16, #tpu.memory_space<vmem>>, %arg18: memref<1x64xf32, #tpu.memory_space<vmem>>, %arg19: memref<64x128xbf16, #tpu.memory_space<vmem>>, %arg20: memref<1x128xf32, #tpu.memory_space<vmem>>, %arg21: memref<1x128xf32, #tpu.memory_space<vmem>>, %arg22: memref<1x128xf32, #tpu.memory_space<vmem>>, %arg23: memref<128x384xbf16, #tpu.memory_space<vmem>>, %arg24: memref<1x384xf32, #tpu.memory_space<vmem>>, %arg25: memref<128x128xbf16, #tpu.memory_space<vmem>>, %arg26: memref<1x128xf32, #tpu.memory_space<vmem>>, %arg27: memref<1x128xf32, #tpu.memory_space<vmem>>, %arg28: memref<1x128xf32, #tpu.memory_space<vmem>>, %arg29: memref<1x128xf32, #tpu.memory_space<vmem>>, %arg30: memref<1x128xf32, #tpu.memory_space<vmem>>, %arg31: memref<128x256xbf16, #tpu.memory_space<vmem>>, %arg32: memref<1x256xf32, #tpu.memory_space<vmem>>, %arg33: memref<256x128xbf16, #tpu.memory_space<vmem>>, %arg34: memref<1x128xf32, #tpu.memory_space<vmem>>, %arg35: memref<128x64xbf16, #tpu.memory_space<vmem>>, %arg36: memref<1x64xf32, #tpu.memory_space<vmem>>, %arg37: memref<64x128xbf16, #tpu.memory_space<vmem>>, %arg38: memref<1x128xf32, #tpu.memory_space<vmem>>, %arg39: memref<1x128xf32, #tpu.memory_space<vmem>>, %arg40: memref<1x128xf32, #tpu.memory_space<vmem>>, %arg41: memref<128x128xbf16, #tpu.memory_space<vmem>>, %arg42: memref<1x128xf32, #tpu.memory_space<vmem>>, %arg43: memref<2x8x128xf32, #tpu.memory_space<vmem>>, %arg44: memref<16x128xf32, #tpu.memory_space<vmem>>) attributes {dimension_semantics = [#tpu.dimension_semantics<parallel>], iteration_bounds = array<i64: 1>, scalar_prefetch = 0 : i64, scratch_operands = 1 : i64, tpu.core_type = #tpu.core_type<tc>, window_params = [{transform_indices = @transform_0, window_bounds = array<i64: 2, 8, 16>}, {pipeline_mode = #tpu.pipeline_mode<synchronous>, transform_indices = @transform_1, window_bounds = array<i64: 8, 128>}, {pipeline_mode = #tpu.pipeline_mode<synchronous>, transform_indices = @transform_2, window_bounds = array<i64: 16, 128>}, {pipeline_mode = #tpu.pipeline_mode<synchronous>, transform_indices = @transform_3, window_bounds = array<i64: 1, 128>}, {pipeline_mode = #tpu.pipeline_mode<synchronous>, transform_indices = @transform_4, window_bounds = array<i64: 128, 384>}, {pipeline_mode = #tpu.pipeline_mode<synchronous>, transform_indices = @transform_5, window_bounds = array<i64: 1, 384>}, {pipeline_mode = #tpu.pipeline_mode<synchronous>, transform_indices = @transform_6, window_bounds = array<i64: 128, 128>}, {pipeline_mode = #tpu.pipeline_mode<synchronous>, transform_indices = @transform_7, window_bounds = array<i64: 1, 128>}, {pipeline_mode = #tpu.pipeline_mode<synchronous>, transform_indices = @transform_8, window_bounds = array<i64: 1, 128>}, {pipeline_mode = #tpu.pipeline_mode<synchronous>, transform_indices = @transform_9, window_bounds = array<i64: 1, 128>}, {pipeline_mode = #tpu.pipeline_mode<synchronous>, transform_indices = @transform_10, window_bounds = array<i64: 1, 128>}, {pipeline_mode = #tpu.pipeline_mode<synchronous>, transform_indices = @transform_11, window_bounds = array<i64: 1, 128>}, {pipeline_mode = #tpu.pipeline_mode<synchronous>, transform_indices = @transform_12, window_bounds = array<i64: 128, 256>}, {pipeline_mode = #tpu.pipeline_mode<synchronous>, transform_indices = @transform_13, window_bounds = array<i64: 1, 256>}, {pipeline_mode = #tpu.pipeline_mode<synchronous>, transform_indices = @transform_14, window_bounds = array<i64: 256, 128>}, {pipeline_mode = #tpu.pipeline_mode<synchronous>, transform_indices = @transform_15, window_bounds = array<i64: 1, 128>}, {pipeline_mode = #tpu.pipeline_mode<synchronous>, transform_indices = @transform_16, window_bounds = array<i64: 128, 64>}, {pipeline_mode = #tpu.pipeline_mode<synchronous>, transform_indices = @transform_17, window_bounds = array<i64: 1, 64>}, {pipeline_mode = #tpu.pipeline_mode<synchronous>, transform_indices = @transform_18, window_bounds = array<i64: 64, 128>}, {pipeline_mode = #tpu.pipeline_mode<synchronous>, transform_indices = @transform_19, window_bounds = array<i64: 1, 128>}, {pipeline_mode = #tpu.pipeline_mode<synchronous>, transform_indices = @transform_20, window_bounds = array<i64: 1, 128>}, {pipeline_mode = #tpu.pipeline_mode<synchronous>, transform_indices = @transform_21, window_bounds = array<i64: 1, 128>}, {pipeline_mode = #tpu.pipeline_mode<synchronous>, transform_indices = @transform_22, window_bounds = array<i64: 128, 384>}, {pipeline_mode = #tpu.pipeline_mode<synchronous>, transform_indices = @transform_23, window_bounds = array<i64: 1, 384>}, {pipeline_mode = #tpu.pipeline_mode<synchronous>, transform_indices = @transform_24, window_bounds = array<i64: 128, 128>}, {pipeline_mode = #tpu.pipeline_mode<synchronous>, transform_indices = @transform_25, window_bounds = array<i64: 1, 128>}, {pipeline_mode = #tpu.pipeline_mode<synchronous>, transform_indices = @transform_26, window_bounds = array<i64: 1, 128>}, {pipeline_mode = #tpu.pipeline_mode<synchronous>, transform_indices = @transform_27, window_bounds = array<i64: 1, 128>}, {pipeline_mode = #tpu.pipeline_mode<synchronous>, transform_indices = @transform_28, window_bounds = array<i64: 1, 128>}, {pipeline_mode = #tpu.pipeline_mode<synchronous>, transform_indices = @transform_29, window_bounds = array<i64: 1, 128>}, {pipeline_mode = #tpu.pipeline_mode<synchronous>, transform_indices = @transform_30, window_bounds = array<i64: 128, 256>}, {pipeline_mode = #tpu.pipeline_mode<synchronous>, transform_indices = @transform_31, window_bounds = array<i64: 1, 256>}, {pipeline_mode = #tpu.pipeline_mode<synchronous>, transform_indices = @transform_32, window_bounds = array<i64: 256, 128>}, {pipeline_mode = #tpu.pipeline_mode<synchronous>, transform_indices = @transform_33, window_bounds = array<i64: 1, 128>}, {pipeline_mode = #tpu.pipeline_mode<synchronous>, transform_indices = @transform_34, window_bounds = array<i64: 128, 64>}, {pipeline_mode = #tpu.pipeline_mode<synchronous>, transform_indices = @transform_35, window_bounds = array<i64: 1, 64>}, {pipeline_mode = #tpu.pipeline_mode<synchronous>, transform_indices = @transform_36, window_bounds = array<i64: 64, 128>}, {pipeline_mode = #tpu.pipeline_mode<synchronous>, transform_indices = @transform_37, window_bounds = array<i64: 1, 128>}, {pipeline_mode = #tpu.pipeline_mode<synchronous>, transform_indices = @transform_38, window_bounds = array<i64: 1, 128>}, {pipeline_mode = #tpu.pipeline_mode<synchronous>, transform_indices = @transform_39, window_bounds = array<i64: 1, 128>}, {pipeline_mode = #tpu.pipeline_mode<synchronous>, transform_indices = @transform_40, window_bounds = array<i64: 128, 128>}, {pipeline_mode = #tpu.pipeline_mode<synchronous>, transform_indices = @transform_41, window_bounds = array<i64: 1, 128>}, {transform_indices = @transform_42, window_bounds = array<i64: 2, 8, 128>}]} {
    %c0 = arith.constant 0 : index
    %c0_0 = arith.constant 0 : index
    %c0_1 = arith.constant 0 : index
    %0 = vector.load %arg1[%c0, %c0_0, %c0_1] : memref<2x8x16xf32, #tpu.memory_space<vmem>>, vector<2x8x16xf32>
    %1 = vector.shape_cast %0 : vector<2x8x16xf32> to vector<16x16xf32>
    %2 = arith.truncf %1 : vector<16x16xf32> to vector<16x16xbf16>
    %c0_2 = arith.constant 0 : index
    %c0_3 = arith.constant 0 : index
    %3 = vector.load %arg3[%c0_2, %c0_3] : memref<16x128xbf16, #tpu.memory_space<vmem>>, vector<16x128xbf16>
    %cst = arith.constant dense<0.000000e+00> : vector<16x128xf32>
    %4 = tpu.matmul %2, %3, %cst {dimension_numbers = #tpu.dot_dimension_numbers<[1], [0], [0], [1], [0, 0, 1, 1], [], []>} : vector<16x16xbf16>, vector<16x128xbf16>, vector<16x128xf32> -> vector<16x128xf32>
    %c0_4 = arith.constant 0 : index
    %c0_5 = arith.constant 0 : index
    %5 = vector.load %arg4[%c0_4, %c0_5] : memref<1x128xf32, #tpu.memory_space<vmem>>, vector<1x128xf32>
    %6 = vector.broadcast %5 : vector<1x128xf32> to vector<16x128xf32>
    %7 = arith.addf %4, %6 : vector<16x128xf32>
    %8 = vector.shape_cast %7 : vector<16x128xf32> to vector<2x8x128xf32>
    %c0_6 = arith.constant 0 : index
    %c0_7 = arith.constant 0 : index
    %9 = vector.load %arg2[%c0_6, %c0_7] : memref<8x128xf32, #tpu.memory_space<vmem>>, vector<8x128xf32>
    %10 = vector.shape_cast %9 : vector<8x128xf32> to vector<1x8x128xf32>
    %11 = vector.broadcast %10 : vector<1x8x128xf32> to vector<2x8x128xf32>
    %12 = arith.addf %8, %11 : vector<2x8x128xf32>
    %13 = vector.shape_cast %12 : vector<2x8x128xf32> to vector<16x128xf32>
    %c0_8 = arith.constant 0 : index
    %c0_9 = arith.constant 0 : index
    %14 = vector.load %arg9[%c0_8, %c0_9] : memref<1x128xf32, #tpu.memory_space<vmem>>, vector<1x128xf32>
    %c0_10 = arith.constant 0 : index
    %c0_11 = arith.constant 0 : index
    %15 = vector.load %arg10[%c0_10, %c0_11] : memref<1x128xf32, #tpu.memory_space<vmem>>, vector<1x128xf32>
    %cst_12 = arith.constant dense<0.000000e+00> : vector<16xf32>
    %16 = vector.multi_reduction <add>, %13, %cst_12 [1] : vector<16x128xf32> to vector<16xf32>
    %17 = vector.shape_cast %16 : vector<16xf32> to vector<16x1xf32>
    %cst_13 = arith.constant 1.280000e+02 : f32
    %18 = vector.broadcast %cst_13 : f32 to vector<16x1xf32>
    %19 = arith.divf %17, %18 : vector<16x1xf32>
    %20 = vector.broadcast %19 : vector<16x1xf32> to vector<16x128xf32>
    %21 = arith.subf %13, %20 : vector<16x128xf32>
    %22 = arith.mulf %21, %21 : vector<16x128xf32>
    %cst_14 = arith.constant dense<0.000000e+00> : vector<16xf32>
    %23 = vector.multi_reduction <add>, %22, %cst_14 [1] : vector<16x128xf32> to vector<16xf32>
    %24 = vector.shape_cast %23 : vector<16xf32> to vector<16x1xf32>
    %cst_15 = arith.constant 1.280000e+02 : f32
    %25 = vector.broadcast %cst_15 : f32 to vector<16x1xf32>
    %26 = arith.divf %24, %25 : vector<16x1xf32>
    %cst_16 = arith.constant 9.99999997E-7 : f32
    %27 = vector.broadcast %cst_16 : f32 to vector<16x1xf32>
    %28 = arith.addf %26, %27 : vector<16x1xf32>
    %29 = math.rsqrt %28 : vector<16x1xf32>
    %30 = vector.broadcast %29 : vector<16x1xf32> to vector<16x128xf32>
    %31 = arith.mulf %21, %30 : vector<16x128xf32>
    %32 = vector.broadcast %14 : vector<1x128xf32> to vector<16x128xf32>
    %33 = arith.mulf %31, %32 : vector<16x128xf32>
    %34 = vector.broadcast %15 : vector<1x128xf32> to vector<16x128xf32>
    %35 = arith.addf %33, %34 : vector<16x128xf32>
    %36 = arith.truncf %35 : vector<16x128xf32> to vector<16x128xbf16>
    %c0_17 = arith.constant 0 : index
    %c0_18 = arith.constant 0 : index
    %37 = vector.load %arg5[%c0_17, %c0_18] : memref<128x384xbf16, #tpu.memory_space<vmem>>, vector<128x384xbf16>
    %cst_19 = arith.constant dense<0.000000e+00> : vector<16x384xf32>
    %38 = tpu.matmul %36, %37, %cst_19 {dimension_numbers = #tpu.dot_dimension_numbers<[1], [0], [0], [1], [0, 0, 1, 1], [], []>} : vector<16x128xbf16>, vector<128x384xbf16>, vector<16x384xf32> -> vector<16x384xf32>
    %c0_20 = arith.constant 0 : index
    %c0_21 = arith.constant 0 : index
    %39 = vector.load %arg6[%c0_20, %c0_21] : memref<1x384xf32, #tpu.memory_space<vmem>>, vector<1x384xf32>
    %40 = vector.broadcast %39 : vector<1x384xf32> to vector<16x384xf32>
    %41 = arith.addf %38, %40 : vector<16x384xf32>
    %42 = vector.extract_strided_slice %41 {offsets = [0, 0], sizes = [16, 32], strides = [1, 1]} : vector<16x384xf32> to vector<16x32xf32>
    %cst_22 = arith.constant 0.176776692 : f32
    %43 = vector.broadcast %cst_22 : f32 to vector<16x32xf32>
    %44 = arith.mulf %42, %43 : vector<16x32xf32>
    %45 = vector.shape_cast %44 : vector<16x32xf32> to vector<2x8x32xf32>
    %46 = vector.extract_strided_slice %41 {offsets = [0, 128], sizes = [16, 32], strides = [1, 1]} : vector<16x384xf32> to vector<16x32xf32>
    %47 = vector.shape_cast %46 : vector<16x32xf32> to vector<2x8x32xf32>
    %48 = vector.extract_strided_slice %41 {offsets = [0, 256], sizes = [16, 32], strides = [1, 1]} : vector<16x384xf32> to vector<16x32xf32>
    %49 = vector.shape_cast %48 : vector<16x32xf32> to vector<2x8x32xf32>
    %50 = arith.truncf %45 : vector<2x8x32xf32> to vector<2x8x32xbf16>
    %51 = arith.truncf %47 : vector<2x8x32xf32> to vector<2x8x32xbf16>
    "tpu.trace_start"() <{level = 10 : i32, message = "bqd,bkd->bqk"}> : () -> ()
    %cst_23 = arith.constant dense<0.000000e+00> : vector<2x8x8xf32>
    %52 = tpu.matmul %50, %51, %cst_23 {dimension_numbers = #tpu.dot_dimension_numbers<[2], [2], [1], [1], [0, 0, 0, 1, 1, 1], [0], [0]>} : vector<2x8x32xbf16>, vector<2x8x32xbf16>, vector<2x8x8xf32> -> vector<2x8x8xf32>
    "tpu.trace_stop"() : () -> ()
    %cst_24 = arith.constant dense<0xFF800000> : vector<2x8xf32>
    %53 = vector.multi_reduction <maximumf>, %52, %cst_24 [2] : vector<2x8x8xf32> to vector<2x8xf32>
    %54 = vector.shape_cast %53 : vector<2x8xf32> to vector<2x8x1xf32>
    %55 = vector.broadcast %54 : vector<2x8x1xf32> to vector<2x8x8xf32>
    %56 = arith.subf %52, %55 : vector<2x8x8xf32>
    %57 = math.exp %56 : vector<2x8x8xf32>
    %cst_25 = arith.constant dense<0.000000e+00> : vector<2x8xf32>
    %58 = vector.multi_reduction <add>, %57, %cst_25 [2] : vector<2x8x8xf32> to vector<2x8xf32>
    %59 = vector.shape_cast %58 : vector<2x8xf32> to vector<2x8x1xf32>
    %60 = tpu.reciprocal %59 {approx = true} : vector<2x8x1xf32> -> vector<2x8x1xf32>
    %61 = vector.broadcast %60 : vector<2x8x1xf32> to vector<2x8x8xf32>
    %62 = arith.mulf %57, %61 : vector<2x8x8xf32>
    %63 = arith.truncf %62 : vector<2x8x8xf32> to vector<2x8x8xbf16>
    %64 = arith.truncf %49 : vector<2x8x32xf32> to vector<2x8x32xbf16>
    "tpu.trace_start"() <{level = 10 : i32, message = "bqk,bkd->bqd"}> : () -> ()
    %cst_26 = arith.constant dense<0.000000e+00> : vector<2x8x32xf32>
    %65 = tpu.matmul %63, %64, %cst_26 {dimension_numbers = #tpu.dot_dimension_numbers<[2], [1], [1], [2], [0, 0, 0, 1, 1, 2], [0], [0]>} : vector<2x8x8xbf16>, vector<2x8x32xbf16>, vector<2x8x32xf32> -> vector<2x8x32xf32>
    "tpu.trace_stop"() : () -> ()
    %66 = vector.shape_cast %65 : vector<2x8x32xf32> to vector<16x32xf32>
    %c0_27 = arith.constant 0 : index
    %c0_28 = arith.constant 0 : index
    %67 = vector.load %arg44[%c0_27, %c0_28] : memref<16x128xf32, #tpu.memory_space<vmem>>, vector<16x32xf32>
    tpu.vector_store %arg44[%c0_27, %c0_28], %66 {strides = array<i32>} : memref<16x128xf32, #tpu.memory_space<vmem>>, vector<16x32xf32>,
    %68 = vector.extract_strided_slice %41 {offsets = [0, 32], sizes = [16, 32], strides = [1, 1]} : vector<16x384xf32> to vector<16x32xf32>
    %cst_29 = arith.constant 0.176776692 : f32
    %69 = vector.broadcast %cst_29 : f32 to vector<16x32xf32>
    %70 = arith.mulf %68, %69 : vector<16x32xf32>
    %71 = vector.shape_cast %70 : vector<16x32xf32> to vector<2x8x32xf32>
    %72 = vector.extract_strided_slice %41 {offsets = [0, 160], sizes = [16, 32], strides = [1, 1]} : vector<16x384xf32> to vector<16x32xf32>
    %73 = vector.shape_cast %72 : vector<16x32xf32> to vector<2x8x32xf32>
    %74 = vector.extract_strided_slice %41 {offsets = [0, 288], sizes = [16, 32], strides = [1, 1]} : vector<16x384xf32> to vector<16x32xf32>
    %75 = vector.shape_cast %74 : vector<16x32xf32> to vector<2x8x32xf32>
    %76 = arith.truncf %71 : vector<2x8x32xf32> to vector<2x8x32xbf16>
    %77 = arith.truncf %73 : vector<2x8x32xf32> to vector<2x8x32xbf16>
    "tpu.trace_start"() <{level = 10 : i32, message = "bqd,bkd->bqk"}> : () -> ()
    %cst_30 = arith.constant dense<0.000000e+00> : vector<2x8x8xf32>
    %78 = tpu.matmul %76, %77, %cst_30 {dimension_numbers = #tpu.dot_dimension_numbers<[2], [2], [1], [1], [0, 0, 0, 1, 1, 1], [0], [0]>} : vector<2x8x32xbf16>, vector<2x8x32xbf16>, vector<2x8x8xf32> -> vector<2x8x8xf32>
    "tpu.trace_stop"() : () -> ()
    %cst_31 = arith.constant dense<0xFF800000> : vector<2x8xf32>
    %79 = vector.multi_reduction <maximumf>, %78, %cst_31 [2] : vector<2x8x8xf32> to vector<2x8xf32>
    %80 = vector.shape_cast %79 : vector<2x8xf32> to vector<2x8x1xf32>
    %81 = vector.broadcast %80 : vector<2x8x1xf32> to vector<2x8x8xf32>
    %82 = arith.subf %78, %81 : vector<2x8x8xf32>
    %83 = math.exp %82 : vector<2x8x8xf32>
    %cst_32 = arith.constant dense<0.000000e+00> : vector<2x8xf32>
    %84 = vector.multi_reduction <add>, %83, %cst_32 [2] : vector<2x8x8xf32> to vector<2x8xf32>
    %85 = vector.shape_cast %84 : vector<2x8xf32> to vector<2x8x1xf32>
    %86 = tpu.reciprocal %85 {approx = true} : vector<2x8x1xf32> -> vector<2x8x1xf32>
    %87 = vector.broadcast %86 : vector<2x8x1xf32> to vector<2x8x8xf32>
    %88 = arith.mulf %83, %87 : vector<2x8x8xf32>
    %89 = arith.truncf %88 : vector<2x8x8xf32> to vector<2x8x8xbf16>
    %90 = arith.truncf %75 : vector<2x8x32xf32> to vector<2x8x32xbf16>
    "tpu.trace_start"() <{level = 10 : i32, message = "bqk,bkd->bqd"}> : () -> ()
    %cst_33 = arith.constant dense<0.000000e+00> : vector<2x8x32xf32>
    %91 = tpu.matmul %89, %90, %cst_33 {dimension_numbers = #tpu.dot_dimension_numbers<[2], [1], [1], [2], [0, 0, 0, 1, 1, 2], [0], [0]>} : vector<2x8x8xbf16>, vector<2x8x32xbf16>, vector<2x8x32xf32> -> vector<2x8x32xf32>
    "tpu.trace_stop"() : () -> ()
    %92 = vector.shape_cast %91 : vector<2x8x32xf32> to vector<16x32xf32>
    %c0_34 = arith.constant 0 : index
    %c32 = arith.constant 32 : index
    %93 = vector.load %arg44[%c0_34, %c32] : memref<16x128xf32, #tpu.memory_space<vmem>>, vector<16x32xf32>
    tpu.vector_store %arg44[%c0_34, %c32], %92 {strides = array<i32>} : memref<16x128xf32, #tpu.memory_space<vmem>>, vector<16x32xf32>,
    %94 = vector.extract_strided_slice %41 {offsets = [0, 64], sizes = [16, 32], strides = [1, 1]} : vector<16x384xf32> to vector<16x32xf32>
    %cst_35 = arith.constant 0.176776692 : f32
    %95 = vector.broadcast %cst_35 : f32 to vector<16x32xf32>
    %96 = arith.mulf %94, %95 : vector<16x32xf32>
    %97 = vector.shape_cast %96 : vector<16x32xf32> to vector<2x8x32xf32>
    %98 = vector.extract_strided_slice %41 {offsets = [0, 192], sizes = [16, 32], strides = [1, 1]} : vector<16x384xf32> to vector<16x32xf32>
    %99 = vector.shape_cast %98 : vector<16x32xf32> to vector<2x8x32xf32>
    %100 = vector.extract_strided_slice %41 {offsets = [0, 320], sizes = [16, 32], strides = [1, 1]} : vector<16x384xf32> to vector<16x32xf32>
    %101 = vector.shape_cast %100 : vector<16x32xf32> to vector<2x8x32xf32>
    %102 = arith.truncf %97 : vector<2x8x32xf32> to vector<2x8x32xbf16>
    %103 = arith.truncf %99 : vector<2x8x32xf32> to vector<2x8x32xbf16>
    "tpu.trace_start"() <{level = 10 : i32, message = "bqd,bkd->bqk"}> : () -> ()
    %cst_36 = arith.constant dense<0.000000e+00> : vector<2x8x8xf32>
    %104 = tpu.matmul %102, %103, %cst_36 {dimension_numbers = #tpu.dot_dimension_numbers<[2], [2], [1], [1], [0, 0, 0, 1, 1, 1], [0], [0]>} : vector<2x8x32xbf16>, vector<2x8x32xbf16>, vector<2x8x8xf32> -> vector<2x8x8xf32>
    "tpu.trace_stop"() : () -> ()
    %cst_37 = arith.constant dense<0xFF800000> : vector<2x8xf32>
    %105 = vector.multi_reduction <maximumf>, %104, %cst_37 [2] : vector<2x8x8xf32> to vector<2x8xf32>
    %106 = vector.shape_cast %105 : vector<2x8xf32> to vector<2x8x1xf32>
    %107 = vector.broadcast %106 : vector<2x8x1xf32> to vector<2x8x8xf32>
    %108 = arith.subf %104, %107 : vector<2x8x8xf32>
    %109 = math.exp %108 : vector<2x8x8xf32>
    %cst_38 = arith.constant dense<0.000000e+00> : vector<2x8xf32>
    %110 = vector.multi_reduction <add>, %109, %cst_38 [2] : vector<2x8x8xf32> to vector<2x8xf32>
    %111 = vector.shape_cast %110 : vector<2x8xf32> to vector<2x8x1xf32>
    %112 = tpu.reciprocal %111 {approx = true} : vector<2x8x1xf32> -> vector<2x8x1xf32>
    %113 = vector.broadcast %112 : vector<2x8x1xf32> to vector<2x8x8xf32>
    %114 = arith.mulf %109, %113 : vector<2x8x8xf32>
    %115 = arith.truncf %114 : vector<2x8x8xf32> to vector<2x8x8xbf16>
    %116 = arith.truncf %101 : vector<2x8x32xf32> to vector<2x8x32xbf16>
    "tpu.trace_start"() <{level = 10 : i32, message = "bqk,bkd->bqd"}> : () -> ()
    %cst_39 = arith.constant dense<0.000000e+00> : vector<2x8x32xf32>
    %117 = tpu.matmul %115, %116, %cst_39 {dimension_numbers = #tpu.dot_dimension_numbers<[2], [1], [1], [2], [0, 0, 0, 1, 1, 2], [0], [0]>} : vector<2x8x8xbf16>, vector<2x8x32xbf16>, vector<2x8x32xf32> -> vector<2x8x32xf32>
    "tpu.trace_stop"() : () -> ()
    %118 = vector.shape_cast %117 : vector<2x8x32xf32> to vector<16x32xf32>
    %c0_40 = arith.constant 0 : index
    %c64 = arith.constant 64 : index
    %119 = vector.load %arg44[%c0_40, %c64] : memref<16x128xf32, #tpu.memory_space<vmem>>, vector<16x32xf32>
    tpu.vector_store %arg44[%c0_40, %c64], %118 {strides = array<i32>} : memref<16x128xf32, #tpu.memory_space<vmem>>, vector<16x32xf32>,
    %120 = vector.extract_strided_slice %41 {offsets = [0, 96], sizes = [16, 32], strides = [1, 1]} : vector<16x384xf32> to vector<16x32xf32>
    %cst_41 = arith.constant 0.176776692 : f32
    %121 = vector.broadcast %cst_41 : f32 to vector<16x32xf32>
    %122 = arith.mulf %120, %121 : vector<16x32xf32>
    %123 = vector.shape_cast %122 : vector<16x32xf32> to vector<2x8x32xf32>
    %124 = vector.extract_strided_slice %41 {offsets = [0, 224], sizes = [16, 32], strides = [1, 1]} : vector<16x384xf32> to vector<16x32xf32>
    %125 = vector.shape_cast %124 : vector<16x32xf32> to vector<2x8x32xf32>
    %126 = vector.extract_strided_slice %41 {offsets = [0, 352], sizes = [16, 32], strides = [1, 1]} : vector<16x384xf32> to vector<16x32xf32>
    %127 = vector.shape_cast %126 : vector<16x32xf32> to vector<2x8x32xf32>
    %128 = arith.truncf %123 : vector<2x8x32xf32> to vector<2x8x32xbf16>
    %129 = arith.truncf %125 : vector<2x8x32xf32> to vector<2x8x32xbf16>
    "tpu.trace_start"() <{level = 10 : i32, message = "bqd,bkd->bqk"}> : () -> ()
    %cst_42 = arith.constant dense<0.000000e+00> : vector<2x8x8xf32>
    %130 = tpu.matmul %128, %129, %cst_42 {dimension_numbers = #tpu.dot_dimension_numbers<[2], [2], [1], [1], [0, 0, 0, 1, 1, 1], [0], [0]>} : vector<2x8x32xbf16>, vector<2x8x32xbf16>, vector<2x8x8xf32> -> vector<2x8x8xf32>
    "tpu.trace_stop"() : () -> ()
    %cst_43 = arith.constant dense<0xFF800000> : vector<2x8xf32>
    %131 = vector.multi_reduction <maximumf>, %130, %cst_43 [2] : vector<2x8x8xf32> to vector<2x8xf32>
    %132 = vector.shape_cast %131 : vector<2x8xf32> to vector<2x8x1xf32>
    %133 = vector.broadcast %132 : vector<2x8x1xf32> to vector<2x8x8xf32>
    %134 = arith.subf %130, %133 : vector<2x8x8xf32>
    %135 = math.exp %134 : vector<2x8x8xf32>
    %cst_44 = arith.constant dense<0.000000e+00> : vector<2x8xf32>
    %136 = vector.multi_reduction <add>, %135, %cst_44 [2] : vector<2x8x8xf32> to vector<2x8xf32>
    %137 = vector.shape_cast %136 : vector<2x8xf32> to vector<2x8x1xf32>
    %138 = tpu.reciprocal %137 {approx = true} : vector<2x8x1xf32> -> vector<2x8x1xf32>
    %139 = vector.broadcast %138 : vector<2x8x1xf32> to vector<2x8x8xf32>
    %140 = arith.mulf %135, %139 : vector<2x8x8xf32>
    %141 = arith.truncf %140 : vector<2x8x8xf32> to vector<2x8x8xbf16>
    %142 = arith.truncf %127 : vector<2x8x32xf32> to vector<2x8x32xbf16>
    "tpu.trace_start"() <{level = 10 : i32, message = "bqk,bkd->bqd"}> : () -> ()
    %cst_45 = arith.constant dense<0.000000e+00> : vector<2x8x32xf32>
    %143 = tpu.matmul %141, %142, %cst_45 {dimension_numbers = #tpu.dot_dimension_numbers<[2], [1], [1], [2], [0, 0, 0, 1, 1, 2], [0], [0]>} : vector<2x8x8xbf16>, vector<2x8x32xbf16>, vector<2x8x32xf32> -> vector<2x8x32xf32>
    "tpu.trace_stop"() : () -> ()
    %144 = vector.shape_cast %143 : vector<2x8x32xf32> to vector<16x32xf32>
    %c0_46 = arith.constant 0 : index
    %c96 = arith.constant 96 : index
    %145 = vector.load %arg44[%c0_46, %c96] : memref<16x128xf32, #tpu.memory_space<vmem>>, vector<16x32xf32>
    tpu.vector_store %arg44[%c0_46, %c96], %144 {strides = array<i32>} : memref<16x128xf32, #tpu.memory_space<vmem>>, vector<16x32xf32>,
    %c0_47 = arith.constant 0 : index
    %c0_48 = arith.constant 0 : index
    %146 = vector.load %arg44[%c0_47, %c0_48] : memref<16x128xf32, #tpu.memory_space<vmem>>, vector<16x128xf32>
    %147 = arith.truncf %146 : vector<16x128xf32> to vector<16x128xbf16>
    %c0_49 = arith.constant 0 : index
    %c0_50 = arith.constant 0 : index
    %148 = vector.load %arg7[%c0_49, %c0_50] : memref<128x128xbf16, #tpu.memory_space<vmem>>, vector<128x128xbf16>
    %cst_51 = arith.constant dense<0.000000e+00> : vector<16x128xf32>
    %149 = tpu.matmul %147, %148, %cst_51 {dimension_numbers = #tpu.dot_dimension_numbers<[1], [0], [0], [1], [0, 0, 1, 1], [], []>} : vector<16x128xbf16>, vector<128x128xbf16>, vector<16x128xf32> -> vector<16x128xf32>
    %c0_52 = arith.constant 0 : index
    %c0_53 = arith.constant 0 : index
    %150 = vector.load %arg8[%c0_52, %c0_53] : memref<1x128xf32, #tpu.memory_space<vmem>>, vector<1x128xf32>
    %151 = vector.broadcast %150 : vector<1x128xf32> to vector<16x128xf32>
    %152 = arith.addf %149, %151 : vector<16x128xf32>
    %153 = arith.addf %13, %152 : vector<16x128xf32>
    %c0_54 = arith.constant 0 : index
    %c0_55 = arith.constant 0 : index
    %154 = vector.load %arg11[%c0_54, %c0_55] : memref<1x128xf32, #tpu.memory_space<vmem>>, vector<1x128xf32>
    %c0_56 = arith.constant 0 : index
    %c0_57 = arith.constant 0 : index
    %155 = vector.load %arg12[%c0_56, %c0_57] : memref<1x128xf32, #tpu.memory_space<vmem>>, vector<1x128xf32>
    %cst_58 = arith.constant dense<0.000000e+00> : vector<16xf32>
    %156 = vector.multi_reduction <add>, %153, %cst_58 [1] : vector<16x128xf32> to vector<16xf32>
    %157 = vector.shape_cast %156 : vector<16xf32> to vector<16x1xf32>
    %cst_59 = arith.constant 1.280000e+02 : f32
    %158 = vector.broadcast %cst_59 : f32 to vector<16x1xf32>
    %159 = arith.divf %157, %158 : vector<16x1xf32>
    %160 = vector.broadcast %159 : vector<16x1xf32> to vector<16x128xf32>
    %161 = arith.subf %153, %160 : vector<16x128xf32>
    %162 = arith.mulf %161, %161 : vector<16x128xf32>
    %cst_60 = arith.constant dense<0.000000e+00> : vector<16xf32>
    %163 = vector.multi_reduction <add>, %162, %cst_60 [1] : vector<16x128xf32> to vector<16xf32>
    %164 = vector.shape_cast %163 : vector<16xf32> to vector<16x1xf32>
    %cst_61 = arith.constant 1.280000e+02 : f32
    %165 = vector.broadcast %cst_61 : f32 to vector<16x1xf32>
    %166 = arith.divf %164, %165 : vector<16x1xf32>
    %cst_62 = arith.constant 9.99999997E-7 : f32
    %167 = vector.broadcast %cst_62 : f32 to vector<16x1xf32>
    %168 = arith.addf %166, %167 : vector<16x1xf32>
    %169 = math.rsqrt %168 : vector<16x1xf32>
    %170 = vector.broadcast %169 : vector<16x1xf32> to vector<16x128xf32>
    %171 = arith.mulf %161, %170 : vector<16x128xf32>
    %172 = vector.broadcast %154 : vector<1x128xf32> to vector<16x128xf32>
    %173 = arith.mulf %171, %172 : vector<16x128xf32>
    %174 = vector.broadcast %155 : vector<1x128xf32> to vector<16x128xf32>
    %175 = arith.addf %173, %174 : vector<16x128xf32>
    %176 = arith.truncf %175 : vector<16x128xf32> to vector<16x128xbf16>
    %c0_63 = arith.constant 0 : index
    %c0_64 = arith.constant 0 : index
    %177 = vector.load %arg13[%c0_63, %c0_64] : memref<128x256xbf16, #tpu.memory_space<vmem>>, vector<128x256xbf16>
    %cst_65 = arith.constant dense<0.000000e+00> : vector<16x256xf32>
    %178 = tpu.matmul %176, %177, %cst_65 {dimension_numbers = #tpu.dot_dimension_numbers<[1], [0], [0], [1], [0, 0, 1, 1], [], []>} : vector<16x128xbf16>, vector<128x256xbf16>, vector<16x256xf32> -> vector<16x256xf32>
    %c0_66 = arith.constant 0 : index
    %c0_67 = arith.constant 0 : index
    %179 = vector.load %arg14[%c0_66, %c0_67] : memref<1x256xf32, #tpu.memory_space<vmem>>, vector<1x256xf32>
    %180 = vector.broadcast %179 : vector<1x256xf32> to vector<16x256xf32>
    %181 = arith.addf %178, %180 : vector<16x256xf32>
    %cst_68 = arith.constant 5.000000e-01 : f32
    %182 = vector.broadcast %cst_68 : f32 to vector<16x256xf32>
    %183 = arith.mulf %182, %181 : vector<16x256xf32>
    %cst_69 = arith.constant 4.471500e-02 : f32
    %184 = vector.broadcast %cst_69 : f32 to vector<16x256xf32>
    %185 = arith.mulf %184, %181 : vector<16x256xf32>
    %186 = arith.mulf %185, %181 : vector<16x256xf32>
    %187 = arith.mulf %186, %181 : vector<16x256xf32>
    %188 = arith.addf %181, %187 : vector<16x256xf32>
    %cst_70 = arith.constant 0.797884583 : f32
    %189 = vector.broadcast %cst_70 : f32 to vector<16x256xf32>
    %190 = arith.mulf %189, %188 : vector<16x256xf32>
    %191 = math.tanh %190 : vector<16x256xf32>
    %cst_71 = arith.constant 1.000000e+00 : f32
    %192 = vector.broadcast %cst_71 : f32 to vector<16x256xf32>
    %193 = arith.addf %192, %191 : vector<16x256xf32>
    %194 = arith.mulf %183, %193 : vector<16x256xf32>
    %195 = arith.truncf %194 : vector<16x256xf32> to vector<16x256xbf16>
    %c0_72 = arith.constant 0 : index
    %c0_73 = arith.constant 0 : index
    %196 = vector.load %arg15[%c0_72, %c0_73] : memref<256x128xbf16, #tpu.memory_space<vmem>>, vector<256x128xbf16>
    %cst_74 = arith.constant dense<0.000000e+00> : vector<16x128xf32>
    %197 = tpu.matmul %195, %196, %cst_74 {dimension_numbers = #tpu.dot_dimension_numbers<[1], [0], [0], [1], [0, 0, 1, 1], [], []>} : vector<16x256xbf16>, vector<256x128xbf16>, vector<16x128xf32> -> vector<16x128xf32>
    %c0_75 = arith.constant 0 : index
    %c0_76 = arith.constant 0 : index
    %198 = vector.load %arg16[%c0_75, %c0_76] : memref<1x128xf32, #tpu.memory_space<vmem>>, vector<1x128xf32>
    %199 = vector.broadcast %198 : vector<1x128xf32> to vector<16x128xf32>
    %200 = arith.addf %197, %199 : vector<16x128xf32>
    %201 = arith.addf %153, %200 : vector<16x128xf32>
    %202 = arith.truncf %201 : vector<16x128xf32> to vector<16x128xbf16>
    %c0_77 = arith.constant 0 : index
    %c0_78 = arith.constant 0 : index
    %203 = vector.load %arg17[%c0_77, %c0_78] : memref<128x64xbf16, #tpu.memory_space<vmem>>, vector<128x64xbf16>
    %cst_79 = arith.constant dense<0.000000e+00> : vector<16x64xf32>
    %204 = tpu.matmul %202, %203, %cst_79 {dimension_numbers = #tpu.dot_dimension_numbers<[1], [0], [0], [1], [0, 0, 1, 1], [], []>} : vector<16x128xbf16>, vector<128x64xbf16>, vector<16x64xf32> -> vector<16x64xf32>
    %c0_80 = arith.constant 0 : index
    %c0_81 = arith.constant 0 : index
    %205 = vector.load %arg18[%c0_80, %c0_81] : memref<1x64xf32, #tpu.memory_space<vmem>>, vector<1x64xf32>
    %206 = vector.broadcast %205 : vector<1x64xf32> to vector<16x64xf32>
    %207 = arith.addf %204, %206 : vector<16x64xf32>
    %cst_82 = arith.constant 0.000000e+00 : f32
    %208 = vector.broadcast %cst_82 : f32 to vector<16x64xf32>
    %209 = arith.maximumf %207, %208 : vector<16x64xf32>
    %210 = arith.truncf %209 : vector<16x64xf32> to vector<16x64xbf16>
    %c0_83 = arith.constant 0 : index
    %c0_84 = arith.constant 0 : index
    %211 = vector.load %arg19[%c0_83, %c0_84] : memref<64x128xbf16, #tpu.memory_space<vmem>>, vector<64x128xbf16>
    %cst_85 = arith.constant dense<0.000000e+00> : vector<16x128xf32>
    %212 = tpu.matmul %210, %211, %cst_85 {dimension_numbers = #tpu.dot_dimension_numbers<[1], [0], [0], [1], [0, 0, 1, 1], [], []>} : vector<16x64xbf16>, vector<64x128xbf16>, vector<16x128xf32> -> vector<16x128xf32>
    %c0_86 = arith.constant 0 : index
    %c0_87 = arith.constant 0 : index
    %213 = vector.load %arg20[%c0_86, %c0_87] : memref<1x128xf32, #tpu.memory_space<vmem>>, vector<1x128xf32>
    %214 = vector.broadcast %213 : vector<1x128xf32> to vector<16x128xf32>
    %215 = arith.addf %212, %214 : vector<16x128xf32>
    %216 = arith.addf %215, %201 : vector<16x128xf32>
    %c0_88 = arith.constant 0 : index
    %c0_89 = arith.constant 0 : index
    %217 = vector.load %arg21[%c0_88, %c0_89] : memref<1x128xf32, #tpu.memory_space<vmem>>, vector<1x128xf32>
    %c0_90 = arith.constant 0 : index
    %c0_91 = arith.constant 0 : index
    %218 = vector.load %arg22[%c0_90, %c0_91] : memref<1x128xf32, #tpu.memory_space<vmem>>, vector<1x128xf32>
    %cst_92 = arith.constant dense<0.000000e+00> : vector<16xf32>
    %219 = vector.multi_reduction <add>, %216, %cst_92 [1] : vector<16x128xf32> to vector<16xf32>
    %220 = vector.shape_cast %219 : vector<16xf32> to vector<16x1xf32>
    %cst_93 = arith.constant 1.280000e+02 : f32
    %221 = vector.broadcast %cst_93 : f32 to vector<16x1xf32>
    %222 = arith.divf %220, %221 : vector<16x1xf32>
    %223 = vector.broadcast %222 : vector<16x1xf32> to vector<16x128xf32>
    %224 = arith.subf %216, %223 : vector<16x128xf32>
    %225 = arith.mulf %224, %224 : vector<16x128xf32>
    %cst_94 = arith.constant dense<0.000000e+00> : vector<16xf32>
    %226 = vector.multi_reduction <add>, %225, %cst_94 [1] : vector<16x128xf32> to vector<16xf32>
    %227 = vector.shape_cast %226 : vector<16xf32> to vector<16x1xf32>
    %cst_95 = arith.constant 1.280000e+02 : f32
    %228 = vector.broadcast %cst_95 : f32 to vector<16x1xf32>
    %229 = arith.divf %227, %228 : vector<16x1xf32>
    %cst_96 = arith.constant 9.99999974E-6 : f32
    %230 = vector.broadcast %cst_96 : f32 to vector<16x1xf32>
    %231 = arith.addf %229, %230 : vector<16x1xf32>
    %232 = math.rsqrt %231 : vector<16x1xf32>
    %233 = vector.broadcast %232 : vector<16x1xf32> to vector<16x128xf32>
    %234 = arith.mulf %224, %233 : vector<16x128xf32>
    %235 = vector.broadcast %217 : vector<1x128xf32> to vector<16x128xf32>
    %236 = arith.mulf %234, %235 : vector<16x128xf32>
    %237 = vector.broadcast %218 : vector<1x128xf32> to vector<16x128xf32>
    %238 = arith.addf %236, %237 : vector<16x128xf32>
    %c0_97 = arith.constant 0 : index
    %c0_98 = arith.constant 0 : index
    %239 = vector.load %arg27[%c0_97, %c0_98] : memref<1x128xf32, #tpu.memory_space<vmem>>, vector<1x128xf32>
    %c0_99 = arith.constant 0 : index
    %c0_100 = arith.constant 0 : index
    %240 = vector.load %arg28[%c0_99, %c0_100] : memref<1x128xf32, #tpu.memory_space<vmem>>, vector<1x128xf32>
    %cst_101 = arith.constant dense<0.000000e+00> : vector<16xf32>
    %241 = vector.multi_reduction <add>, %238, %cst_101 [1] : vector<16x128xf32> to vector<16xf32>
    %242 = vector.shape_cast %241 : vector<16xf32> to vector<16x1xf32>
    %cst_102 = arith.constant 1.280000e+02 : f32
    %243 = vector.broadcast %cst_102 : f32 to vector<16x1xf32>
    %244 = arith.divf %242, %243 : vector<16x1xf32>
    %245 = vector.broadcast %244 : vector<16x1xf32> to vector<16x128xf32>
    %246 = arith.subf %238, %245 : vector<16x128xf32>
    %247 = arith.mulf %246, %246 : vector<16x128xf32>
    %cst_103 = arith.constant dense<0.000000e+00> : vector<16xf32>
    %248 = vector.multi_reduction <add>, %247, %cst_103 [1] : vector<16x128xf32> to vector<16xf32>
    %249 = vector.shape_cast %248 : vector<16xf32> to vector<16x1xf32>
    %cst_104 = arith.constant 1.280000e+02 : f32
    %250 = vector.broadcast %cst_104 : f32 to vector<16x1xf32>
    %251 = arith.divf %249, %250 : vector<16x1xf32>
    %cst_105 = arith.constant 9.99999997E-7 : f32
    %252 = vector.broadcast %cst_105 : f32 to vector<16x1xf32>
    %253 = arith.addf %251, %252 : vector<16x1xf32>
    %254 = math.rsqrt %253 : vector<16x1xf32>
    %255 = vector.broadcast %254 : vector<16x1xf32> to vector<16x128xf32>
    %256 = arith.mulf %246, %255 : vector<16x128xf32>
    %257 = vector.broadcast %239 : vector<1x128xf32> to vector<16x128xf32>
    %258 = arith.mulf %256, %257 : vector<16x128xf32>
    %259 = vector.broadcast %240 : vector<1x128xf32> to vector<16x128xf32>
    %260 = arith.addf %258, %259 : vector<16x128xf32>
    %261 = arith.truncf %260 : vector<16x128xf32> to vector<16x128xbf16>
    %c0_106 = arith.constant 0 : index
    %c0_107 = arith.constant 0 : index
    %262 = vector.load %arg23[%c0_106, %c0_107] : memref<128x384xbf16, #tpu.memory_space<vmem>>, vector<128x384xbf16>
    %cst_108 = arith.constant dense<0.000000e+00> : vector<16x384xf32>
    %263 = tpu.matmul %261, %262, %cst_108 {dimension_numbers = #tpu.dot_dimension_numbers<[1], [0], [0], [1], [0, 0, 1, 1], [], []>} : vector<16x128xbf16>, vector<128x384xbf16>, vector<16x384xf32> -> vector<16x384xf32>
    %c0_109 = arith.constant 0 : index
    %c0_110 = arith.constant 0 : index
    %264 = vector.load %arg24[%c0_109, %c0_110] : memref<1x384xf32, #tpu.memory_space<vmem>>, vector<1x384xf32>
    %265 = vector.broadcast %264 : vector<1x384xf32> to vector<16x384xf32>
    %266 = arith.addf %263, %265 : vector<16x384xf32>
    %267 = vector.extract_strided_slice %266 {offsets = [0, 0], sizes = [16, 32], strides = [1, 1]} : vector<16x384xf32> to vector<16x32xf32>
    %cst_111 = arith.constant 0.176776692 : f32
    %268 = vector.broadcast %cst_111 : f32 to vector<16x32xf32>
    %269 = arith.mulf %267, %268 : vector<16x32xf32>
    %270 = vector.shape_cast %269 : vector<16x32xf32> to vector<2x8x32xf32>
    %271 = vector.extract_strided_slice %266 {offsets = [0, 128], sizes = [16, 32], strides = [1, 1]} : vector<16x384xf32> to vector<16x32xf32>
    %272 = vector.shape_cast %271 : vector<16x32xf32> to vector<2x8x32xf32>
    %273 = vector.extract_strided_slice %266 {offsets = [0, 256], sizes = [16, 32], strides = [1, 1]} : vector<16x384xf32> to vector<16x32xf32>
    %274 = vector.shape_cast %273 : vector<16x32xf32> to vector<2x8x32xf32>
    %275 = arith.truncf %270 : vector<2x8x32xf32> to vector<2x8x32xbf16>
    %276 = arith.truncf %272 : vector<2x8x32xf32> to vector<2x8x32xbf16>
    "tpu.trace_start"() <{level = 10 : i32, message = "bqd,bkd->bqk"}> : () -> ()
    %cst_112 = arith.constant dense<0.000000e+00> : vector<2x8x8xf32>
    %277 = tpu.matmul %275, %276, %cst_112 {dimension_numbers = #tpu.dot_dimension_numbers<[2], [2], [1], [1], [0, 0, 0, 1, 1, 1], [0], [0]>} : vector<2x8x32xbf16>, vector<2x8x32xbf16>, vector<2x8x8xf32> -> vector<2x8x8xf32>
    "tpu.trace_stop"() : () -> ()
    %cst_113 = arith.constant dense<0xFF800000> : vector<2x8xf32>
    %278 = vector.multi_reduction <maximumf>, %277, %cst_113 [2] : vector<2x8x8xf32> to vector<2x8xf32>
    %279 = vector.shape_cast %278 : vector<2x8xf32> to vector<2x8x1xf32>
    %280 = vector.broadcast %279 : vector<2x8x1xf32> to vector<2x8x8xf32>
    %281 = arith.subf %277, %280 : vector<2x8x8xf32>
    %282 = math.exp %281 : vector<2x8x8xf32>
    %cst_114 = arith.constant dense<0.000000e+00> : vector<2x8xf32>
    %283 = vector.multi_reduction <add>, %282, %cst_114 [2] : vector<2x8x8xf32> to vector<2x8xf32>
    %284 = vector.shape_cast %283 : vector<2x8xf32> to vector<2x8x1xf32>
    %285 = tpu.reciprocal %284 {approx = true} : vector<2x8x1xf32> -> vector<2x8x1xf32>
    %286 = vector.broadcast %285 : vector<2x8x1xf32> to vector<2x8x8xf32>
    %287 = arith.mulf %282, %286 : vector<2x8x8xf32>
    %288 = arith.truncf %287 : vector<2x8x8xf32> to vector<2x8x8xbf16>
    %289 = arith.truncf %274 : vector<2x8x32xf32> to vector<2x8x32xbf16>
    "tpu.trace_start"() <{level = 10 : i32, message = "bqk,bkd->bqd"}> : () -> ()
    %cst_115 = arith.constant dense<0.000000e+00> : vector<2x8x32xf32>
    %290 = tpu.matmul %288, %289, %cst_115 {dimension_numbers = #tpu.dot_dimension_numbers<[2], [1], [1], [2], [0, 0, 0, 1, 1, 2], [0], [0]>} : vector<2x8x8xbf16>, vector<2x8x32xbf16>, vector<2x8x32xf32> -> vector<2x8x32xf32>
    "tpu.trace_stop"() : () -> ()
    %291 = vector.shape_cast %290 : vector<2x8x32xf32> to vector<16x32xf32>
    %c0_116 = arith.constant 0 : index
    %c0_117 = arith.constant 0 : index
    %292 = vector.load %arg44[%c0_116, %c0_117] : memref<16x128xf32, #tpu.memory_space<vmem>>, vector<16x32xf32>
    tpu.vector_store %arg44[%c0_116, %c0_117], %291 {strides = array<i32>} : memref<16x128xf32, #tpu.memory_space<vmem>>, vector<16x32xf32>,
    %293 = vector.extract_strided_slice %266 {offsets = [0, 32], sizes = [16, 32], strides = [1, 1]} : vector<16x384xf32> to vector<16x32xf32>
    %cst_118 = arith.constant 0.176776692 : f32
    %294 = vector.broadcast %cst_118 : f32 to vector<16x32xf32>
    %295 = arith.mulf %293, %294 : vector<16x32xf32>
    %296 = vector.shape_cast %295 : vector<16x32xf32> to vector<2x8x32xf32>
    %297 = vector.extract_strided_slice %266 {offsets = [0, 160], sizes = [16, 32], strides = [1, 1]} : vector<16x384xf32> to vector<16x32xf32>
    %298 = vector.shape_cast %297 : vector<16x32xf32> to vector<2x8x32xf32>
    %299 = vector.extract_strided_slice %266 {offsets = [0, 288], sizes = [16, 32], strides = [1, 1]} : vector<16x384xf32> to vector<16x32xf32>
    %300 = vector.shape_cast %299 : vector<16x32xf32> to vector<2x8x32xf32>
    %301 = arith.truncf %296 : vector<2x8x32xf32> to vector<2x8x32xbf16>
    %302 = arith.truncf %298 : vector<2x8x32xf32> to vector<2x8x32xbf16>
    "tpu.trace_start"() <{level = 10 : i32, message = "bqd,bkd->bqk"}> : () -> ()
    %cst_119 = arith.constant dense<0.000000e+00> : vector<2x8x8xf32>
    %303 = tpu.matmul %301, %302, %cst_119 {dimension_numbers = #tpu.dot_dimension_numbers<[2], [2], [1], [1], [0, 0, 0, 1, 1, 1], [0], [0]>} : vector<2x8x32xbf16>, vector<2x8x32xbf16>, vector<2x8x8xf32> -> vector<2x8x8xf32>
    "tpu.trace_stop"() : () -> ()
    %cst_120 = arith.constant dense<0xFF800000> : vector<2x8xf32>
    %304 = vector.multi_reduction <maximumf>, %303, %cst_120 [2] : vector<2x8x8xf32> to vector<2x8xf32>
    %305 = vector.shape_cast %304 : vector<2x8xf32> to vector<2x8x1xf32>
    %306 = vector.broadcast %305 : vector<2x8x1xf32> to vector<2x8x8xf32>
    %307 = arith.subf %303, %306 : vector<2x8x8xf32>
    %308 = math.exp %307 : vector<2x8x8xf32>
    %cst_121 = arith.constant dense<0.000000e+00> : vector<2x8xf32>
    %309 = vector.multi_reduction <add>, %308, %cst_121 [2] : vector<2x8x8xf32> to vector<2x8xf32>
    %310 = vector.shape_cast %309 : vector<2x8xf32> to vector<2x8x1xf32>
    %311 = tpu.reciprocal %310 {approx = true} : vector<2x8x1xf32> -> vector<2x8x1xf32>
    %312 = vector.broadcast %311 : vector<2x8x1xf32> to vector<2x8x8xf32>
    %313 = arith.mulf %308, %312 : vector<2x8x8xf32>
    %314 = arith.truncf %313 : vector<2x8x8xf32> to vector<2x8x8xbf16>
    %315 = arith.truncf %300 : vector<2x8x32xf32> to vector<2x8x32xbf16>
    "tpu.trace_start"() <{level = 10 : i32, message = "bqk,bkd->bqd"}> : () -> ()
    %cst_122 = arith.constant dense<0.000000e+00> : vector<2x8x32xf32>
    %316 = tpu.matmul %314, %315, %cst_122 {dimension_numbers = #tpu.dot_dimension_numbers<[2], [1], [1], [2], [0, 0, 0, 1, 1, 2], [0], [0]>} : vector<2x8x8xbf16>, vector<2x8x32xbf16>, vector<2x8x32xf32> -> vector<2x8x32xf32>
    "tpu.trace_stop"() : () -> ()
    %317 = vector.shape_cast %316 : vector<2x8x32xf32> to vector<16x32xf32>
    %c0_123 = arith.constant 0 : index
    %c32_124 = arith.constant 32 : index
    %318 = vector.load %arg44[%c0_123, %c32_124] : memref<16x128xf32, #tpu.memory_space<vmem>>, vector<16x32xf32>
    tpu.vector_store %arg44[%c0_123, %c32_124], %317 {strides = array<i32>} : memref<16x128xf32, #tpu.memory_space<vmem>>, vector<16x32xf32>,
    %319 = vector.extract_strided_slice %266 {offsets = [0, 64], sizes = [16, 32], strides = [1, 1]} : vector<16x384xf32> to vector<16x32xf32>
    %cst_125 = arith.constant 0.176776692 : f32
    %320 = vector.broadcast %cst_125 : f32 to vector<16x32xf32>
    %321 = arith.mulf %319, %320 : vector<16x32xf32>
    %322 = vector.shape_cast %321 : vector<16x32xf32> to vector<2x8x32xf32>
    %323 = vector.extract_strided_slice %266 {offsets = [0, 192], sizes = [16, 32], strides = [1, 1]} : vector<16x384xf32> to vector<16x32xf32>
    %324 = vector.shape_cast %323 : vector<16x32xf32> to vector<2x8x32xf32>
    %325 = vector.extract_strided_slice %266 {offsets = [0, 320], sizes = [16, 32], strides = [1, 1]} : vector<16x384xf32> to vector<16x32xf32>
    %326 = vector.shape_cast %325 : vector<16x32xf32> to vector<2x8x32xf32>
    %327 = arith.truncf %322 : vector<2x8x32xf32> to vector<2x8x32xbf16>
    %328 = arith.truncf %324 : vector<2x8x32xf32> to vector<2x8x32xbf16>
    "tpu.trace_start"() <{level = 10 : i32, message = "bqd,bkd->bqk"}> : () -> ()
    %cst_126 = arith.constant dense<0.000000e+00> : vector<2x8x8xf32>
    %329 = tpu.matmul %327, %328, %cst_126 {dimension_numbers = #tpu.dot_dimension_numbers<[2], [2], [1], [1], [0, 0, 0, 1, 1, 1], [0], [0]>} : vector<2x8x32xbf16>, vector<2x8x32xbf16>, vector<2x8x8xf32> -> vector<2x8x8xf32>
    "tpu.trace_stop"() : () -> ()
    %cst_127 = arith.constant dense<0xFF800000> : vector<2x8xf32>
    %330 = vector.multi_reduction <maximumf>, %329, %cst_127 [2] : vector<2x8x8xf32> to vector<2x8xf32>
    %331 = vector.shape_cast %330 : vector<2x8xf32> to vector<2x8x1xf32>
    %332 = vector.broadcast %331 : vector<2x8x1xf32> to vector<2x8x8xf32>
    %333 = arith.subf %329, %332 : vector<2x8x8xf32>
    %334 = math.exp %333 : vector<2x8x8xf32>
    %cst_128 = arith.constant dense<0.000000e+00> : vector<2x8xf32>
    %335 = vector.multi_reduction <add>, %334, %cst_128 [2] : vector<2x8x8xf32> to vector<2x8xf32>
    %336 = vector.shape_cast %335 : vector<2x8xf32> to vector<2x8x1xf32>
    %337 = tpu.reciprocal %336 {approx = true} : vector<2x8x1xf32> -> vector<2x8x1xf32>
    %338 = vector.broadcast %337 : vector<2x8x1xf32> to vector<2x8x8xf32>
    %339 = arith.mulf %334, %338 : vector<2x8x8xf32>
    %340 = arith.truncf %339 : vector<2x8x8xf32> to vector<2x8x8xbf16>
    %341 = arith.truncf %326 : vector<2x8x32xf32> to vector<2x8x32xbf16>
    "tpu.trace_start"() <{level = 10 : i32, message = "bqk,bkd->bqd"}> : () -> ()
    %cst_129 = arith.constant dense<0.000000e+00> : vector<2x8x32xf32>
    %342 = tpu.matmul %340, %341, %cst_129 {dimension_numbers = #tpu.dot_dimension_numbers<[2], [1], [1], [2], [0, 0, 0, 1, 1, 2], [0], [0]>} : vector<2x8x8xbf16>, vector<2x8x32xbf16>, vector<2x8x32xf32> -> vector<2x8x32xf32>
    "tpu.trace_stop"() : () -> ()
    %343 = vector.shape_cast %342 : vector<2x8x32xf32> to vector<16x32xf32>
    %c0_130 = arith.constant 0 : index
    %c64_131 = arith.constant 64 : index
    %344 = vector.load %arg44[%c0_130, %c64_131] : memref<16x128xf32, #tpu.memory_space<vmem>>, vector<16x32xf32>
    tpu.vector_store %arg44[%c0_130, %c64_131], %343 {strides = array<i32>} : memref<16x128xf32, #tpu.memory_space<vmem>>, vector<16x32xf32>,
    %345 = vector.extract_strided_slice %266 {offsets = [0, 96], sizes = [16, 32], strides = [1, 1]} : vector<16x384xf32> to vector<16x32xf32>
    %cst_132 = arith.constant 0.176776692 : f32
    %346 = vector.broadcast %cst_132 : f32 to vector<16x32xf32>
    %347 = arith.mulf %345, %346 : vector<16x32xf32>
    %348 = vector.shape_cast %347 : vector<16x32xf32> to vector<2x8x32xf32>
    %349 = vector.extract_strided_slice %266 {offsets = [0, 224], sizes = [16, 32], strides = [1, 1]} : vector<16x384xf32> to vector<16x32xf32>
    %350 = vector.shape_cast %349 : vector<16x32xf32> to vector<2x8x32xf32>
    %351 = vector.extract_strided_slice %266 {offsets = [0, 352], sizes = [16, 32], strides = [1, 1]} : vector<16x384xf32> to vector<16x32xf32>
    %352 = vector.shape_cast %351 : vector<16x32xf32> to vector<2x8x32xf32>
    %353 = arith.truncf %348 : vector<2x8x32xf32> to vector<2x8x32xbf16>
    %354 = arith.truncf %350 : vector<2x8x32xf32> to vector<2x8x32xbf16>
    "tpu.trace_start"() <{level = 10 : i32, message = "bqd,bkd->bqk"}> : () -> ()
    %cst_133 = arith.constant dense<0.000000e+00> : vector<2x8x8xf32>
    %355 = tpu.matmul %353, %354, %cst_133 {dimension_numbers = #tpu.dot_dimension_numbers<[2], [2], [1], [1], [0, 0, 0, 1, 1, 1], [0], [0]>} : vector<2x8x32xbf16>, vector<2x8x32xbf16>, vector<2x8x8xf32> -> vector<2x8x8xf32>
    "tpu.trace_stop"() : () -> ()
    %cst_134 = arith.constant dense<0xFF800000> : vector<2x8xf32>
    %356 = vector.multi_reduction <maximumf>, %355, %cst_134 [2] : vector<2x8x8xf32> to vector<2x8xf32>
    %357 = vector.shape_cast %356 : vector<2x8xf32> to vector<2x8x1xf32>
    %358 = vector.broadcast %357 : vector<2x8x1xf32> to vector<2x8x8xf32>
    %359 = arith.subf %355, %358 : vector<2x8x8xf32>
    %360 = math.exp %359 : vector<2x8x8xf32>
    %cst_135 = arith.constant dense<0.000000e+00> : vector<2x8xf32>
    %361 = vector.multi_reduction <add>, %360, %cst_135 [2] : vector<2x8x8xf32> to vector<2x8xf32>
    %362 = vector.shape_cast %361 : vector<2x8xf32> to vector<2x8x1xf32>
    %363 = tpu.reciprocal %362 {approx = true} : vector<2x8x1xf32> -> vector<2x8x1xf32>
    %364 = vector.broadcast %363 : vector<2x8x1xf32> to vector<2x8x8xf32>
    %365 = arith.mulf %360, %364 : vector<2x8x8xf32>
    %366 = arith.truncf %365 : vector<2x8x8xf32> to vector<2x8x8xbf16>
    %367 = arith.truncf %352 : vector<2x8x32xf32> to vector<2x8x32xbf16>
    "tpu.trace_start"() <{level = 10 : i32, message = "bqk,bkd->bqd"}> : () -> ()
    %cst_136 = arith.constant dense<0.000000e+00> : vector<2x8x32xf32>
    %368 = tpu.matmul %366, %367, %cst_136 {dimension_numbers = #tpu.dot_dimension_numbers<[2], [1], [1], [2], [0, 0, 0, 1, 1, 2], [0], [0]>} : vector<2x8x8xbf16>, vector<2x8x32xbf16>, vector<2x8x32xf32> -> vector<2x8x32xf32>
    "tpu.trace_stop"() : () -> ()
    %369 = vector.shape_cast %368 : vector<2x8x32xf32> to vector<16x32xf32>
    %c0_137 = arith.constant 0 : index
    %c96_138 = arith.constant 96 : index
    %370 = vector.load %arg44[%c0_137, %c96_138] : memref<16x128xf32, #tpu.memory_space<vmem>>, vector<16x32xf32>
    tpu.vector_store %arg44[%c0_137, %c96_138], %369 {strides = array<i32>} : memref<16x128xf32, #tpu.memory_space<vmem>>, vector<16x32xf32>,
    %c0_139 = arith.constant 0 : index
    %c0_140 = arith.constant 0 : index
    %371 = vector.load %arg44[%c0_139, %c0_140] : memref<16x128xf32, #tpu.memory_space<vmem>>, vector<16x128xf32>
    %372 = arith.truncf %371 : vector<16x128xf32> to vector<16x128xbf16>
    %c0_141 = arith.constant 0 : index
    %c0_142 = arith.constant 0 : index
    %373 = vector.load %arg25[%c0_141, %c0_142] : memref<128x128xbf16, #tpu.memory_space<vmem>>, vector<128x128xbf16>
    %cst_143 = arith.constant dense<0.000000e+00> : vector<16x128xf32>
    %374 = tpu.matmul %372, %373, %cst_143 {dimension_numbers = #tpu.dot_dimension_numbers<[1], [0], [0], [1], [0, 0, 1, 1], [], []>} : vector<16x128xbf16>, vector<128x128xbf16>, vector<16x128xf32> -> vector<16x128xf32>
    %c0_144 = arith.constant 0 : index
    %c0_145 = arith.constant 0 : index
    %375 = vector.load %arg26[%c0_144, %c0_145] : memref<1x128xf32, #tpu.memory_space<vmem>>, vector<1x128xf32>
    %376 = vector.broadcast %375 : vector<1x128xf32> to vector<16x128xf32>
    %377 = arith.addf %374, %376 : vector<16x128xf32>
    %378 = arith.addf %238, %377 : vector<16x128xf32>
    %c0_146 = arith.constant 0 : index
    %c0_147 = arith.constant 0 : index
    %379 = vector.load %arg29[%c0_146, %c0_147] : memref<1x128xf32, #tpu.memory_space<vmem>>, vector<1x128xf32>
    %c0_148 = arith.constant 0 : index
    %c0_149 = arith.constant 0 : index
    %380 = vector.load %arg30[%c0_148, %c0_149] : memref<1x128xf32, #tpu.memory_space<vmem>>, vector<1x128xf32>
    %cst_150 = arith.constant dense<0.000000e+00> : vector<16xf32>
    %381 = vector.multi_reduction <add>, %378, %cst_150 [1] : vector<16x128xf32> to vector<16xf32>
    %382 = vector.shape_cast %381 : vector<16xf32> to vector<16x1xf32>
    %cst_151 = arith.constant 1.280000e+02 : f32
    %383 = vector.broadcast %cst_151 : f32 to vector<16x1xf32>
    %384 = arith.divf %382, %383 : vector<16x1xf32>
    %385 = vector.broadcast %384 : vector<16x1xf32> to vector<16x128xf32>
    %386 = arith.subf %378, %385 : vector<16x128xf32>
    %387 = arith.mulf %386, %386 : vector<16x128xf32>
    %cst_152 = arith.constant dense<0.000000e+00> : vector<16xf32>
    %388 = vector.multi_reduction <add>, %387, %cst_152 [1] : vector<16x128xf32> to vector<16xf32>
    %389 = vector.shape_cast %388 : vector<16xf32> to vector<16x1xf32>
    %cst_153 = arith.constant 1.280000e+02 : f32
    %390 = vector.broadcast %cst_153 : f32 to vector<16x1xf32>
    %391 = arith.divf %389, %390 : vector<16x1xf32>
    %cst_154 = arith.constant 9.99999997E-7 : f32
    %392 = vector.broadcast %cst_154 : f32 to vector<16x1xf32>
    %393 = arith.addf %391, %392 : vector<16x1xf32>
    %394 = math.rsqrt %393 : vector<16x1xf32>
    %395 = vector.broadcast %394 : vector<16x1xf32> to vector<16x128xf32>
    %396 = arith.mulf %386, %395 : vector<16x128xf32>
    %397 = vector.broadcast %379 : vector<1x128xf32> to vector<16x128xf32>
    %398 = arith.mulf %396, %397 : vector<16x128xf32>
    %399 = vector.broadcast %380 : vector<1x128xf32> to vector<16x128xf32>
    %400 = arith.addf %398, %399 : vector<16x128xf32>
    %401 = arith.truncf %400 : vector<16x128xf32> to vector<16x128xbf16>
    %c0_155 = arith.constant 0 : index
    %c0_156 = arith.constant 0 : index
    %402 = vector.load %arg31[%c0_155, %c0_156] : memref<128x256xbf16, #tpu.memory_space<vmem>>, vector<128x256xbf16>
    %cst_157 = arith.constant dense<0.000000e+00> : vector<16x256xf32>
    %403 = tpu.matmul %401, %402, %cst_157 {dimension_numbers = #tpu.dot_dimension_numbers<[1], [0], [0], [1], [0, 0, 1, 1], [], []>} : vector<16x128xbf16>, vector<128x256xbf16>, vector<16x256xf32> -> vector<16x256xf32>
    %c0_158 = arith.constant 0 : index
    %c0_159 = arith.constant 0 : index
    %404 = vector.load %arg32[%c0_158, %c0_159] : memref<1x256xf32, #tpu.memory_space<vmem>>, vector<1x256xf32>
    %405 = vector.broadcast %404 : vector<1x256xf32> to vector<16x256xf32>
    %406 = arith.addf %403, %405 : vector<16x256xf32>
    %cst_160 = arith.constant 5.000000e-01 : f32
    %407 = vector.broadcast %cst_160 : f32 to vector<16x256xf32>
    %408 = arith.mulf %407, %406 : vector<16x256xf32>
    %cst_161 = arith.constant 4.471500e-02 : f32
    %409 = vector.broadcast %cst_161 : f32 to vector<16x256xf32>
    %410 = arith.mulf %409, %406 : vector<16x256xf32>
    %411 = arith.mulf %410, %406 : vector<16x256xf32>
    %412 = arith.mulf %411, %406 : vector<16x256xf32>
    %413 = arith.addf %406, %412 : vector<16x256xf32>
    %cst_162 = arith.constant 0.797884583 : f32
    %414 = vector.broadcast %cst_162 : f32 to vector<16x256xf32>
    %415 = arith.mulf %414, %413 : vector<16x256xf32>
    %416 = math.tanh %415 : vector<16x256xf32>
    %cst_163 = arith.constant 1.000000e+00 : f32
    %417 = vector.broadcast %cst_163 : f32 to vector<16x256xf32>
    %418 = arith.addf %417, %416 : vector<16x256xf32>
    %419 = arith.mulf %408, %418 : vector<16x256xf32>
    %420 = arith.truncf %419 : vector<16x256xf32> to vector<16x256xbf16>
    %c0_164 = arith.constant 0 : index
    %c0_165 = arith.constant 0 : index
    %421 = vector.load %arg33[%c0_164, %c0_165] : memref<256x128xbf16, #tpu.memory_space<vmem>>, vector<256x128xbf16>
    %cst_166 = arith.constant dense<0.000000e+00> : vector<16x128xf32>
    %422 = tpu.matmul %420, %421, %cst_166 {dimension_numbers = #tpu.dot_dimension_numbers<[1], [0], [0], [1], [0, 0, 1, 1], [], []>} : vector<16x256xbf16>, vector<256x128xbf16>, vector<16x128xf32> -> vector<16x128xf32>
    %c0_167 = arith.constant 0 : index
    %c0_168 = arith.constant 0 : index
    %423 = vector.load %arg34[%c0_167, %c0_168] : memref<1x128xf32, #tpu.memory_space<vmem>>, vector<1x128xf32>
    %424 = vector.broadcast %423 : vector<1x128xf32> to vector<16x128xf32>
    %425 = arith.addf %422, %424 : vector<16x128xf32>
    %426 = arith.addf %378, %425 : vector<16x128xf32>
    %427 = arith.truncf %426 : vector<16x128xf32> to vector<16x128xbf16>
    %c0_169 = arith.constant 0 : index
    %c0_170 = arith.constant 0 : index
    %428 = vector.load %arg35[%c0_169, %c0_170] : memref<128x64xbf16, #tpu.memory_space<vmem>>, vector<128x64xbf16>
    %cst_171 = arith.constant dense<0.000000e+00> : vector<16x64xf32>
    %429 = tpu.matmul %427, %428, %cst_171 {dimension_numbers = #tpu.dot_dimension_numbers<[1], [0], [0], [1], [0, 0, 1, 1], [], []>} : vector<16x128xbf16>, vector<128x64xbf16>, vector<16x64xf32> -> vector<16x64xf32>
    %c0_172 = arith.constant 0 : index
    %c0_173 = arith.constant 0 : index
    %430 = vector.load %arg36[%c0_172, %c0_173] : memref<1x64xf32, #tpu.memory_space<vmem>>, vector<1x64xf32>
    %431 = vector.broadcast %430 : vector<1x64xf32> to vector<16x64xf32>
    %432 = arith.addf %429, %431 : vector<16x64xf32>
    %cst_174 = arith.constant 0.000000e+00 : f32
    %433 = vector.broadcast %cst_174 : f32 to vector<16x64xf32>
    %434 = arith.maximumf %432, %433 : vector<16x64xf32>
    %435 = arith.truncf %434 : vector<16x64xf32> to vector<16x64xbf16>
    %c0_175 = arith.constant 0 : index
    %c0_176 = arith.constant 0 : index
    %436 = vector.load %arg37[%c0_175, %c0_176] : memref<64x128xbf16, #tpu.memory_space<vmem>>, vector<64x128xbf16>
    %cst_177 = arith.constant dense<0.000000e+00> : vector<16x128xf32>
    %437 = tpu.matmul %435, %436, %cst_177 {dimension_numbers = #tpu.dot_dimension_numbers<[1], [0], [0], [1], [0, 0, 1, 1], [], []>} : vector<16x64xbf16>, vector<64x128xbf16>, vector<16x128xf32> -> vector<16x128xf32>
    %c0_178 = arith.constant 0 : index
    %c0_179 = arith.constant 0 : index
    %438 = vector.load %arg38[%c0_178, %c0_179] : memref<1x128xf32, #tpu.memory_space<vmem>>, vector<1x128xf32>
    %439 = vector.broadcast %438 : vector<1x128xf32> to vector<16x128xf32>
    %440 = arith.addf %437, %439 : vector<16x128xf32>
    %441 = arith.addf %440, %426 : vector<16x128xf32>
    %c0_180 = arith.constant 0 : index
    %c0_181 = arith.constant 0 : index
    %442 = vector.load %arg39[%c0_180, %c0_181] : memref<1x128xf32, #tpu.memory_space<vmem>>, vector<1x128xf32>
    %c0_182 = arith.constant 0 : index
    %c0_183 = arith.constant 0 : index
    %443 = vector.load %arg40[%c0_182, %c0_183] : memref<1x128xf32, #tpu.memory_space<vmem>>, vector<1x128xf32>
    %cst_184 = arith.constant dense<0.000000e+00> : vector<16xf32>
    %444 = vector.multi_reduction <add>, %441, %cst_184 [1] : vector<16x128xf32> to vector<16xf32>
    %445 = vector.shape_cast %444 : vector<16xf32> to vector<16x1xf32>
    %cst_185 = arith.constant 1.280000e+02 : f32
    %446 = vector.broadcast %cst_185 : f32 to vector<16x1xf32>
    %447 = arith.divf %445, %446 : vector<16x1xf32>
    %448 = vector.broadcast %447 : vector<16x1xf32> to vector<16x128xf32>
    %449 = arith.subf %441, %448 : vector<16x128xf32>
    %450 = arith.mulf %449, %449 : vector<16x128xf32>
    %cst_186 = arith.constant dense<0.000000e+00> : vector<16xf32>
    %451 = vector.multi_reduction <add>, %450, %cst_186 [1] : vector<16x128xf32> to vector<16xf32>
    %452 = vector.shape_cast %451 : vector<16xf32> to vector<16x1xf32>
    %cst_187 = arith.constant 1.280000e+02 : f32
    %453 = vector.broadcast %cst_187 : f32 to vector<16x1xf32>
    %454 = arith.divf %452, %453 : vector<16x1xf32>
    %cst_188 = arith.constant 9.99999974E-6 : f32
    %455 = vector.broadcast %cst_188 : f32 to vector<16x1xf32>
    %456 = arith.addf %454, %455 : vector<16x1xf32>
    %457 = math.rsqrt %456 : vector<16x1xf32>
    %458 = vector.broadcast %457 : vector<16x1xf32> to vector<16x128xf32>
    %459 = arith.mulf %449, %458 : vector<16x128xf32>
    %460 = vector.broadcast %442 : vector<1x128xf32> to vector<16x128xf32>
    %461 = arith.mulf %459, %460 : vector<16x128xf32>
    %462 = vector.broadcast %443 : vector<1x128xf32> to vector<16x128xf32>
    %463 = arith.addf %461, %462 : vector<16x128xf32>
    %464 = arith.truncf %463 : vector<16x128xf32> to vector<16x128xbf16>
    %c0_189 = arith.constant 0 : index
    %c0_190 = arith.constant 0 : index
    %465 = vector.load %arg41[%c0_189, %c0_190] : memref<128x128xbf16, #tpu.memory_space<vmem>>, vector<128x128xbf16>
    %cst_191 = arith.constant dense<0.000000e+00> : vector<16x128xf32>
    %466 = tpu.matmul %464, %465, %cst_191 {dimension_numbers = #tpu.dot_dimension_numbers<[1], [0], [0], [1], [0, 0, 1, 1], [], []>} : vector<16x128xbf16>, vector<128x128xbf16>, vector<16x128xf32> -> vector<16x128xf32>
    %c0_192 = arith.constant 0 : index
    %c0_193 = arith.constant 0 : index
    %467 = vector.load %arg42[%c0_192, %c0_193] : memref<1x128xf32, #tpu.memory_space<vmem>>, vector<1x128xf32>
    %468 = vector.broadcast %467 : vector<1x128xf32> to vector<16x128xf32>
    %469 = arith.addf %466, %468 : vector<16x128xf32>
    %470 = vector.shape_cast %469 : vector<16x128xf32> to vector<2x8x128xf32>
    %c0_194 = arith.constant 0 : index
    %c0_195 = arith.constant 0 : index
    %c0_196 = arith.constant 0 : index
    %471 = vector.load %arg43[%c0_194, %c0_195, %c0_196] : memref<2x8x128xf32, #tpu.memory_space<vmem>>, vector<2x8x128xf32>
    tpu.vector_store %arg43[%c0_194, %c0_195, %c0_196], %470 {strides = array<i32>} : memref<2x8x128xf32, #tpu.memory_space<vmem>>, vector<2x8x128xf32>,
    return
  }
  func.func @transform_0(%arg0: i32) -> (i32, i32, i32) {
    %c0_i32 = arith.constant 0 : i32
    %c0_i32_0 = arith.constant 0 : i32
    %c0_i32_1 = arith.constant 0 : i32
    return %arg0, %c0_i32, %c0_i32_0 : i32, i32, i32
  }
  func.func @transform_1(%arg0: i32) -> (i32, i32) {
    %c0_i32 = arith.constant 0 : i32
    %c0_i32_0 = arith.constant 0 : i32
    %c0_i32_1 = arith.constant 0 : i32
    return %c0_i32, %c0_i32_0 : i32, i32
  }
  func.func @transform_2(%arg0: i32) -> (i32, i32) {
    %c0_i32 = arith.constant 0 : i32
    %c0_i32_0 = arith.constant 0 : i32
    %c0_i32_1 = arith.constant 0 : i32
    return %c0_i32, %c0_i32_0 : i32, i32
  }
  func.func @transform_3(%arg0: i32) -> (i32, i32) {
    %c0_i32 = arith.constant 0 : i32
    %c0_i32_0 = arith.constant 0 : i32
    %c0_i32_1 = arith.constant 0 : i32
    return %c0_i32, %c0_i32_0 : i32, i32
  }
  func.func @transform_4(%arg0: i32) -> (i32, i32) {
    %c0_i32 = arith.constant 0 : i32
    %c0_i32_0 = arith.constant 0 : i32
    %c0_i32_1 = arith.constant 0 : i32
    return %c0_i32, %c0_i32_0 : i32, i32
  }
  func.func @transform_5(%arg0: i32) -> (i32, i32) {
    %c0_i32 = arith.constant 0 : i32
    %c0_i32_0 = arith.constant 0 : i32
    %c0_i32_1 = arith.constant 0 : i32
    return %c0_i32, %c0_i32_0 : i32, i32
  }
  func.func @transform_6(%arg0: i32) -> (i32, i32) {
    %c0_i32 = arith.constant 0 : i32
    %c0_i32_0 = arith.constant 0 : i32
    %c0_i32_1 = arith.constant 0 : i32
    return %c0_i32, %c0_i32_0 : i32, i32
  }
  func.func @transform_7(%arg0: i32) -> (i32, i32) {
    %c0_i32 = arith.constant 0 : i32
    %c0_i32_0 = arith.constant 0 : i32
    %c0_i32_1 = arith.constant 0 : i32
    return %c0_i32, %c0_i32_0 : i32, i32
  }
  func.func @transform_8(%arg0: i32) -> (i32, i32) {
    %c0_i32 = arith.constant 0 : i32
    %c0_i32_0 = arith.constant 0 : i32
    %c0_i32_1 = arith.constant 0 : i32
    return %c0_i32, %c0_i32_0 : i32, i32
  }
  func.func @transform_9(%arg0: i32) -> (i32, i32) {
    %c0_i32 = arith.constant 0 : i32
    %c0_i32_0 = arith.constant 0 : i32
    %c0_i32_1 = arith.constant 0 : i32
    return %c0_i32, %c0_i32_0 : i32, i32
  }
  func.func @transform_10(%arg0: i32) -> (i32, i32) {
    %c0_i32 = arith.constant 0 : i32
    %c0_i32_0 = arith.constant 0 : i32
    %c0_i32_1 = arith.constant 0 : i32
    return %c0_i32, %c0_i32_0 : i32, i32
  }
  func.func @transform_11(%arg0: i32) -> (i32, i32) {
    %c0_i32 = arith.constant 0 : i32
    %c0_i32_0 = arith.constant 0 : i32
    %c0_i32_1 = arith.constant 0 : i32
    return %c0_i32, %c0_i32_0 : i32, i32
  }
  func.func @transform_12(%arg0: i32) -> (i32, i32) {
    %c0_i32 = arith.constant 0 : i32
    %c0_i32_0 = arith.constant 0 : i32
    %c0_i32_1 = arith.constant 0 : i32
    return %c0_i32, %c0_i32_0 : i32, i32
  }
  func.func @transform_13(%arg0: i32) -> (i32, i32) {
    %c0_i32 = arith.constant 0 : i32
    %c0_i32_0 = arith.constant 0 : i32
    %c0_i32_1 = arith.constant 0 : i32
    return %c0_i32, %c0_i32_0 : i32, i32
  }
  func.func @transform_14(%arg0: i32) -> (i32, i32) {
    %c0_i32 = arith.constant 0 : i32
    %c0_i32_0 = arith.constant 0 : i32
    %c0_i32_1 = arith.constant 0 : i32
    return %c0_i32, %c0_i32_0 : i32, i32
  }
  func.func @transform_15(%arg0: i32) -> (i32, i32) {
    %c0_i32 = arith.constant 0 : i32
    %c0_i32_0 = arith.constant 0 : i32
    %c0_i32_1 = arith.constant 0 : i32
    return %c0_i32, %c0_i32_0 : i32, i32
  }
  func.func @transform_16(%arg0: i32) -> (i32, i32) {
    %c0_i32 = arith.constant 0 : i32
    %c0_i32_0 = arith.constant 0 : i32
    %c0_i32_1 = arith.constant 0 : i32
    return %c0_i32, %c0_i32_0 : i32, i32
  }
  func.func @transform_17(%arg0: i32) -> (i32, i32) {
    %c0_i32 = arith.constant 0 : i32
    %c0_i32_0 = arith.constant 0 : i32
    %c0_i32_1 = arith.constant 0 : i32
    return %c0_i32, %c0_i32_0 : i32, i32
  }
  func.func @transform_18(%arg0: i32) -> (i32, i32) {
    %c0_i32 = arith.constant 0 : i32
    %c0_i32_0 = arith.constant 0 : i32
    %c0_i32_1 = arith.constant 0 : i32
    return %c0_i32, %c0_i32_0 : i32, i32
  }
  func.func @transform_19(%arg0: i32) -> (i32, i32) {
    %c0_i32 = arith.constant 0 : i32
    %c0_i32_0 = arith.constant 0 : i32
    %c0_i32_1 = arith.constant 0 : i32
    return %c0_i32, %c0_i32_0 : i32, i32
  }
  func.func @transform_20(%arg0: i32) -> (i32, i32) {
    %c0_i32 = arith.constant 0 : i32
    %c0_i32_0 = arith.constant 0 : i32
    %c0_i32_1 = arith.constant 0 : i32
    return %c0_i32, %c0_i32_0 : i32, i32
  }
  func.func @transform_21(%arg0: i32) -> (i32, i32) {
    %c0_i32 = arith.constant 0 : i32
    %c0_i32_0 = arith.constant 0 : i32
    %c0_i32_1 = arith.constant 0 : i32
    return %c0_i32, %c0_i32_0 : i32, i32
  }
  func.func @transform_22(%arg0: i32) -> (i32, i32) {
    %c0_i32 = arith.constant 0 : i32
    %c0_i32_0 = arith.constant 0 : i32
    %c0_i32_1 = arith.constant 0 : i32
    return %c0_i32, %c0_i32_0 : i32, i32
  }
  func.func @transform_23(%arg0: i32) -> (i32, i32) {
    %c0_i32 = arith.constant 0 : i32
    %c0_i32_0 = arith.constant 0 : i32
    %c0_i32_1 = arith.constant 0 : i32
    return %c0_i32, %c0_i32_0 : i32, i32
  }
  func.func @transform_24(%arg0: i32) -> (i32, i32) {
    %c0_i32 = arith.constant 0 : i32
    %c0_i32_0 = arith.constant 0 : i32
    %c0_i32_1 = arith.constant 0 : i32
    return %c0_i32, %c0_i32_0 : i32, i32
  }
  func.func @transform_25(%arg0: i32) -> (i32, i32) {
    %c0_i32 = arith.constant 0 : i32
    %c0_i32_0 = arith.constant 0 : i32
    %c0_i32_1 = arith.constant 0 : i32
    return %c0_i32, %c0_i32_0 : i32, i32
  }
  func.func @transform_26(%arg0: i32) -> (i32, i32) {
    %c0_i32 = arith.constant 0 : i32
    %c0_i32_0 = arith.constant 0 : i32
    %c0_i32_1 = arith.constant 0 : i32
    return %c0_i32, %c0_i32_0 : i32, i32
  }
  func.func @transform_27(%arg0: i32) -> (i32, i32) {
    %c0_i32 = arith.constant 0 : i32
    %c0_i32_0 = arith.constant 0 : i32
    %c0_i32_1 = arith.constant 0 : i32
    return %c0_i32, %c0_i32_0 : i32, i32
  }
  func.func @transform_28(%arg0: i32) -> (i32, i32) {
    %c0_i32 = arith.constant 0 : i32
    %c0_i32_0 = arith.constant 0 : i32
    %c0_i32_1 = arith.constant 0 : i32
    return %c0_i32, %c0_i32_0 : i32, i32
  }
  func.func @transform_29(%arg0: i32) -> (i32, i32) {
    %c0_i32 = arith.constant 0 : i32
    %c0_i32_0 = arith.constant 0 : i32
    %c0_i32_1 = arith.constant 0 : i32
    return %c0_i32, %c0_i32_0 : i32, i32
  }
  func.func @transform_30(%arg0: i32) -> (i32, i32) {
    %c0_i32 = arith.constant 0 : i32
    %c0_i32_0 = arith.constant 0 : i32
    %c0_i32_1 = arith.constant 0 : i32
    return %c0_i32, %c0_i32_0 : i32, i32
  }
  func.func @transform_31(%arg0: i32) -> (i32, i32) {
    %c0_i32 = arith.constant 0 : i32
    %c0_i32_0 = arith.constant 0 : i32
    %c0_i32_1 = arith.constant 0 : i32
    return %c0_i32, %c0_i32_0 : i32, i32
  }
  func.func @transform_32(%arg0: i32) -> (i32, i32) {
    %c0_i32 = arith.constant 0 : i32
    %c0_i32_0 = arith.constant 0 : i32
    %c0_i32_1 = arith.constant 0 : i32
    return %c0_i32, %c0_i32_0 : i32, i32
  }
  func.func @transform_33(%arg0: i32) -> (i32, i32) {
    %c0_i32 = arith.constant 0 : i32
    %c0_i32_0 = arith.constant 0 : i32
    %c0_i32_1 = arith.constant 0 : i32
    return %c0_i32, %c0_i32_0 : i32, i32
  }
  func.func @transform_34(%arg0: i32) -> (i32, i32) {
    %c0_i32 = arith.constant 0 : i32
    %c0_i32_0 = arith.constant 0 : i32
    %c0_i32_1 = arith.constant 0 : i32
    return %c0_i32, %c0_i32_0 : i32, i32
  }
  func.func @transform_35(%arg0: i32) -> (i32, i32) {
    %c0_i32 = arith.constant 0 : i32
    %c0_i32_0 = arith.constant 0 : i32
    %c0_i32_1 = arith.constant 0 : i32
    return %c0_i32, %c0_i32_0 : i32, i32
  }
  func.func @transform_36(%arg0: i32) -> (i32, i32) {
    %c0_i32 = arith.constant 0 : i32
    %c0_i32_0 = arith.constant 0 : i32
    %c0_i32_1 = arith.constant 0 : i32
    return %c0_i32, %c0_i32_0 : i32, i32
  }
  func.func @transform_37(%arg0: i32) -> (i32, i32) {
    %c0_i32 = arith.constant 0 : i32
    %c0_i32_0 = arith.constant 0 : i32
    %c0_i32_1 = arith.constant 0 : i32
    return %c0_i32, %c0_i32_0 : i32, i32
  }
  func.func @transform_38(%arg0: i32) -> (i32, i32) {
    %c0_i32 = arith.constant 0 : i32
    %c0_i32_0 = arith.constant 0 : i32
    %c0_i32_1 = arith.constant 0 : i32
    return %c0_i32, %c0_i32_0 : i32, i32
  }
  func.func @transform_39(%arg0: i32) -> (i32, i32) {
    %c0_i32 = arith.constant 0 : i32
    %c0_i32_0 = arith.constant 0 : i32
    %c0_i32_1 = arith.constant 0 : i32
    return %c0_i32, %c0_i32_0 : i32, i32
  }
  func.func @transform_40(%arg0: i32) -> (i32, i32) {
    %c0_i32 = arith.constant 0 : i32
    %c0_i32_0 = arith.constant 0 : i32
    %c0_i32_1 = arith.constant 0 : i32
    return %c0_i32, %c0_i32_0 : i32, i32
  }
  func.func @transform_41(%arg0: i32) -> (i32, i32) {
    %c0_i32 = arith.constant 0 : i32
    %c0_i32_0 = arith.constant 0 : i32
    %c0_i32_1 = arith.constant 0 : i32
    return %c0_i32, %c0_i32_0 : i32, i32
  }
  func.func @transform_42(%arg0: i32) -> (i32, i32, i32) {
    %c0_i32 = arith.constant 0 : i32
    %c0_i32_0 = arith.constant 0 : i32
    %c0_i32_1 = arith.constant 0 : i32
    return %arg0, %c0_i32, %c0_i32_0 : i32, i32, i32
  }
}

</mosaic_0001>

<bundles_post_ra>
// kernel: atmospheric_model_forward.1
= control target key start
LH: loop header
LB: loop body
LE: loop exit
PB: predicated region body
PF: predicated region fallthrough
CT: control target
= control target key end

     0   :  { %s4254_s6 = smov 1   ;;  %s4255_s10 = smov 2   ;;  %s5102_s0 = inlined_call_operand.smem [shape: u32[43], index: -1, kind: input, shape index: {}] }
   0x1   :  { %s4311_s5 = sld [smem:[%s5102_s0]]   ;;  %s4256_s14 = smov 3  }
   0x2   :  { %s4316_s9 = sld [smem:[%s5102_s0 + %s4254_s6]]   ;;  %s4257_s18 = smov 4  }
   0x3   :  { %s4321_s13 = sld [smem:[%s5102_s0 + %s4255_s10]]   ;;  %s4258_s22 = smov 5  }
   0x4   :  { %s4326_s17 = sld [smem:[%s5102_s0 + %s4256_s14]]   ;;  %s4259_s26 = smov 6  }
   0x5   :  { %s4331_s21 = sld [smem:[%s5102_s0 + %s4257_s18]]   ;;  %s4260_s30 = smov 7  }
   0x6   :  { %s4336_s25 = sld [smem:[%s5102_s0 + %s4258_s22]]   ;;  %s4261_s4 = smov 8  }
   0x7   :  { %s4341_s29 = sld [smem:[%s5102_s0 + %s4259_s26]]   ;;  %s4262_s10 = smov 9  }
   0x8   :  { %s4346_s3 = sld [smem:[%s5102_s0 + %s4260_s30]]   ;;  %s4263_s15 = smov 10  }
   0x9   :  { %s4351_s8 = sld [smem:[%s5102_s0 + %s4261_s4]]   ;;  %s4264_s20 = smov 11  }
   0xa   :  { %s4356_s14 = sld [smem:[%s5102_s0 + %s4262_s10]]   ;;  %s4265_s26 = smov 12  }
   0xb   :  { %s4361_s19 = sld [smem:[%s5102_s0 + %s4263_s15]]   ;;  %s4266_s1 = smov 13  }
   0xc   :  { %s4366_s24 = sld [smem:[%s5102_s0 + %s4264_s20]]   ;;  %s4267_s7 = smov 14  }
   0xd   :  { %s4371_s30 = sld [smem:[%s5102_s0 + %s4265_s26]]   ;;  %s4268_s15 = smov 15  }
   0xe   :  { %s4376_s6 = sld [smem:[%s5102_s0 + %s4266_s1]]   ;;  %s4269_s22 = smov 16  }
   0xf   :  { %s4381_s12 = sld [smem:[%s5102_s0 + %s4267_s7]]   ;;  %s4270_s28 = smov 17  }
  0x10   :  { %s4386_s20 = sld [smem:[%s5102_s0 + %s4268_s15]]   ;;  %s4271_s7 = smov 18  }
  0x11   :  { %s4391_s27 = sld [smem:[%s5102_s0 + %s4269_s22]]   ;;  %s4272_s15 = smov 19  }
  0x12   :  { %s4396_s4 = sld [smem:[%s5102_s0 + %s4270_s28]]   ;;  %s4273_s22 = smov 20  }
  0x13   :  { %s4274_s28 = smov 21  }
  0x14   :  { %5111 = sst [smem:[#allocation6_spill]] %s4376_s6 }
  0x15   :  { %s4401_s6 = sld [smem:[%s5102_s0 + %s4271_s7]]   ;;  %s4275_s7 = smov 22  }
  0x16   :  { %5112 = sst [smem:[#allocation7_spill]] %s4386_s20 }
  0x17   :  { %5113 = sst [smem:[#allocation8_spill]] %s4391_s27 }
  0x18   :  { %5114 = sst [smem:[#allocation9_spill]] %s4396_s4 }
  0x19   :  { %s4406_s20 = sld [smem:[%s5102_s0 + %s4272_s15]]   ;;  %s4276_s15 = smov 23  }
  0x1a   :  { %s4411_s27 = sld [smem:[%s5102_s0 + %s4273_s22]]   ;;  %s4277_s22 = smov 24  }
  0x1b   :  { %5115 = sst [smem:[#allocation10_spill]] %s4401_s6 }
  0x1c   :  { %s4416_s4 = sld [smem:[%s5102_s0 + %s4274_s28]]   ;;  %s4278_s28 = smov 25  }
  0x1d   :  { %s4421_s6 = sld [smem:[%s5102_s0 + %s4275_s7]]   ;;  %s4279_s7 = smov 26  }
  0x1f   :  { %5116 = sst [smem:[#allocation11_spill]] %s4406_s20 }
  0x20   :  { %5117 = sst [smem:[#allocation12_spill]] %s4411_s27 }
  0x21   :  { %s4426_s20 = sld [smem:[%s5102_s0 + %s4276_s15]]   ;;  %s4280_s15 = smov 27  }
  0x22   :  { %5118 = sst [smem:[#allocation13_spill]] %s4416_s4 }
  0x23   :  { %5119 = sst [smem:[#allocation14_spill]] %s4421_s6 }
  0x24   :  { %s4431_s27 = sld [smem:[%s5102_s0 + %s4277_s22]]   ;;  %s4281_s22 = smov 28  }
  0x25   :  { %s4436_s4 = sld [smem:[%s5102_s0 + %s4278_s28]]   ;;  %s4282_s28 = smov 29  }
  0x26   :  { %s4441_s6 = sld [smem:[%s5102_s0 + %s4279_s7]]   ;;  %s4283_s7 = smov 30  }
  0x27   :  { %5120 = sst [smem:[#allocation15_spill]] %s4426_s20 }
  0x28   :  { %s4446_s20 = sld [smem:[%s5102_s0 + %s4280_s15]]   ;;  %s4284_s15 = smov 31  }
  0x2a   :  { %5121 = sst [smem:[#allocation16_spill]] %s4431_s27 }
  0x2b   :  { %5122 = sst [smem:[#allocation17_spill]] %s4436_s4 }
  0x2c   :  { %5123 = sst [smem:[#allocation18_spill]] %s4441_s6 }
  0x2d   :  { %s4451_s27 = sld [smem:[%s5102_s0 + %s4281_s22]]   ;;  %s4285_s22 = smov 32  }
  0x2e   :  { %5124 = sst [smem:[#allocation19_spill]] %s4446_s20 }
  0x2f   :  { %s4456_s4 = sld [smem:[%s5102_s0 + %s4282_s28]]   ;;  %s4286_s28 = smov 33  }
  0x30   :  { %s4461_s6 = sld [smem:[%s5102_s0 + %s4283_s7]]   ;;  %s4287_s7 = smov 34  }
  0x31   :  { %s4466_s20 = sld [smem:[%s5102_s0 + %s4284_s15]]   ;;  %s4288_s15 = smov 35  }
  0x33   :  { %5125 = sst [smem:[#allocation20_spill]] %s4451_s27 }
  0x34   :  { %s4471_s27 = sld [smem:[%s5102_s0 + %s4285_s22]]   ;;  %s4289_s22 = smov 36  }
  0x35   :  { %5126 = sst [smem:[#allocation21_spill]] %s4456_s4 }
  0x36   :  { %5127 = sst [smem:[#allocation22_spill]] %s4461_s6 }
  0x37   :  { %5128 = sst [smem:[#allocation23_spill]] %s4466_s20 }
  0x38   :  { %s4476_s4 = sld [smem:[%s5102_s0 + %s4286_s28]]   ;;  %s4290_s28 = smov 37  }
  0x39   :  { %s4481_s6 = sld [smem:[%s5102_s0 + %s4287_s7]]   ;;  %s4291_s7 = smov 38  }
  0x3a   :  { %5129 = sst [smem:[#allocation24_spill]] %s4471_s27 }
  0x3b   :  { %s4486_s20 = sld [smem:[%s5102_s0 + %s4288_s15]]   ;;  %s4292_s15 = smov 39  }
  0x3c   :  { %s4491_s27 = sld [smem:[%s5102_s0 + %s4289_s22]]   ;;  %s4293_s22 = smov 40  }
  0x3e   :  { %5130 = sst [smem:[#allocation25_spill]] %s4476_s4 }
  0x3f   :  { %5131 = sst [smem:[#allocation26_spill]] %s4481_s6 }
  0x40   :  { %s4496_s4 = sld [smem:[%s5102_s0 + %s4290_s28]]   ;;  %s4294_s28 = smov 41  }
  0x41   :  { %5132 = sst [smem:[#allocation27_spill]] %s4486_s20 }
  0x42   :  { %5133 = sst [smem:[#allocation28_spill]] %s4491_s27 }
  0x43   :  { %s4501_s6 = sld [smem:[%s5102_s0 + %s4291_s7]]   ;;  %s4295_s7 = smov 42  }
  0x44   :  { %s4506_s20 = sld [smem:[%s5102_s0 + %s4292_s15]]  }
  0x45   :  { %s4511_s27 = sld [smem:[%s5102_s0 + %s4293_s22]]  }
  0x46   :  { %5134 = sst [smem:[#allocation29_spill]] %s4496_s4 }
  0x47   :  { %s4516_s4 = sld [smem:[%s5102_s0 + %s4294_s28]]  }
  0x49   :  { %5135 = sst [smem:[#allocation30_spill]] %s4501_s6 }
  0x4a   :  { %s4521_s6 = sld [smem:[%s5102_s0 + %s4295_s7]]  }
  0x4b   :  { %v3890_v0 = vld [vmem:[%s4321_s13] sm:$0xff]  ;;  %v177_v2 = vld [vmem:[%s4311_s5 + $0x8] sm:$0xff]  ;;  %vm191_vm0 = vcmask 130048  }
  0x4c   :  { %v176_v1 = vld [vmem:[%s4311_s5] sm:$0xff]  ;;  %202 = vmatpush.bf16.msra.mxu0 %v3890_v0 }
  0x4d   :  { %v178_v3 = vpack.c.bf16 %v177_v2, %v176_v1 }
  0x4f   :  { %3215 = vmatmul.msk.bf16.vlgmr.msra.gmra.mxu0 %vm191_vm0, %v178_v3 }
  0x50   :  { %90 = vsyncpa [#allocation4], 0  ;;  %v4100_v4 = vld [vmem:[%s4326_s17] ss:$0 sm:$0xff]  ;;  %v4296_v12 = vmov 128.0   ;;  %vm488_vm8 = vcmask 261120  }
  0x51   :  { %v209_v6 = vld [vmem:[%s4316_s9] sm:$0xff]  ;;  %4122 = vrcp.f32 %v4296_v12  ;;  %v3302_v27 = vld [vmem:[%s4331_s21 + $0xa8] sm:$0xf]  ;;  %v3913_v28 = vld [vmem:[%s4331_s21 + $0xb0] sm:$0xf0]  ;;  %s4297_s0 = smov 96  }
  0x52   :  { %v3912_v29 = vld [vmem:[%s4331_s21 + $0xac] sm:$0xf]  ;;  %v3303_v30 = vor.u32 %v3913_v28, %v3302_v27  ;;  %v3304_v31 = vld [vmem:[%s4331_s21 + $0xb4] sm:$0xf0]  ;;  %v3310_v32 = vld [vmem:[%s4331_s21 + $0xb0] sm:$0xf] }
  0x53   :  { %v3914_v33 = vld [vmem:[%s4331_s21 + $0xb8] sm:$0xf0]  ;;  %v3307_v34 = vor.u32 %v3912_v29, %v3304_v31  ;;  %v3290_v36 = vld [vmem:[%s4331_s21 + $0x90] sm:$0xf]  ;;  %v3909_v38 = vld [vmem:[%s4331_s21 + $0x94] sm:$0xf] }
  0x54   :  { %v3311_v35 = vor.u32 %v3914_v33, %v3310_v32  ;;  %440 = vmatpush.bf16.msra.mxu1 %v3303_v30  ;;  %v3910_v37 = vld [vmem:[%s4331_s21 + $0x98] sm:$0xf0]  ;;  %v3292_v40 = vld [vmem:[%s4331_s21 + $0x9c] sm:$0xf0]  ;;  %v3298_v41 = vld [vmem:[%s4331_s21 + $0x98] sm:$0xf] }
  0x55   :  { %454 = vmatpush.bf16.msra.mxu2 %v3307_v34  ;;  %v3291_v39 = vor.u32 %v3910_v37, %v3290_v36  ;;  %v3911_v42 = vld [vmem:[%s4331_s21 + $0xa0] sm:$0xf0]  ;;  %v3295_v43 = vor.u32 %v3909_v38, %v3292_v40  ;;  %v3278_v45 = vld [vmem:[%s4331_s21 + $0x78] sm:$0xf]  ;;  %v3906_v47 = vld [vmem:[%s4331_s21 + $0x7c] sm:$0xf] }
  0x56   :  { %468 = vmatpush.bf16.msra.mxu3 %v3311_v35  ;;  %v3299_v44 = vor.u32 %v3911_v42, %v3298_v41  ;;  %v3907_v46 = vld [vmem:[%s4331_s21 + $0x80] sm:$0xf0]  ;;  %v3280_v49 = vld [vmem:[%s4331_s21 + $0x84] sm:$0xf0]  ;;  %v3286_v50 = vld [vmem:[%s4331_s21 + $0x80] sm:$0xf] }
  0x57   :  { %v4123_v13 = vpop.eup %4122  ;;  %v3279_v48 = vor.u32 %v3907_v46, %v3278_v45  ;;  %v3908_v51 = vld [vmem:[%s4331_s21 + $0x88] sm:$0xf0]  ;;  %v3283_v52 = vor.u32 %v3906_v47, %v3280_v49  ;;  %v3266_v54 = vld [vmem:[%s4331_s21 + $0x60] sm:$0xf]  ;;  %v3903_v56 = vld [vmem:[%s4331_s21 + $0x64] sm:$0xf] }
  0x58   :  { %v219_v14 = vmul.f32 128.0, %v4123_v13  ;;  %vm223_vm1 = vweird.f32 %v4123_v13  ;;  %441 = vmatpush.bf16.msra.mxu1 %v3291_v39  ;;  %v3287_v53 = vor.u32 %v3908_v51, %v3286_v50  ;;  %v3904_v55 = vld [vmem:[%s4331_s21 + $0x68] sm:$0xf0]  ;;  %v3268_v58 = vld [vmem:[%s4331_s21 + $0x6c] sm:$0xf0]  ;;  %vm557_vm9 = vcmask 1043456  }
  0x59   :  { %455 = vmatpush.bf16.msra.mxu2 %v3295_v43  ;;  %v3267_v57 = vor.u32 %v3904_v55, %v3266_v54  ;;  %v3274_v59 = vld [vmem:[%s4331_s21 + $0x68] sm:$0xf]  ;;  %v3905_v60 = vld [vmem:[%s4331_s21 + $0x70] sm:$0xf0]  ;;  %v3271_v61 = vor.u32 %v3903_v56, %v3268_v58  ;;  %v3900_v1 = vld [vmem:[%s4331_s21 + $0x4c] sm:$0xf] }
  0x5a   :  { %v220_v15 = vsub.f32 1.0, %v219_v14  ;;  %469 = vmatpush.bf16.msra.mxu3 %v3299_v44  ;;  %v3275_v62 = vor.u32 %v3905_v60, %v3274_v59  ;;  %v3254_v63 = vld [vmem:[%s4331_s21 + $0x48] sm:$0xf]  ;;  %v3901_v0 = vld [vmem:[%s4331_s21 + $0x50] sm:$0xf0]  ;;  %s4298_s5 = smov 64  }
  0x5b   :  { %v3255_v2 = vor.u32 %v3901_v0, %v3254_v63  ;;  %v3256_v3 = vld [vmem:[%s4331_s21 + $0x54] sm:$0xf0]  ;;  %v3897_v12 = vld [vmem:[%s4331_s21 + $0x34] sm:$0xf]  ;;  %v3244_v14 = vld [vmem:[%s4331_s21 + $0x3c] sm:$0xf0] }
  0x5c   :  { %v221_v16 = vmul.f32 %v4123_v13, %v220_v15  ;;  %442 = vmatpush.bf16.msra.mxu1 %v3279_v48  ;;  %v3250_v15 = vld [vmem:[%s4331_s21 + $0x38] sm:$0xf]  ;;  %v3238_v27 = vld [vmem:[%s4331_s21 + $0x20] sm:$0xf]  ;;  %v3896_v28 = vld [vmem:[%s4331_s21 + $0x28] sm:$0xf0] }
  0x5d   :  { %456 = vmatpush.bf16.msra.mxu2 %v3283_v52  ;;  %v3239_v30 = vor.u32 %v3896_v28, %v3238_v27  ;;  %v3218_v31 = vld [vmem:[%s4331_s21] sm:$0xf]  ;;  %v3892_v32 = vld [vmem:[%s4331_s21 + $0x8] sm:$0xf0]  ;;  %v3891_v33 = vld [vmem:[%s4331_s21 + $0x4] sm:$0xf] }
  0x5e   :  { %v222_v17 = vadd.f32 %v4123_v13, %v221_v16  ;;  %470 = vmatpush.bf16.msra.mxu3 %v3287_v53  ;;  %v3899_v16 = vld [vmem:[%s4331_s21 + $0x40] sm:$0xf0]  ;;  %v3219_v35 = vor.u32 %v3892_v32, %v3218_v31  ;;  %v3220_v36 = vld [vmem:[%s4331_s21 + $0xc] sm:$0xf0]  ;;  %v3226_v37 = vld [vmem:[%s4331_s21 + $0x8] sm:$0xf] }
  0x5f   :  { %v3893_v38 = vld [vmem:[%s4331_s21 + $0x10] sm:$0xf0]  ;;  %v3223_v40 = vor.u32 %v3891_v33, %v3220_v36  ;;  %v4101_v59 = vld [vmem:[%s4351_s8] ss:$0 sm:$0xff]  ;;  %s4299_s9 = smov 32   ;;  %vm527_vm10 = vcmask 64512  }
  0x60   :  { %v4534_v18 = vsel %vm223_vm1, %v4123_v13, %v222_v17  ;;  %443 = vmatpush.bf16.msra.mxu1 %v3267_v57  ;;  %v3247_v17 = vor.u32 %v3897_v12, %v3244_v14  ;;  %v3227_v41 = vor.u32 %v3893_v38, %v3226_v37  ;;  %v4102_v0 = vld [vmem:[%s4356_s14] ss:$0 sm:$0xff]  ;;  %vm733_vm11 = vcmask 523520   ;;  %s5136_s13 = sld [smem:[#allocation6_spill]] }
  0x61   :  { %457 = vmatpush.bf16.msra.mxu2 %v3271_v61  ;;  %vm856_vm12 = vcmask 785920   ;;  %vm979_vm13 = vcmask 1048320   ;;  %s5137_s17 = sld [smem:[#allocation8_spill]] }
  0x62   :  { %471 = vmatpush.bf16.msra.mxu3 %v3275_v62  ;;  %s5142_s8 = sld [smem:[#allocation12_spill]] }
  0x63   :  { %s5143_s14 = sld [smem:[#allocation13_spill]] }
  0x64   :  { %444 = vmatpush.bf16.msra.mxu1 %v3255_v2  ;;  %s5148_s15 = sld [smem:[#allocation16_spill]] }
  0x65   :  { %s5149_s16 = sld [smem:[#allocation17_spill]] }
  0x66   :  { %s5150_s18 = sld [smem:[#allocation22_spill]] }
  0x67   :  { %s5151_s22 = sld [smem:[#allocation20_spill]] }
  0x68   :  { %s5152_s23 = sld [smem:[#allocation21_spill]] }
  0x69   :  { %s5153_s26 = sld [smem:[#allocation24_spill]] }
  0x6a   :  { %s5154_s28 = sld [smem:[#allocation23_spill]] }
  0x6b   :  { %s5155_s1 = sld [smem:[#allocation26_spill]] }
  0x6c   :  { %s5156_s2 = sld [smem:[#allocation25_spill]] }
  0x6d   :  { %s5157_s7 = sld [smem:[#allocation28_spill]] }
  0x6e   :  { %s5158_s10 = sld [smem:[#allocation27_spill]] }
  0x6f   :  { %s5159_s11 = sld [smem:[#allocation29_spill]] }
  0xcc   :  { %v204_v5 = vpop.f32.mrf.mxu0 }
  0xcd   :  { %v205_v7 = vadd.f32 %v4100_v4, %v204_v5  ;;  %v3902_v5 = vld [vmem:[%s4331_s21 + $0x58] sm:$0xf0] }
  0xcf   :  { %v4528_v8 = vadd.f32 %v209_v6, %v205_v7 }
  0xd1   :  { %214 = vadd.xlane.f32.xlu0 %v4528_v8 }
  0xd4   :  { %v206_v9 = vpop.f32.mrf.mxu0 }
  0xd5   :  { %v207_v10 = vadd.f32 %v4100_v4, %v206_v9  ;;  %v3262_v4 = vld [vmem:[%s4331_s21 + $0x50] sm:$0xf] }
  0xd6   :  { %v3263_v7 = vor.u32 %v3902_v5, %v3262_v4  ;;  %v3242_v9 = vld [vmem:[%s4331_s21 + $0x30] sm:$0xf] }
  0xd7   :  { %v4531_v11 = vadd.f32 %v209_v6, %v207_v10  ;;  %v3259_v6 = vor.u32 %v3900_v1, %v3256_v3  ;;  %v3898_v10 = vld [vmem:[%s4331_s21 + $0x38] sm:$0xf0] }
  0xd8   :  { %472 = vmatpush.bf16.msra.mxu3 %v3263_v7  ;;  %v3243_v13 = vor.u32 %v3898_v10, %v3242_v9 }
  0xd9   :  { %216 = vadd.xlane.f32.xlu0 %v4531_v11  ;;  %458 = vmatpush.bf16.msra.mxu2 %v3259_v6  ;;  %v304_v6 = vld [vmem:[%s4336_s25] sm:$0x7]  ;;  %s5139_s25 = sld [smem:[#allocation10_spill]] }
  0xda   :  { %445 = vmatpush.bf16.msra.mxu1 %v3243_v13  ;;  %v306_v7 = vperm.slane %v304_v6, 0  ;;  %v308_v13 = vperm.slane %v304_v6, 2 }
  0xdd   :  { %459 = vmatpush.bf16.msra.mxu2 %v3247_v17 }
 0x144   :  { %v215_v19 = vpop.xlane.xlu0 %214 }
 0x145   :  { %v225_v20 = vmul.f32 %v4534_v18, %v215_v19  ;;  %v3251_v19 = vor.u32 %v3899_v16, %v3250_v15 }
 0x147   :  { %v4538_v21 = vsub.f32 %v4528_v8, %v225_v20  ;;  %473 = vmatpush.bf16.msra.mxu3 %v3251_v19  ;;  %v3230_v20 = vld [vmem:[%s4331_s21 + $0x18] sm:$0xf] }
 0x149   :  { %v229_v22 = vmul.f32 %v4538_v21, %v4538_v21 }
 0x14b   :  { %231 = vadd.xlane.f32.xlu1 %v229_v22  ;;  %v3895_v22 = vld [vmem:[%s4331_s21 + $0x20] sm:$0xf0]  ;;  %474 = vmatpush.bf16.msra.mxu3 %v3239_v30 }
 0x14c   :  { %v217_v23 = vpop.xlane.xlu0 %216 }
 0x14d   :  { %v226_v24 = vmul.f32 %v4534_v18, %v217_v23  ;;  %v3894_v23 = vld [vmem:[%s4331_s21 + $0x1c] sm:$0xf] }
 0x14f   :  { %v4544_v25 = vsub.f32 %v4531_v11, %v226_v24  ;;  %v3231_v24 = vor.u32 %v3895_v22, %v3230_v20  ;;  %475 = vmatpush.bf16.msra.mxu3 %v3227_v41 }
 0x151   :  { %v230_v26 = vmul.f32 %v4544_v25, %v4544_v25  ;;  %446 = vmatpush.bf16.msra.mxu1 %v3231_v24 }
 0x153   :  { %233 = vadd.xlane.f32.xlu1 %v230_v26  ;;  %v3232_v26 = vld [vmem:[%s4331_s21 + $0x24] sm:$0xf0]  ;;  %s5138_s21 = sld [smem:[#allocation7_spill]] }
 0x154   :  { %v3235_v29 = vor.u32 %v3894_v23, %v3232_v26 }
 0x155   :  { %447 = vmatpush.bf16.msra.mxu1 %v3219_v35 }
 0x156   :  { %460 = vmatpush.bf16.msra.mxu2 %v3235_v29 }
 0x15a   :  { %461 = vmatpush.bf16.msra.mxu2 %v3223_v40 }
 0x1be   :  { %v232_v34 = vpop.xlane.xlu1 %231 }
 0x1bf   :  { %v235_v39 = vmul.f32 %v232_v34, %v4534_v18 }
 0x1c1   :  { %v237_v42 = vadd.f32 1e-06, %v235_v39 }
 0x1c3   :  { %4124 = vrsqrt.f32 %v237_v42  ;;  %vm245_vm3 = vweird.f32 %v237_v42 }
 0x1c6   :  { %v234_v43 = vpop.xlane.xlu1 %233 }
 0x1c7   :  { %v236_v44 = vmul.f32 %v234_v43, %v4534_v18 }
 0x1c9   :  { %v4125_v45 = vpop.eup %4124  ;;  %v238_v46 = vadd.f32 1e-06, %v236_v44 }
 0x1ca   :  { %v240_v47 = vmul.f32 %v4125_v45, %v237_v42  ;;  %vm246_vm2 = vweird.f32 %v4125_v45 }
 0x1cb   :  { %4126 = vrsqrt.f32 %v238_v46  ;;  %vm247_vm4 = vmor %vm245_vm3, %vm246_vm2  ;;  %vm255_vm6 = vweird.f32 %v238_v46 }
 0x1cc   :  { %v241_v48 = vmul.f32 %v4125_v45, %v240_v47 }
 0x1ce   :  { %v242_v49 = vmul.f32 0.5, %v241_v48 }
 0x1d0   :  { %v243_v50 = vsub.f32 1.5, %v242_v49 }
 0x1d1   :  { %v4127_v51 = vpop.eup %4126 }
 0x1d2   :  { %v244_v52 = vmul.f32 %v4125_v45, %v243_v50  ;;  %v250_v53 = vmul.f32 %v4127_v51, %v238_v46  ;;  %vm256_vm5 = vweird.f32 %v4127_v51 }
 0x1d3   :  { %vm257_vm7 = vmor %vm255_vm6, %vm256_vm5 }
 0x1d4   :  { %v251_v54 = vmul.f32 %v4127_v51, %v250_v53  ;;  %v248_v55 = vsel %vm247_vm4, %v4125_v45, %v244_v52  ;;  %vm1574_vm4 = vcmask 523264  }
 0x1d5   :  { %v259_v58 = vmul.f32 %v248_v55, %v4538_v21  ;;  %v307_v21 = vperm.slane %v304_v6, 1 }
 0x1d6   :  { %v252_v56 = vmul.f32 0.5, %v251_v54 }
 0x1d7   :  { %v264_v63 = vmul.f32 %v4101_v59, %v259_v58 }
 0x1d8   :  { %v253_v57 = vsub.f32 1.5, %v252_v56 }
 0x1d9   :  { %v269_v2 = vadd.f32 %v4102_v0, %v264_v63 }
 0x1da   :  { %v254_v60 = vmul.f32 %v4127_v51, %v253_v57 }
 0x1dc   :  { %v258_v61 = vsel %vm257_vm7, %v4127_v51, %v254_v60 }
 0x1dd   :  { %v260_v62 = vmul.f32 %v258_v61, %v4544_v25 }
 0x1df   :  { %v265_v1 = vmul.f32 %v4101_v59, %v260_v62 }
 0x1e1   :  { %v270_v3 = vadd.f32 %v4102_v0, %v265_v1 }
 0x1e3   :  { %v271_v4 = vpack.c.bf16 %v270_v3, %v269_v2 }
 0x1e5   :  { %448 = vmatmul.bf16.vlgmr.msra.gmra.mxu1 %v271_v4  ;;  %462 = vmatmul.bf16.vlgmr.msra.gmra.mxu2 %v271_v4 }
 0x1e6   :  { %476 = vmatmul.bf16.vlgmr.msra.gmra.mxu3 %v271_v4 }
 0x262   :  { %v449_v5 = vpop.f32.mrf.mxu1 }
 0x263   :  { %v450_v25 = vadd.f32 %v449_v5, %v306_v7 }
 0x265   :  { %v482_v23 = vmul.f32 0.17677669, %v450_v25 }
 0x267   :  { %v484_v32 = vpack.c.bf16 %v482_v23, %v482_v23 }
 0x268   :  { %v463_v9 = vpop.f32.mrf.mxu2 }
 0x269   :  { %v464_v10 = vadd.f32 %v463_v9, %v307_v21  ;;  %v477_v12 = vpop.f32.mrf.mxu3  ;;  %v596_v42 = vunpack.c.l.b16 %v484_v32 }
 0x26a   :  { %v451_v14 = vpop.f32.mrf.mxu1  ;;  %v478_v22 = vadd.f32 %v477_v12, %v308_v13 }
 0x26b   :  { %v486_v15 = vpack.c.bf16 %v464_v10, %v464_v10  ;;  %v452_v16 = vadd.f32 %v451_v14, %v306_v7  ;;  %v597_v43 = vpack.c.b16 %v596_v42, %v596_v42 }
 0x26c   :  { %v4608_v30 = vpack.c.bf16 %v478_v22, %v478_v22 }
 0x26d   :  { %v601_v17 = vunpack.c.l.b16 %v486_v15  ;;  %v483_v19 = vmul.f32 0.17677669, %v452_v16  ;;  %v493_v20 = vsel %vm488_vm8, %v486_v15, 0 }
 0x26e   :  { %502 = vmatpush.bf16.xpose.msrb.mxu0 %v493_v20  ;;  %v559_v38 = vsel %vm557_vm9, %v4608_v30, 0 }
 0x26f   :  { %v4604_v24 = vpack.c.b16 %v601_v17, %v601_v17  ;;  %v485_v26 = vpack.c.bf16 %v483_v19, %v483_v19 }
 0x270   :  { %v465_v27 = vpop.f32.mrf.mxu2 }
 0x271   :  { %v466_v28 = vadd.f32 %v465_v27, %v307_v21  ;;  %v479_v29 = vpop.f32.mrf.mxu3  ;;  %603 = vrot.lane.b32.xlu0 %v4604_v24, %s4297_s0  ;;  %v625_v34 = vunpack.c.l.b16 %v485_v26 }
 0x272   :  { %v480_v31 = vadd.f32 %v479_v29, %v308_v13 }
 0x273   :  { %v487_v33 = vpack.c.bf16 %v466_v28, %v466_v28  ;;  %v626_v41 = vpack.c.b16 %v625_v34, %v625_v34 }
 0x274   :  { %v4610_v35 = vpack.c.bf16 %v480_v31, %v480_v31 }
 0x275   :  { %v630_v36 = vunpack.c.l.b16 %v487_v33  ;;  %3312 = vmatmul.msk.bf16.vlgmr.msrb.gmra.mxu0 %vm488_vm8, %v484_v32  ;;  %v512_v37 = vsel %vm488_vm8, %v487_v33, 0 }
 0x276   :  { %521 = vmatpush.bf16.xpose.msra.mxu0 %v512_v37  ;;  %v578_v39 = vsel %vm557_vm9, %v4610_v35, 0 }
 0x277   :  { %587 = vmatpush.bf16.msrb.mxu2 %v578_v39  ;;  %v631_v40 = vpack.c.b16 %v630_v36, %v630_v36 }
 0x279   :  { %632 = vrot.lane.b32.xlu1 %v631_v40, %s4297_s0  ;;  %627 = vrot.lane.b32.xlu0 %v626_v41, %s4297_s0 }
 0x27e   :  { %568 = vmatpush.bf16.msrb.mxu0 %v559_v38 }
 0x281   :  { %761 = vrot.lane.b32.xlu1 %v631_v40, %s4298_s5  ;;  %736 = vrot.lane.b32.xlu0 %v597_v43, %s4298_s5 }
 0x285   :  { %3313 = vmatmul.msk.bf16.vlgmr.msra.gmra.mxu0 %vm488_vm8, %v485_v26 }
 0x289   :  { %861 = vrot.lane.b32.xlu1 %v4604_v24, %s4299_s9  ;;  %884 = vrot.lane.b32.xlu0 %v631_v40, %s4299_s9 }
 0x291   :  { %882 = vrot.lane.b32.xlu1 %v626_v41, %s4299_s9 }
 0x2e3   :  { %v604_v44 = vpop.permute.xlu0 %603 }
 0x2e4   :  { %v609_v45 = vsel %vm488_vm8, %v604_v44, 0 }
 0x2e5   :  { %618 = vmatpush.bf16.xpose.msrb.mxu3 %v609_v45 }
 0x2eb   :  { %v633_v46 = vpop.permute.xlu1 %632  ;;  %v628_v54 = vpop.permute.xlu0 %627 }
 0x2ec   :  { %v638_v47 = vsel %vm488_vm8, %v633_v46, 0 }
 0x2ed   :  { %647 = vmatpush.bf16.xpose.msra.mxu0 %v638_v47 }
 0x2f2   :  { %v504_v48 = vpop.f32.mrf.mxu0 }
 0x2f3   :  { %v528_v49 = vsel %vm527_vm10, %v504_v48, -inf  ;;  %v737_v55 = vpop.permute.xlu0 %736  ;;  %v762_v4 = vpop.permute.xlu1 %761 }
 0x2f4   :  { %529 = vmax.xlane.f32.xlu2 %v528_v49  ;;  %v767_v14 = vsel %vm488_vm8, %v762_v4, 0 }
 0x2fa   :  { %v506_v50 = vpop.f32.mrf.mxu0 }
 0x2fb   :  { %v885_v59 = vpop.permute.xlu0 %884  ;;  %v862_v21 = vpop.permute.xlu1 %861 }
 0x2fc   :  { %v867_v12 = vsel %vm488_vm8, %v862_v21, 0 }
 0x302   :  { %v523_v51 = vpop.f32.mrf.mxu0 }
 0x303   :  { %v531_v52 = vsel %vm527_vm10, %v523_v51, -inf  ;;  %v883_v27 = vpop.permute.xlu1 %882 }
 0x304   :  { %532 = vmax.xlane.f32.xlu0 %v531_v52 }
 0x30a   :  { %v525_v53 = vpop.f32.mrf.mxu0 }
 0x30b   :  { %v702_v53 = vunpack.c.l.b16 %v4610_v35 }
 0x30c   :  { %598 = vrot.lane.b32.xlu2 %v597_v43, %s4297_s0 }
 0x367   :  { %v530_v56 = vpop.xlane.xlu2 %529 }
 0x368   :  { %v534_v57 = vsub.f32 %v504_v48, %v530_v56  ;;  %v678_v56 = vunpack.c.l.b16 %v4608_v30 }
 0x36a   :  { %v536_v58 = vmul.f32 1.442695, %v534_v57  ;;  %v679_v57 = vpack.c.b16 %v678_v56, %v678_v56 }
 0x36c   :  { %4128 = vpow2.f32 %v536_v58 }
 0x36f   :  { %v599_v60 = vpop.permute.xlu2 %598 }
 0x370   :  { %3316 = vmatmul.msk.bf16.vlgmr.msrb.gmra.mxu3 %vm488_vm8, %v599_v60 }
 0x372   :  { %v4129_v61 = vpop.eup %4128 }
 0x373   :  { %v540_v62 = vsel %vm527_vm10, %v4129_v61, 0.0 }
 0x374   :  { %541 = vadd.xlane.f32.xlu2 %v540_v62 }
 0x377   :  { %v533_v63 = vpop.xlane.xlu0 %532 }
 0x378   :  { %v535_v0 = vsub.f32 %v523_v51, %v533_v63 }
 0x37a   :  { %v538_v1 = vmul.f32 1.442695, %v535_v0 }
 0x37c   :  { %4130 = vpow2.f32 %v538_v1 }
 0x382   :  { %v4131_v2 = vpop.eup %4130 }
 0x383   :  { %v543_v3 = vsel %vm527_vm10, %v4131_v2, 0.0 }
 0x384   :  { %544 = vadd.xlane.f32.xlu0 %v543_v3 }
 0x38c   :  { %738 = vrot.lane.b32.xlu2 %v4604_v24, %s4298_s5  ;;  %v890_v24 = vsel %vm488_vm8, %v885_v59, 0 }
 0x394   :  { %759 = vrot.lane.b32.xlu2 %v626_v41, %s4298_s5 }
 0x39c   :  { %859 = vrot.lane.b32.xlu2 %v597_v43, %s4299_s9 }
 0x3e7   :  { %v542_v5 = vpop.xlane.xlu2 %541 }
 0x3e8   :  { %4132 = vrcp.f32 %v542_v5 }
 0x3ee   :  { %v4133_v6 = vpop.eup %4132 }
 0x3ef   :  { %v548_v7 = vmul.f32 %v4133_v6, %v4129_v61  ;;  %v739_v9 = vpop.permute.xlu2 %738 }
 0x3f0   :  { %v744_v10 = vsel %vm488_vm8, %v739_v9, 0 }
 0x3f1   :  { %v550_v13 = vpack.c.bf16 %v548_v7, %v548_v7  ;;  %753 = vmatpush.bf16.xpose.msra.mxu3 %v744_v10 }
 0x3f3   :  { %3314 = vmatmul.msk.bf16.vlgmr.msrb.gmra.mxu0 %vm527_vm10, %v550_v13  ;;  %v620_v25 = vpop.f32.mrf.mxu3 }
 0x3f4   :  { %776 = vmatpush.bf16.xpose.msrb.mxu0 %v767_v14  ;;  %v653_v15 = vsel %vm527_vm10, %v620_v25, -inf }
 0x3f5   :  { %654 = vmax.xlane.f32.xlu1 %v653_v15 }
 0x3f7   :  { %v545_v16 = vpop.xlane.xlu0 %544  ;;  %v760_v19 = vpop.permute.xlu2 %759 }
 0x3f8   :  { %4134 = vrcp.f32 %v545_v16  ;;  %3320 = vmatmul.msk.bf16.vlgmr.msra.gmra.mxu3 %vm488_vm8, %v737_v55 }
 0x3f9   :  { %876 = vmatpush.bf16.xpose.msrb.mxu3 %v867_v12 }
 0x3fb   :  { %v622_v17 = vpop.f32.mrf.mxu3 }
 0x3fe   :  { %v4135_v20 = vpop.eup %4134 }
 0x3ff   :  { %v549_v22 = vmul.f32 %v4135_v20, %v4131_v2  ;;  %v860_v26 = vpop.permute.xlu2 %859 }
 0x401   :  { %v551_v23 = vpack.c.bf16 %v549_v22, %v549_v22 }
 0x403   :  { %3315 = vmatmul.msk.bf16.vlgmr.msrb.gmra.mxu2 %vm527_vm10, %v551_v23  ;;  %3317 = vmatmul.msk.bf16.vlgmr.msra.gmra.mxu0 %vm488_vm8, %v628_v54  ;;  %v703_v54 = vpack.c.b16 %v702_v53, %v702_v53 }
 0x404   :  { %899 = vmatpush.bf16.xpose.msra.mxu0 %v890_v24 }
 0x408   :  { %3324 = vmatmul.msk.bf16.vlgmr.msrb.gmra.mxu3 %vm488_vm8, %v860_v26 }
 0x413   :  { %3321 = vmatmul.msk.bf16.vlgmr.msrb.gmra.mxu0 %vm488_vm8, %v760_v19 }
 0x423   :  { %3325 = vmatmul.msk.bf16.vlgmr.msra.gmra.mxu0 %vm488_vm8, %v883_v27 }
 0x468   :  { %v655_v28 = vpop.xlane.xlu1 %654 }
 0x469   :  { %v659_v29 = vsub.f32 %v620_v25, %v655_v28 }
 0x46b   :  { %v661_v31 = vmul.f32 1.442695, %v659_v29 }
 0x46d   :  { %4136 = vpow2.f32 %v661_v31 }
 0x470   :  { %v570_v32 = vpop.f32.mrf.mxu0 }
 0x471   :  { %593 = vst.msk [vmem:[#allocation2] sm:$0xff] %vm488_vm8, %v570_v32 }
 0x473   :  { %v4652_v33 = vpop.eup %4136 }
 0x474   :  { %v665_v34 = vsel %vm527_vm10, %v4652_v33, 0.0 }
 0x475   :  { %666 = vadd.xlane.f32.xlu0 %v665_v34 }
 0x478   :  { %v572_v36 = vpop.f32.mrf.mxu0 }
 0x47b   :  { %v755_v37 = vpop.f32.mrf.mxu3 }
 0x47c   :  { %v782_v43 = vsel %vm527_vm10, %v755_v37, -inf }
 0x480   :  { %v649_v38 = vpop.f32.mrf.mxu0 }
 0x481   :  { %v656_v39 = vsel %vm527_vm10, %v649_v38, -inf }
 0x482   :  { %657 = vmax.xlane.f32.xlu2 %v656_v39 }
 0x483   :  { %v757_v40 = vpop.f32.mrf.mxu3 }
 0x486   :  { %v589_v41 = vpop.f32.mrf.mxu2 }
 0x487   :  { %594 = vst.msk [vmem:[#allocation2 + $0x8] sm:$0xff] %vm488_vm8, %v589_v41 }
 0x488   :  { %v651_v42 = vpop.f32.mrf.mxu0 }
 0x48a   :  { %783 = vmax.xlane.f32.xlu2 %v782_v43 }
 0x48b   :  { %v878_v44 = vpop.f32.mrf.mxu3 }
 0x48c   :  { %v905_v47 = vsel %vm527_vm10, %v878_v44, -inf }
 0x48e   :  { %v591_v45 = vpop.f32.mrf.mxu2 }
 0x490   :  { %v778_v46 = vpop.f32.mrf.mxu0 }
 0x491   :  { %v785_v48 = vsel %vm527_vm10, %v778_v46, -inf }
 0x492   :  { %906 = vmax.xlane.f32.xlu2 %v905_v47  ;;  %786 = vmax.xlane.f32.xlu0 %v785_v48 }
 0x493   :  { %v880_v49 = vpop.f32.mrf.mxu3 }
 0x498   :  { %v780_v50 = vpop.f32.mrf.mxu0 }
 0x4a0   :  { %v901_v51 = vpop.f32.mrf.mxu0 }
 0x4a1   :  { %v908_v52 = vsel %vm527_vm10, %v901_v51, -inf }
 0x4a2   :  { %909 = vmax.xlane.f32.xlu1 %v908_v52 }
 0x4a8   :  { %v903_v55 = vpop.f32.mrf.mxu0 }
 0x4aa   :  { %704 = vrot.lane.b32.xlu2 %v703_v54, %s4297_s0 }
 0x4b2   :  { %806 = vrot.lane.b32.xlu2 %v679_v57, %s4298_s5 }
 0x4e8   :  { %v667_v9 = vpop.xlane.xlu0 %666 }
 0x4f5   :  { %v658_v58 = vpop.xlane.xlu2 %657 }
 0x4f6   :  { %v660_v59 = vsub.f32 %v649_v38, %v658_v58 }
 0x4f8   :  { %v663_v60 = vmul.f32 1.442695, %v660_v59 }
 0x4fa   :  { %4138 = vpow2.f32 %v663_v60 }
 0x4fd   :  { %v784_v61 = vpop.xlane.xlu2 %783 }
 0x4fe   :  { %v788_v62 = vsub.f32 %v755_v37, %v784_v61 }
 0x500   :  { %v4139_v63 = vpop.eup %4138  ;;  %v790_v0 = vmul.f32 1.442695, %v788_v62 }
 0x501   :  { %v668_v1 = vsel %vm527_vm10, %v4139_v63, 0.0 }
 0x502   :  { %4140 = vpow2.f32 %v790_v0  ;;  %669 = vadd.xlane.f32.xlu1 %v668_v1 }
 0x505   :  { %v907_v35 = vpop.xlane.xlu2 %906  ;;  %v787_v12 = vpop.xlane.xlu0 %786 }
 0x506   :  { %v911_v2 = vsub.f32 %v878_v44, %v907_v35  ;;  %v789_v14 = vsub.f32 %v778_v46, %v787_v12  ;;  %v3918_v12 = vld [vmem:[%s4341_s29 + $0x18] sm:$0xff] }
 0x508   :  { %v4141_v3 = vpop.eup %4140  ;;  %v913_v4 = vmul.f32 1.442695, %v911_v2  ;;  %v792_v15 = vmul.f32 1.442695, %v789_v14  ;;  %v3916_v14 = vld [vmem:[%s4341_s29 + $0x8] sm:$0xff] }
 0x509   :  { %v794_v30 = vsel %vm527_vm10, %v4141_v3, 0.0 }
 0x50a   :  { %4142 = vpow2.f32 %v913_v4  ;;  %795 = vadd.xlane.f32.xlu0 %v794_v30 }
 0x50d   :  { %v705_v5 = vpop.permute.xlu2 %704 }
 0x50e   :  { %v710_v6 = vsel %vm557_vm9, %v705_v5, 0 }
 0x50f   :  { %719 = vmatpush.bf16.msra.mxu2 %v710_v6 }
 0x510   :  { %v4669_v21 = vpop.eup %4142 }
 0x511   :  { %v917_v7 = vsel %vm527_vm10, %v4669_v21, 0.0 }
 0x512   :  { %918 = vadd.xlane.f32.xlu2 %v917_v7  ;;  %v3921_v7 = vld [vmem:[%s4341_s29 + $0x30] sm:$0xff] }
 0x515   :  { %v910_v10 = vpop.xlane.xlu1 %909  ;;  %v807_v31 = vpop.permute.xlu2 %806 }
 0x516   :  { %v912_v13 = vsub.f32 %v901_v51, %v910_v10  ;;  %v812_v36 = vsel %vm557_vm9, %v807_v31, 0  ;;  %v3919_v10 = vld [vmem:[%s4341_s29 + $0x20] sm:$0xff] }
 0x518   :  { %v915_v25 = vmul.f32 1.442695, %v912_v13  ;;  %v3917_v13 = vld [vmem:[%s4341_s29 + $0x10] sm:$0xff] }
 0x51a   :  { %4144 = vpow2.f32 %v915_v25  ;;  %v3915_v25 = vld [vmem:[%s4341_s29] sm:$0xff] }
 0x51b   :  { %680 = vrot.lane.b32.xlu1 %v679_v57, %s4297_s0  ;;  %4146 = vpow2.f32 %v792_v15 }
 0x51e   :  { %827 = vrot.lane.b32.xlu0 %v703_v54, %s4298_s5 }
 0x520   :  { %v4145_v16 = vpop.eup %4144 }
 0x521   :  { %v4147_v17 = vpop.eup %4146  ;;  %v920_v19 = vsel %vm527_vm10, %v4145_v16, 0.0 }
 0x522   :  { %v797_v20 = vsel %vm527_vm10, %v4147_v17, 0.0 }
 0x545   :  { %921 = vadd.xlane.f32.xlu1 %v920_v19 }
 0x548   :  { %798 = vadd.xlane.f32.xlu0 %v797_v20 }
 0x55c   :  { %950 = vrot.lane.b32.xlu0 %v703_v54, %s4299_s9 }
 0x564   :  { %929 = vrot.lane.b32.xlu0 %v679_v57, %s4299_s9 }
 0x575   :  { %v670_v22 = vpop.xlane.xlu1 %669 }
 0x576   :  { %4148 = vrcp.f32 %v670_v22 }
 0x577   :  { %4150 = vrcp.f32 %v667_v9  ;;  %v3920_v9 = vld [vmem:[%s4341_s29 + $0x28] sm:$0xff] }
 0x57c   :  { %v4149_v23 = vpop.eup %4148 }
 0x57d   :  { %v674_v24 = vmul.f32 %v4149_v23, %v4139_v63  ;;  %v796_v27 = vpop.xlane.xlu0 %795  ;;  %v4151_v28 = vpop.eup %4150  ;;  %v4103_v23 = vld [vmem:[%s4346_s3] ss:$0 sm:$0xff]  ;;  %s5141_s3 = sld [smem:[#allocation11_spill]] }
 0x57e   :  { %v673_v29 = vmul.f32 %v4151_v28, %v4652_v33  ;;  %4152 = vrcp.f32 %v796_v27 }
 0x57f   :  { %v676_v26 = vpack.c.bf16 %v674_v24, %v674_v24 }
 0x580   :  { %v675_v38 = vpack.c.bf16 %v673_v29, %v673_v29 }
 0x581   :  { %3319 = vmatmul.msk.bf16.vlgmr.msra.gmra.mxu2 %vm527_vm10, %v676_v26 }
 0x584   :  { %v4153_v40 = vpop.eup %4152 }
 0x585   :  { %v802_v41 = vmul.f32 %v4153_v40, %v4141_v3  ;;  %v919_v47 = vpop.xlane.xlu2 %918  ;;  %v3418_v40 = vld [vmem:[%s4371_s30 + $0x70] sm:$0xf] }
 0x587   :  { %v804_v42 = vpack.c.bf16 %v802_v41, %v802_v41  ;;  %v3938_v41 = vld [vmem:[%s4371_s30 + $0x74] sm:$0xf0] }
 0x58d   :  { %v681_v32 = vpop.permute.xlu1 %680 }
 0x58e   :  { %v686_v34 = vsel %vm557_vm9, %v681_v32, 0 }
 0x58f   :  { %695 = vmatpush.bf16.msrb.mxu1 %v686_v34 }
 0x590   :  { %v828_v37 = vpop.permute.xlu0 %827 }
 0x591   :  { %v833_v39 = vsel %vm557_vm9, %v828_v37, 0 }
 0x592   :  { %3318 = vmatmul.msk.bf16.vlgmr.msrb.gmra.mxu1 %vm527_vm10, %v675_v38  ;;  %842 = vmatpush.bf16.msrb.mxu2 %v833_v39 }
 0x593   :  { %821 = vmatpush.bf16.msra.mxu1 %v812_v36 }
 0x5a2   :  { %3322 = vmatmul.msk.bf16.vlgmr.msra.gmra.mxu1 %vm527_vm10, %v804_v42  ;;  %v3937_v42 = vld [vmem:[%s4371_s30 + $0x74] sm:$0xf] }
 0x5b8   :  { %v922_v45 = vpop.xlane.xlu1 %921 }
 0x5bb   :  { %v799_v33 = vpop.xlane.xlu0 %798 }
 0x5bc   :  { %4154 = vrcp.f32 %v799_v33  ;;  %v3419_v33 = vor.u32 %v3938_v41, %v3418_v40 }
 0x5bd   :  { %4156 = vrcp.f32 %v922_v45  ;;  %v3410_v45 = vld [vmem:[%s4371_s30 + $0x60] sm:$0xf] }
 0x5be   :  { %4158 = vrcp.f32 %v919_v47  ;;  %1224 = vmatpush.bf16.msrb.mxu0 %v3419_v33  ;;  %v3935_v47 = vld [vmem:[%s4371_s30 + $0x64] sm:$0xf] }
 0x5c2   :  { %v4155_v43 = vpop.eup %4154 }
 0x5c3   :  { %v803_v44 = vmul.f32 %v4155_v43, %v4147_v17  ;;  %v4157_v48 = vpop.eup %4156  ;;  %v3420_v43 = vld [vmem:[%s4371_s30 + $0x78] sm:$0xf0] }
 0x5c4   :  { %v926_v51 = vmul.f32 %v4157_v48, %v4145_v16  ;;  %v4159_v52 = vpop.eup %4158 }
 0x5c5   :  { %v805_v46 = vpack.c.bf16 %v803_v44, %v803_v44  ;;  %v925_v53 = vmul.f32 %v4159_v52, %v4669_v21  ;;  %v3922_v21 = vld [vmem:[%s4341_s29 + $0x38] sm:$0xff]  ;;  %v3423_v44 = vor.u32 %v3937_v42, %v3420_v43  ;;  %s5140_s29 = sld [smem:[#allocation9_spill]] }
 0x5c6   :  { %v928_v54 = vpack.c.bf16 %v926_v51, %v926_v51  ;;  %1053 = vmatpush.bf16.msra.mxu3 %v3922_v21  ;;  %v3402_v51 = vld [vmem:[%s4371_s30 + $0x50] sm:$0xf]  ;;  %v3934_v52 = vld [vmem:[%s4371_s30 + $0x54] sm:$0xf0]  ;;  %v3380_v21 = vld [vmem:[%s4371_s30 + $0x28] sm:$0xf0] }
 0x5c7   :  { %3323 = vmatmul.msk.bf16.vlgmr.msrb.gmra.mxu2 %vm527_vm10, %v805_v46  ;;  %v927_v57 = vpack.c.bf16 %v925_v53, %v925_v53  ;;  %v3936_v46 = vld [vmem:[%s4371_s30 + $0x64] sm:$0xf0]  ;;  %v3933_v53 = vld [vmem:[%s4371_s30 + $0x54] sm:$0xf] }
 0x5c8   :  { %v3411_v48 = vor.u32 %v3936_v46, %v3410_v45 }
 0x5ca   :  { %1054 = vmatpush.bf16.msra.mxu3 %v3921_v7  ;;  %1225 = vmatpush.bf16.msrb.mxu0 %v3411_v48 }
 0x5ce   :  { %v951_v49 = vpop.permute.xlu0 %950  ;;  %1055 = vmatpush.bf16.msra.mxu3 %v3920_v9  ;;  %v3370_v9 = vld [vmem:[%s4371_s30 + $0x10] sm:$0xf] }
 0x5cf   :  { %v956_v50 = vsel %vm557_vm9, %v951_v49, 0  ;;  %v3412_v49 = vld [vmem:[%s4371_s30 + $0x68] sm:$0xf0] }
 0x5d0   :  { %965 = vmatpush.bf16.msra.mxu2 %v956_v50  ;;  %v3415_v50 = vor.u32 %v3935_v47, %v3412_v49  ;;  %v4104_v47 = vld [vmem:[%s4361_s19] ss:$0 sm:$0xff]  ;;  %s5144_s19 = sld [smem:[#allocation14_spill]] }
 0x5d2   :  { %1056 = vmatpush.bf16.msra.mxu3 %v3919_v10  ;;  %v3926_v10 = vld [vmem:[%s4371_s30 + $0x14] sm:$0xf0] }
 0x5d6   :  { %v930_v55 = vpop.permute.xlu0 %929  ;;  %1057 = vmatpush.bf16.msra.mxu3 %v3918_v12  ;;  %v3925_v12 = vld [vmem:[%s4371_s30 + $0x14] sm:$0xf] }
 0x5d7   :  { %v935_v56 = vsel %vm557_vm9, %v930_v55, 0  ;;  %3327 = vmatmul.msk.bf16.vlgmr.msra.gmra.mxu2 %vm527_vm10, %v928_v54  ;;  %v3403_v54 = vor.u32 %v3934_v52, %v3402_v51  ;;  %v3404_v55 = vld [vmem:[%s4371_s30 + $0x58] sm:$0xf0]  ;;  %v4105_v52 = vld [vmem:[%s4366_s24] ss:$0 sm:$0xff]  ;;  %s5145_s24 = sld [smem:[#allocation18_spill]] }
 0x5d8   :  { %944 = vmatpush.bf16.msrb.mxu1 %v935_v56  ;;  %v3407_v56 = vor.u32 %v3933_v53, %v3404_v55 }
 0x5d9   :  { %1226 = vmatpush.bf16.msrb.mxu0 %v3403_v54 }
 0x5da   :  { %1058 = vmatpush.bf16.msra.mxu3 %v3917_v13  ;;  %v3371_v13 = vor.u32 %v3926_v10, %v3370_v9 }
 0x5db   :  { %3326 = vmatmul.msk.bf16.vlgmr.msrb.gmra.mxu1 %vm527_vm10, %v927_v57  ;;  %v3394_v57 = vld [vmem:[%s4371_s30 + $0x40] sm:$0xf] }
 0x5dc   :  { %1238 = vmatpush.bf16.msra.mxu1 %v3423_v44 }
 0x5de   :  { %1059 = vmatpush.bf16.msra.mxu3 %v3916_v14  ;;  %v3372_v14 = vld [vmem:[%s4371_s30 + $0x18] sm:$0xf0] }
 0x5e0   :  { %1239 = vmatpush.bf16.msra.mxu1 %v3415_v50 }
 0x5e2   :  { %1060 = vmatpush.bf16.msra.mxu3 %v3915_v25  ;;  %v3362_v25 = vld [vmem:[%s4371_s30] sm:$0xf] }
 0x5e4   :  { %1240 = vmatpush.bf16.msra.mxu1 %v3407_v56 }
 0x604   :  { %v721_v58 = vpop.f32.mrf.mxu2 }
 0x60c   :  { %v723_v59 = vpop.f32.mrf.mxu2 }
 0x60d   :  { %v3931_v59 = vld [vmem:[%s4371_s30 + $0x44] sm:$0xf] }
 0x60f   :  { %v697_v60 = vpop.f32.mrf.mxu1 }
 0x610   :  { %727 = vrot.lane.b32.xlu0 %v697_v60, %s4299_s9 }
 0x617   :  { %v699_v61 = vpop.f32.mrf.mxu1 }
 0x618   :  { %729 = vrot.lane.b32.xlu0 %v721_v58, %s4299_s9  ;;  %v3932_v58 = vld [vmem:[%s4371_s30 + $0x44] sm:$0xf0]  ;;  %v3396_v61 = vld [vmem:[%s4371_s30 + $0x48] sm:$0xf0] }
 0x619   :  { %v3395_v60 = vor.u32 %v3932_v58, %v3394_v57  ;;  %v3954_v57 = vld [vmem:[%s4381_s12 + $0x78] sm:$0xff]  ;;  %v3945_v58 = vld [vmem:[%s4381_s12 + $0x30] sm:$0xff] }
 0x61a   :  { %1436 = vmatpush.bf16.msrb.mxu3 %v3954_v57 }
 0x61b   :  { %1227 = vmatpush.bf16.msrb.mxu0 %v3395_v60  ;;  %v3952_v60 = vld [vmem:[%s4381_s12 + $0x68] sm:$0xff] }
 0x61f   :  { %v823_v62 = vpop.f32.mrf.mxu1 }
 0x620   :  { %850 = vrot.lane.b32.xlu1 %v823_v62, %s4298_s5  ;;  %v3399_v62 = vor.u32 %v3931_v59, %v3396_v61  ;;  %v3944_v59 = vld [vmem:[%s4381_s12 + $0x28] sm:$0xff]  ;;  %v3943_v61 = vld [vmem:[%s4381_s12 + $0x20] sm:$0xff] }
 0x622   :  { %1241 = vmatpush.bf16.msra.mxu1 %v3399_v62  ;;  %v3951_v62 = vld [vmem:[%s4381_s12 + $0x60] sm:$0xff] }
 0x627   :  { %v825_v63 = vpop.f32.mrf.mxu1 }
 0x628   :  { %v3386_v63 = vld [vmem:[%s4371_s30 + $0x30] sm:$0xf] }
 0x64a   :  { %v844_v0 = vpop.f32.mrf.mxu2 }
 0x64b   :  { %852 = vrot.lane.b32.xlu0 %v844_v0, %s4298_s5  ;;  %v3930_v0 = vld [vmem:[%s4371_s30 + $0x34] sm:$0xf0] }
 0x652   :  { %v846_v1 = vpop.f32.mrf.mxu2 }
 0x653   :  { %v3929_v1 = vld [vmem:[%s4371_s30 + $0x34] sm:$0xf] }
 0x658   :  { %v946_v35 = vpop.f32.mrf.mxu1 }
 0x659   :  { %973 = vrot.lane.b32.xlu2 %v946_v35, %s4297_s0  ;;  %v3387_v35 = vor.u32 %v3930_v0, %v3386_v63  ;;  %v3942_v63 = vld [vmem:[%s4381_s12 + $0x18] sm:$0xff] }
 0x65a   :  { %v967_v2 = vpop.f32.mrf.mxu2  ;;  %v3950_v0 = vld [vmem:[%s4381_s12 + $0x58] sm:$0xff] }
 0x65b   :  { %975 = vrot.lane.b32.xlu0 %v967_v2, %s4297_s0  ;;  %v3388_v2 = vld [vmem:[%s4371_s30 + $0x38] sm:$0xf0]  ;;  %1228 = vmatpush.bf16.msrb.mxu0 %v3387_v35  ;;  %v3949_v35 = vld [vmem:[%s4381_s12 + $0x50] sm:$0xff] }
 0x660   :  { %v948_v3 = vpop.f32.mrf.mxu1 }
 0x661   :  { %v3391_v3 = vor.u32 %v3929_v1, %v3388_v2  ;;  %v3941_v1 = vld [vmem:[%s4381_s12 + $0x10] sm:$0xff]  ;;  %v3940_v2 = vld [vmem:[%s4381_s12 + $0x8] sm:$0xff] }
 0x662   :  { %v969_v4 = vpop.f32.mrf.mxu2 }
 0x663   :  { %1242 = vmatpush.bf16.msra.mxu1 %v3391_v3  ;;  %v3378_v4 = vld [vmem:[%s4371_s30 + $0x20] sm:$0xf]  ;;  %v3948_v3 = vld [vmem:[%s4381_s12 + $0x48] sm:$0xff] }
 0x682   :  { %v728_v30 = vpop.permute.xlu0 %727 }
 0x683   :  { %734 = vst.msk [vmem:[#allocation2] sm:$0xff] %vm733_vm11, %v728_v30  ;;  %v3928_v30 = vld [vmem:[%s4371_s30 + $0x24] sm:$0xf0] }
 0x68a   :  { %v730_v5 = vpop.permute.xlu0 %729 }
 0x68b   :  { %735 = vst.msk [vmem:[#allocation2 + $0x8] sm:$0xff] %vm733_vm11, %v730_v5  ;;  %v3927_v5 = vld [vmem:[%s4371_s30 + $0x24] sm:$0xf] }
 0x68c   :  { %v3383_v7 = vor.u32 %v3927_v5, %v3380_v21  ;;  %v3947_v5 = vld [vmem:[%s4381_s12 + $0x40] sm:$0xff] }
 0x68e   :  { %1243 = vmatpush.bf16.msra.mxu1 %v3383_v7 }
 0x692   :  { %v851_v6 = vpop.permute.xlu1 %850 }
 0x693   :  { %857 = vst.msk [vmem:[#allocation2] sm:$0xff] %vm856_vm12, %v851_v6  ;;  %v3379_v6 = vor.u32 %v3928_v30, %v3378_v4  ;;  %v1138_v4 = vld [vmem:[%s5136_s13] sm:$0x3] }
 0x694   :  { %v3939_v30 = vld [vmem:[%s4381_s12] sm:$0xff]  ;;  %v1141_v21 = vperm.slane %v1138_v4, 1 }
 0x695   :  { %1229 = vmatpush.bf16.msrb.mxu0 %v3379_v6  ;;  %v1140_v6 = vperm.slane %v1138_v4, 0 }
 0x699   :  { %1230 = vmatpush.bf16.msrb.mxu0 %v3371_v13 }
 0x6b3   :  { %v974_v15 = vpop.permute.xlu2 %973 }
 0x6b4   :  { %980 = vst.msk [vmem:[#allocation2] sm:$0xff] %vm979_vm13, %v974_v15  ;;  %v3924_v15 = vld [vmem:[%s4371_s30 + $0x4] sm:$0xf0] }
 0x6bb   :  { %v982_v19 = vld [vmem:[#allocation2] sm:$0xff] }
 0x6bd   :  { %v853_v16 = vpop.permute.xlu0 %852 }
 0x6be   :  { %858 = vst.msk [vmem:[#allocation2 + $0x8] sm:$0xff] %vm856_vm12, %v853_v16 }
 0x6cd   :  { %v976_v17 = vpop.permute.xlu0 %975 }
 0x6ce   :  { %981 = vst.msk [vmem:[#allocation2 + $0x8] sm:$0xff] %vm979_vm13, %v976_v17  ;;  %v3375_v17 = vor.u32 %v3925_v12, %v3372_v14 }
 0x6d0   :  { %1244 = vmatpush.bf16.msra.mxu1 %v3375_v17  ;;  %v3961_v17 = vld [vmem:[%s5137_s17 + $0x30] sm:$0xff] }
 0x6d5   :  { %v983_v20 = vld [vmem:[#allocation2 + $0x8] sm:$0xff] }
 0x6d6   :  { %v984_v22 = vpack.c.bf16 %v983_v20, %v982_v19  ;;  %v3923_v19 = vld [vmem:[%s4371_s30 + $0x4] sm:$0xf]  ;;  %v3364_v20 = vld [vmem:[%s4371_s30 + $0x8] sm:$0xf0]  ;;  %s5146_s30 = sld [smem:[#allocation19_spill]] }
 0x6d8   :  { %1061 = vmatmul.bf16.vlgmr.msra.gmra.mxu3 %v984_v22 }
 0x75b   :  { %v1062_v24 = vpop.f32.mrf.mxu3 }
 0x75c   :  { %v1063_v26 = vadd.f32 %v4103_v23, %v1062_v24  ;;  %v3367_v24 = vor.u32 %v3923_v19, %v3364_v20 }
 0x75e   :  { %v4714_v27 = vadd.f32 %v1063_v26, %v4528_v8  ;;  %1245 = vmatpush.bf16.msra.mxu1 %v3367_v24 }
 0x760   :  { %1071 = vadd.xlane.f32.xlu0 %v4714_v27 }
 0x763   :  { %v1064_v28 = vpop.f32.mrf.mxu3 }
 0x764   :  { %v1065_v29 = vadd.f32 %v4103_v23, %v1064_v28  ;;  %v3363_v23 = vor.u32 %v3924_v15, %v3362_v25  ;;  %v3962_v25 = vld [vmem:[%s5137_s17 + $0x38] sm:$0xff] }
 0x766   :  { %v4718_v31 = vadd.f32 %v1065_v29, %v4531_v11  ;;  %1231 = vmatpush.bf16.msrb.mxu0 %v3363_v23 }
 0x768   :  { %1073 = vadd.xlane.f32.xlu1 %v4718_v31 }
 0x76a   :  { %1521 = vmatpush.bf16.msra.mxu0 %v3962_v25  ;;  %v3965_v25 = vld [vmem:[%s5139_s25 + $0x10] sm:$0xff] }
 0x76e   :  { %1522 = vmatpush.bf16.msra.mxu0 %v3961_v17 }
 0x7d3   :  { %v1072_v32 = vpop.xlane.xlu0 %1071 }
 0x7d4   :  { %v1075_v34 = vmul.f32 %v1072_v32, %v4534_v18 }
 0x7d6   :  { %v4723_v36 = vsub.f32 %v4714_v27, %v1075_v34 }
 0x7d8   :  { %v1079_v8 = vmul.f32 %v4723_v36, %v4723_v36 }
 0x7da   :  { %1081 = vadd.xlane.f32.xlu2 %v1079_v8 }
 0x7db   :  { %v1074_v37 = vpop.xlane.xlu1 %1073 }
 0x7dc   :  { %v1076_v11 = vmul.f32 %v1074_v37, %v4534_v18 }
 0x7de   :  { %v4729_v38 = vsub.f32 %v4718_v31, %v1076_v11 }
 0x7e0   :  { %v1080_v39 = vmul.f32 %v4729_v38, %v4729_v38 }
 0x7e2   :  { %1083 = vadd.xlane.f32.xlu0 %v1080_v39 }
 0x84d   :  { %v1082_v16 = vpop.xlane.xlu2 %1081 }
 0x84e   :  { %v1085_v22 = vmul.f32 %v1082_v16, %v4534_v18 }
 0x850   :  { %v1087_v26 = vadd.f32 1e-06, %v1085_v22 }
 0x852   :  { %4160 = vrsqrt.f32 %v1087_v26  ;;  %vm1095_vm15 = vweird.f32 %v1087_v26 }
 0x855   :  { %v1084_v28 = vpop.xlane.xlu0 %1083 }
 0x856   :  { %v1086_v29 = vmul.f32 %v1084_v28, %v4534_v18 }
 0x858   :  { %v4161_v32 = vpop.eup %4160  ;;  %v1088_v34 = vadd.f32 1e-06, %v1086_v29 }
 0x859   :  { %v1090_v8 = vmul.f32 %v4161_v32, %v1087_v26  ;;  %vm1096_vm14 = vweird.f32 %v4161_v32 }
 0x85a   :  { %4162 = vrsqrt.f32 %v1088_v34  ;;  %vm1097_vm0 = vmor %vm1095_vm15, %vm1096_vm14  ;;  %vm1105_vm2 = vweird.f32 %v1088_v34 }
 0x85b   :  { %v1091_v37 = vmul.f32 %v4161_v32, %v1090_v8 }
 0x85d   :  { %v1092_v11 = vmul.f32 0.5, %v1091_v37 }
 0x85f   :  { %v1093_v39 = vsub.f32 1.5, %v1092_v11 }
 0x860   :  { %v4163_v40 = vpop.eup %4162 }
 0x861   :  { %v1094_v41 = vmul.f32 %v4161_v32, %v1093_v39  ;;  %v1100_v42 = vmul.f32 %v4163_v40, %v1088_v34  ;;  %vm1106_vm1 = vweird.f32 %v4163_v40 }
 0x862   :  { %vm1107_vm3 = vmor %vm1105_vm2, %vm1106_vm1 }
 0x863   :  { %v1101_v33 = vmul.f32 %v4163_v40, %v1100_v42  ;;  %v1098_v43 = vsel %vm1097_vm0, %v4161_v32, %v1094_v41  ;;  %v3960_v32 = vld [vmem:[%s5137_s17 + $0x28] sm:$0xff]  ;;  %v3959_v41 = vld [vmem:[%s5137_s17 + $0x20] sm:$0xff] }
 0x864   :  { %v1109_v46 = vmul.f32 %v1098_v43, %v4723_v36  ;;  %v3946_v36 = vld [vmem:[%s4381_s12 + $0x38] sm:$0xff]  ;;  %1523 = vmatpush.bf16.msra.mxu0 %v3960_v32 }
 0x865   :  { %v1102_v44 = vmul.f32 0.5, %v1101_v33  ;;  %1422 = vmatpush.bf16.msrb.mxu2 %v3946_v36 }
 0x866   :  { %v1114_v51 = vmul.f32 %v4104_v47, %v1109_v46 }
 0x867   :  { %v1103_v45 = vsub.f32 1.5, %v1102_v44 }
 0x868   :  { %v1119_v54 = vadd.f32 %v4105_v52, %v1114_v51  ;;  %1524 = vmatpush.bf16.msra.mxu0 %v3959_v41 }
 0x869   :  { %v1104_v48 = vmul.f32 %v4163_v40, %v1103_v45  ;;  %1423 = vmatpush.bf16.msrb.mxu2 %v3945_v58 }
 0x86b   :  { %v1108_v49 = vsel %vm1107_vm3, %v4163_v40, %v1104_v48 }
 0x86c   :  { %v1110_v50 = vmul.f32 %v1108_v49, %v4729_v38  ;;  %v3953_v38 = vld [vmem:[%s4381_s12 + $0x70] sm:$0xff]  ;;  %s5147_s12 = sld [smem:[#allocation15_spill]] }
 0x86d   :  { %1437 = vmatpush.bf16.msrb.mxu3 %v3953_v38  ;;  %1424 = vmatpush.bf16.msrb.mxu2 %v3944_v59 }
 0x86e   :  { %v1115_v53 = vmul.f32 %v4104_v47, %v1110_v50 }
 0x870   :  { %v1120_v55 = vadd.f32 %v4105_v52, %v1115_v53 }
 0x871   :  { %1438 = vmatpush.bf16.msrb.mxu3 %v3952_v60  ;;  %1425 = vmatpush.bf16.msrb.mxu2 %v3943_v61 }
 0x872   :  { %v1121_v56 = vpack.c.bf16 %v1120_v55, %v1119_v54 }
 0x874   :  { %1232 = vmatmul.bf16.vlgmr.msrb.gmra.mxu0 %v1121_v56  ;;  %1246 = vmatmul.bf16.vlgmr.msra.gmra.mxu1 %v1121_v56 }
 0x875   :  { %1439 = vmatpush.bf16.msrb.mxu3 %v3951_v62  ;;  %1426 = vmatpush.bf16.msrb.mxu2 %v3942_v63  ;;  %v3958_v63 = vld [vmem:[%s5137_s17 + $0x18] sm:$0xff] }
 0x876   :  { %1525 = vmatpush.bf16.msra.mxu0 %v3958_v63 }
 0x879   :  { %1440 = vmatpush.bf16.msrb.mxu3 %v3950_v0  ;;  %1427 = vmatpush.bf16.msrb.mxu2 %v3941_v1  ;;  %v3957_v0 = vld [vmem:[%s5137_s17 + $0x10] sm:$0xff]  ;;  %v3956_v1 = vld [vmem:[%s5137_s17 + $0x8] sm:$0xff] }
 0x87a   :  { %1526 = vmatpush.bf16.msra.mxu0 %v3957_v0 }
 0x87d   :  { %1441 = vmatpush.bf16.msrb.mxu3 %v3949_v35  ;;  %1428 = vmatpush.bf16.msrb.mxu2 %v3940_v2  ;;  %v3955_v35 = vld [vmem:[%s5137_s17] sm:$0xff]  ;;  %s4244_s17 = scalar_lea.hbm %s4521_s6, 16 }
 0x87e   :  { %1527 = vmatpush.bf16.msra.mxu0 %v3956_v1 }
 0x881   :  { %1442 = vmatpush.bf16.msrb.mxu3 %v3948_v3  ;;  %1429 = vmatpush.bf16.msrb.mxu2 %v3939_v30  ;;  %v4106_v3 = vld [vmem:[%s5138_s21] ss:$0 sm:$0xff] }
 0x882   :  { %1528 = vmatpush.bf16.msra.mxu0 %v3955_v35 }
 0x885   :  { %1443 = vmatpush.bf16.msrb.mxu3 %v3947_v5 }
 0x8f1   :  { %v1233_v7 = vpop.f32.mrf.mxu0  ;;  %v1247_v9 = vpop.f32.mrf.mxu1 }
 0x8f2   :  { %v1234_v10 = vadd.f32 %v1233_v7, %v1140_v6  ;;  %v1248_v12 = vadd.f32 %v1247_v9, %v1141_v21 }
 0x8f4   :  { %v1256_v13 = vmul.f32 0.044715, %v1234_v10  ;;  %v1257_v14 = vmul.f32 0.044715, %v1248_v12  ;;  %v1252_v53 = vmul.f32 0.5, %v1234_v10  ;;  %v1253_v56 = vmul.f32 0.5, %v1248_v12 }
 0x8f6   :  { %v1260_v15 = vmul.f32 %v1256_v13, %v1234_v10  ;;  %v1261_v16 = vmul.f32 %v1257_v14, %v1248_v12  ;;  %v3966_v14 = vld [vmem:[%s5139_s25 + $0x18] sm:$0xff] }
 0x8f7   :  { %1582 = vmatpush.bf16.msrb.mxu1 %v3966_v14  ;;  %v3623_v14 = vld [vmem:[%s5144_s19 + $0xa8] sm:$0xf] }
 0x8f8   :  { %v1264_v19 = vmul.f32 %v1260_v15, %v1234_v10  ;;  %v1265_v20 = vmul.f32 %v1261_v16, %v1248_v12  ;;  %v3964_v15 = vld [vmem:[%s5139_s25 + $0x8] sm:$0xff]  ;;  %v3963_v16 = vld [vmem:[%s5139_s25] sm:$0xff] }
 0x8f9   :  { %v1235_v22 = vpop.f32.mrf.mxu0  ;;  %v1249_v23 = vpop.f32.mrf.mxu1 }
 0x8fa   :  { %v1268_v24 = vadd.f32 %v1264_v19, %v1234_v10  ;;  %v1236_v26 = vadd.f32 %v1235_v22, %v1140_v6  ;;  %v1250_v28 = vadd.f32 %v1249_v23, %v1141_v21  ;;  %v1269_v29 = vadd.f32 %v1265_v20, %v1248_v12  ;;  %v4107_v19 = vld [vmem:[%s5140_s29] ss:$0 sm:$0xff] }
 0x8fb   :  { %1583 = vmatpush.bf16.msrb.mxu1 %v3965_v25  ;;  %v3989_v25 = vld [vmem:[%s5144_s19 + $0xb0] sm:$0xf0] }
 0x8fc   :  { %v1258_v34 = vmul.f32 0.044715, %v1236_v26  ;;  %v1259_v8 = vmul.f32 0.044715, %v1250_v28  ;;  %v1272_v37 = vmul.f32 0.7978846, %v1268_v24 }
 0x8fd   :  { %v1273_v39 = vmul.f32 0.7978846, %v1269_v29  ;;  %v1254_v54 = vmul.f32 0.5, %v1236_v26  ;;  %v1255_v36 = vmul.f32 0.5, %v1250_v28 }
 0x8fe   :  { %v1262_v11 = vmul.f32 %v1258_v34, %v1236_v26  ;;  %v1263_v40 = vmul.f32 %v1259_v8, %v1250_v28  ;;  %4164 = vtanh.f32 %v1272_v37 }
 0x8ff   :  { %4166 = vtanh.f32 %v1273_v39  ;;  %1584 = vmatpush.bf16.msrb.mxu1 %v3964_v15  ;;  %v3988_v15 = vld [vmem:[%s5144_s19 + $0xac] sm:$0xf] }
 0x900   :  { %v1266_v42 = vmul.f32 %v1262_v11, %v1236_v26  ;;  %v1267_v33 = vmul.f32 %v1263_v40, %v1250_v28 }
 0x902   :  { %v1270_v43 = vadd.f32 %v1266_v42, %v1236_v26  ;;  %v1271_v44 = vadd.f32 %v1267_v33, %v1250_v28  ;;  %v4108_v26 = vld [vmem:[%s5141_s3] ss:$0 sm:$0xff] }
 0x903   :  { %1585 = vmatpush.bf16.msrb.mxu1 %v3963_v16  ;;  %v3624_v16 = vor.u32 %v3989_v25, %v3623_v14  ;;  %v3559_v14 = vld [vmem:[%s5144_s19 + $0x20] sm:$0xf]  ;;  %v3972_v25 = vld [vmem:[%s5144_s19 + $0x28] sm:$0xf0] }
 0x904   :  { %v1274_v45 = vmul.f32 0.7978846, %v1270_v43  ;;  %v1275_v46 = vmul.f32 0.7978846, %v1271_v44  ;;  %v4165_v47 = vpop.eup %4164 }
 0x905   :  { %v4167_v48 = vpop.eup %4166  ;;  %v1280_v49 = vadd.f32 1.0, %v4165_v47  ;;  %1867 = vmatpush.bf16.msra.mxu2 %v3624_v16 }
 0x906   :  { %4168 = vtanh.f32 %v1274_v45  ;;  %v1281_v51 = vadd.f32 1.0, %v4167_v48 }
 0x907   :  { %4170 = vtanh.f32 %v1275_v46  ;;  %v1284_v58 = vmul.f32 %v1280_v49, %v1252_v53 }
 0x908   :  { %v1285_v59 = vmul.f32 %v1281_v51, %v1253_v56 }
 0x90c   :  { %v4169_v50 = vpop.eup %4168 }
 0x90d   :  { %v4171_v52 = vpop.eup %4170  ;;  %v1282_v55 = vadd.f32 1.0, %v4169_v50 }
 0x90e   :  { %v1283_v57 = vadd.f32 1.0, %v4171_v52 }
 0x90f   :  { %v1286_v38 = vmul.f32 %v1282_v55, %v1254_v54 }
 0x910   :  { %v1287_v60 = vmul.f32 %v1283_v57, %v1255_v36 }
 0x911   :  { %v1288_v61 = vpack.c.bf16 %v1286_v38, %v1284_v58  ;;  %v4109_v58 = vld [vmem:[%s5142_s8] ss:$0 sm:$0xff] }
 0x912   :  { %v1289_v62 = vpack.c.bf16 %v1287_v60, %v1285_v59 }
 0x913   :  { %1430 = vmatmul.bf16.vlgmr.msrb.gmra.mxu2 %v1288_v61  ;;  %v4110_v61 = vld [vmem:[%s5143_s14] ss:$0 sm:$0xff] }
 0x914   :  { %1444 = vmatmul.bf16.vlgmr.msrb.gmra.mxu3 %v1289_v62 }
 0x996   :  { %v1431_v2 = vpop.f32.mrf.mxu2 }
 0x997   :  { %v1445_v4 = vpop.f32.mrf.mxu3  ;;  %v1432_v30 = vadd.f32 %v4106_v3, %v1431_v2 }
 0x999   :  { %v1446_v6 = vadd.f32 %v1445_v4, %v1432_v30 }
 0x99b   :  { %v1450_v10 = vadd.f32 %v1446_v6, %v4714_v27 }
 0x99e   :  { %v1433_v5 = vpop.f32.mrf.mxu2 }
 0x99f   :  { %v1434_v21 = vadd.f32 %v4106_v3, %v1433_v5  ;;  %v1447_v7 = vpop.f32.mrf.mxu3 }
 0x9a1   :  { %v1448_v9 = vadd.f32 %v1447_v7, %v1434_v21 }
 0x9a3   :  { %v1451_v12 = vadd.f32 %v1448_v9, %v4718_v31 }
 0x9a5   :  { %v1452_v13 = vpack.c.bf16 %v1451_v12, %v1450_v10 }
 0x9a7   :  { %1529 = vmatmul.bf16.vlgmr.msra.gmra.mxu0 %v1452_v13 }
 0xa24   :  { %v1530_v17 = vpop.f32.mrf.mxu0 }
 0xa25   :  { %v1531_v20 = vadd.f32 %v4107_v19, %v1530_v17  ;;  %v3625_v17 = vld [vmem:[%s5144_s19 + $0xb4] sm:$0xf0] }
 0xa27   :  { %v1535_v24 = vmax.f32 %v1531_v20, 0.0  ;;  %v3990_v20 = vld [vmem:[%s5144_s19 + $0xb8] sm:$0xf0] }
 0xa2c   :  { %v1532_v22 = vpop.f32.mrf.mxu0 }
 0xa2d   :  { %v1533_v23 = vadd.f32 %v4107_v19, %v1532_v22  ;;  %v3631_v19 = vld [vmem:[%s5144_s19 + $0xb0] sm:$0xf]  ;;  %v3628_v22 = vor.u32 %v3988_v15, %v3625_v17  ;;  %v3560_v17 = vor.u32 %v3972_v25, %v3559_v14 }
 0xa2f   :  { %v1536_v27 = vmax.f32 %v1533_v23, 0.0  ;;  %v3632_v23 = vor.u32 %v3990_v20, %v3631_v19  ;;  %1881 = vmatpush.bf16.msra.mxu1 %v3628_v22  ;;  %v3539_v19 = vld [vmem:[%s5144_s19] sm:$0xf]  ;;  %v3968_v20 = vld [vmem:[%s5144_s19 + $0x8] sm:$0xf0] }
 0xa30   :  { %v3967_v22 = vld [vmem:[%s5144_s19 + $0x4] sm:$0xf] }
 0xa31   :  { %v1537_v31 = vpack.c.bf16 %v1536_v27, %v1535_v24  ;;  %1895 = vmatpush.bf16.msra.mxu3 %v3632_v23  ;;  %v3611_v24 = vld [vmem:[%s5144_s19 + $0x90] sm:$0xf]  ;;  %v3986_v27 = vld [vmem:[%s5144_s19 + $0x98] sm:$0xf0] }
 0xa33   :  { %3536 = vmatmul.msk.bf16.vlgmr.msrb.gmra.mxu1 %vm1574_vm4, %v1537_v31  ;;  %v3985_v31 = vld [vmem:[%s5144_s19 + $0x94] sm:$0xf] }
 0xab0   :  { %v1587_v28 = vpop.f32.mrf.mxu1 }
 0xab1   :  { %v1588_v29 = vadd.f32 %v4108_v26, %v1587_v28  ;;  %v3613_v28 = vld [vmem:[%s5144_s19 + $0x9c] sm:$0xf0] }
 0xab3   :  { %v1592_v32 = vadd.f32 %v1588_v29, %v1450_v10  ;;  %v3619_v29 = vld [vmem:[%s5144_s19 + $0x98] sm:$0xf] }
 0xab5   :  { %1596 = vadd.xlane.f32.xlu1 %v1592_v32 }
 0xab8   :  { %v1589_v34 = vpop.f32.mrf.mxu1 }
 0xab9   :  { %v1590_v8 = vadd.f32 %v4108_v26, %v1589_v34  ;;  %v3612_v26 = vor.u32 %v3986_v27, %v3611_v24  ;;  %v3616_v34 = vor.u32 %v3985_v31, %v3613_v28  ;;  %v3540_v24 = vor.u32 %v3968_v20, %v3539_v19  ;;  %v3541_v27 = vld [vmem:[%s5144_s19 + $0xc] sm:$0xf0]  ;;  %v3547_v31 = vld [vmem:[%s5144_s19 + $0x8] sm:$0xf] }
 0xaba   :  { %v3544_v28 = vor.u32 %v3967_v22, %v3541_v27 }
 0xabb   :  { %v1593_v37 = vadd.f32 %v1590_v8, %v1451_v12  ;;  %1868 = vmatpush.bf16.msra.mxu2 %v3612_v26  ;;  %1882 = vmatpush.bf16.msra.mxu1 %v3616_v34  ;;  %v3969_v26 = vld [vmem:[%s5144_s19 + $0x10] sm:$0xf0] }
 0xabd   :  { %1598 = vadd.xlane.f32.xlu2 %v1593_v37 }
 0xb28   :  { %v1597_v11 = vpop.xlane.xlu1 %1596 }
 0xb29   :  { %v1600_v39 = vmul.f32 %v1597_v11, %v4534_v18  ;;  %v3983_v11 = vld [vmem:[%s5144_s19 + $0x80] sm:$0xf0] }
 0xb2b   :  { %v1602_v40 = vsub.f32 %v1592_v32, %v1600_v39  ;;  %v3987_v32 = vld [vmem:[%s5144_s19 + $0xa0] sm:$0xf0]  ;;  %v3982_v39 = vld [vmem:[%s5144_s19 + $0x7c] sm:$0xf] }
 0xb2c   :  { %v3620_v8 = vor.u32 %v3987_v32, %v3619_v29  ;;  %v3548_v29 = vor.u32 %v3969_v26, %v3547_v31 }
 0xb2d   :  { %v1604_v41 = vmul.f32 %v1602_v40, %v1602_v40 }
 0xb2e   :  { %1896 = vmatpush.bf16.msra.mxu3 %v3620_v8 }
 0xb2f   :  { %1606 = vadd.xlane.f32.xlu0 %v1604_v41  ;;  %v3601_v41 = vld [vmem:[%s5144_s19 + $0x84] sm:$0xf0] }
 0xb30   :  { %v1599_v42 = vpop.xlane.xlu2 %1598 }
 0xb31   :  { %v1601_v33 = vmul.f32 %v1599_v42, %v4534_v18  ;;  %v3607_v42 = vld [vmem:[%s5144_s19 + $0x80] sm:$0xf] }
 0xb33   :  { %v1603_v43 = vsub.f32 %v1593_v37, %v1601_v33  ;;  %v3599_v37 = vld [vmem:[%s5144_s19 + $0x78] sm:$0xf]  ;;  %v3984_v33 = vld [vmem:[%s5144_s19 + $0x88] sm:$0xf0] }
 0xb35   :  { %v1605_v44 = vmul.f32 %v1603_v43, %v1603_v43 }
 0xb37   :  { %1608 = vadd.xlane.f32.xlu1 %v1605_v44  ;;  %v3608_v44 = vor.u32 %v3984_v33, %v3607_v42 }
 0xb39   :  { %1897 = vmatpush.bf16.msra.mxu3 %v3608_v44 }
 0xba2   :  { %v1607_v45 = vpop.xlane.xlu0 %1606 }
 0xba3   :  { %v1610_v46 = vmul.f32 %v1607_v45, %v4534_v18  ;;  %v3587_v45 = vld [vmem:[%s5144_s19 + $0x60] sm:$0xf] }
 0xba5   :  { %v1612_v47 = vadd.f32 1e-05, %v1610_v46  ;;  %v3980_v46 = vld [vmem:[%s5144_s19 + $0x68] sm:$0xf0] }
 0xba7   :  { %4172 = vrsqrt.f32 %v1612_v47  ;;  %vm1620_vm6 = vweird.f32 %v1612_v47 }
 0xbaa   :  { %v1609_v48 = vpop.xlane.xlu1 %1608 }
 0xbab   :  { %v1611_v49 = vmul.f32 %v1609_v48, %v4534_v18  ;;  %v3588_v48 = vor.u32 %v3980_v46, %v3587_v45 }
 0xbad   :  { %v4173_v50 = vpop.eup %4172  ;;  %v1613_v51 = vadd.f32 1e-05, %v1611_v49  ;;  %v3589_v49 = vld [vmem:[%s5144_s19 + $0x6c] sm:$0xf0] }
 0xbae   :  { %v1615_v52 = vmul.f32 %v4173_v50, %v1612_v47  ;;  %vm1621_vm5 = vweird.f32 %v4173_v50  ;;  %v3979_v47 = vld [vmem:[%s5144_s19 + $0x64] sm:$0xf] }
 0xbaf   :  { %4174 = vrsqrt.f32 %v1613_v51  ;;  %vm1622_vm7 = vmor %vm1620_vm6, %vm1621_vm5  ;;  %vm1630_vm15 = vweird.f32 %v1613_v51 }
 0xbb0   :  { %v1616_v53 = vmul.f32 %v4173_v50, %v1615_v52  ;;  %v3592_v52 = vor.u32 %v3979_v47, %v3589_v49 }
 0xbb2   :  { %v1617_v54 = vmul.f32 0.5, %v1616_v53 }
 0xbb4   :  { %v1618_v55 = vsub.f32 1.5, %v1617_v54  ;;  %v3575_v54 = vld [vmem:[%s5144_s19 + $0x48] sm:$0xf] }
 0xbb5   :  { %v4175_v56 = vpop.eup %4174 }
 0xbb6   :  { %v1619_v36 = vmul.f32 %v4173_v50, %v1618_v55  ;;  %v1625_v57 = vmul.f32 %v4175_v56, %v1613_v51  ;;  %vm1631_vm14 = vweird.f32 %v4175_v56  ;;  %v3981_v51 = vld [vmem:[%s5144_s19 + $0x70] sm:$0xf0] }
 0xbb7   :  { %vm1632_vm0 = vmor %vm1630_vm15, %vm1631_vm14  ;;  %v3977_v55 = vld [vmem:[%s5144_s19 + $0x50] sm:$0xf0] }
 0xbb8   :  { %v1623_v38 = vsel %vm1622_vm7, %v4173_v50, %v1619_v36  ;;  %v1626_v59 = vmul.f32 %v4175_v56, %v1625_v57  ;;  %v3595_v50 = vld [vmem:[%s5144_s19 + $0x68] sm:$0xf]  ;;  %v3576_v36 = vor.u32 %v3977_v55, %v3575_v54  ;;  %v3577_v57 = vld [vmem:[%s5144_s19 + $0x54] sm:$0xf0]  ;;  %v4112_v55 = vld [vmem:[%s5146_s30] ss:$0 sm:$0xff] }
 0xbb9   :  { %v1634_v60 = vmul.f32 %v1623_v38, %v1602_v40  ;;  %v3600_v40 = vor.u32 %v3983_v11, %v3599_v37  ;;  %v3596_v53 = vor.u32 %v3981_v51, %v3595_v50  ;;  %v3978_v38 = vld [vmem:[%s5144_s19 + $0x58] sm:$0xf0]  ;;  %v4111_v50 = vld [vmem:[%s5145_s24] ss:$0 sm:$0xff] }
 0xbba   :  { %v1627_v62 = vmul.f32 0.5, %v1626_v59 }
 0xbbb   :  { %v1639_v63 = vmul.f32 %v4109_v58, %v1634_v60  ;;  %1869 = vmatpush.bf16.msra.mxu2 %v3600_v40  ;;  %1898 = vmatpush.bf16.msra.mxu3 %v3596_v53 }
 0xbbc   :  { %v1628_v0 = vsub.f32 1.5, %v1627_v62  ;;  %v3974_v62 = vld [vmem:[%s5144_s19 + $0x38] sm:$0xf0] }
 0xbbd   :  { %v4812_v1 = vadd.f32 %v4110_v61, %v1639_v63  ;;  %v3973_v63 = vld [vmem:[%s5144_s19 + $0x34] sm:$0xf] }
 0xbbe   :  { %v1629_v35 = vmul.f32 %v4175_v56, %v1628_v0 }
 0xbbf   :  { %1648 = vadd.xlane.f32.xlu2 %v4812_v1  ;;  %1870 = vmatpush.bf16.msra.mxu2 %v3588_v48 }
 0xbc0   :  { %v1633_v2 = vsel %vm1632_vm0, %v4175_v56, %v1629_v35  ;;  %v3976_v56 = vld [vmem:[%s5144_s19 + $0x4c] sm:$0xf]  ;;  %v3565_v35 = vld [vmem:[%s5144_s19 + $0x3c] sm:$0xf0] }
 0xbc1   :  { %v1635_v3 = vmul.f32 %v1633_v2, %v1603_v43  ;;  %v3604_v43 = vor.u32 %v3982_v39, %v3601_v41  ;;  %v3580_v59 = vor.u32 %v3976_v56, %v3577_v57  ;;  %v3571_v2 = vld [vmem:[%s5144_s19 + $0x38] sm:$0xf] }
 0xbc3   :  { %v1640_v4 = vmul.f32 %v4109_v58, %v1635_v3  ;;  %1883 = vmatpush.bf16.msra.mxu1 %v3604_v43  ;;  %v3583_v58 = vld [vmem:[%s5144_s19 + $0x50] sm:$0xf]  ;;  %1871 = vmatpush.bf16.msra.mxu2 %v3576_v36  ;;  %v3975_v3 = vld [vmem:[%s5144_s19 + $0x40] sm:$0xf0] }
 0xbc4   :  { %v3584_v60 = vor.u32 %v3978_v38, %v3583_v58  ;;  %v1731_v38 = vld [vmem:[%s5147_s12] sm:$0x7] }
 0xbc5   :  { %v4815_v30 = vadd.f32 %v4110_v61, %v1640_v4  ;;  %v3563_v61 = vld [vmem:[%s5144_s19 + $0x30] sm:$0xf]  ;;  %v3568_v4 = vor.u32 %v3973_v63, %v3565_v35  ;;  %v1735_v63 = vperm.slane %v1731_v38, 2 }
 0xbc6   :  { %1899 = vmatpush.bf16.msra.mxu3 %v3584_v60  ;;  %v3564_v0 = vor.u32 %v3974_v62, %v3563_v61  ;;  %v1733_v62 = vperm.slane %v1731_v38, 0 }
 0xbc7   :  { %1650 = vadd.xlane.f32.xlu0 %v4815_v30  ;;  %1884 = vmatpush.bf16.msra.mxu1 %v3592_v52 }
 0xbc8   :  { %1872 = vmatpush.bf16.msra.mxu2 %v3564_v0 }
 0xbcb   :  { %1885 = vmatpush.bf16.msra.mxu1 %v3580_v59  ;;  %v1734_v59 = vperm.slane %v1731_v38, 1 }
 0xbcf   :  { %1886 = vmatpush.bf16.msra.mxu1 %v3568_v4 }
 0xc32   :  { %v1649_v5 = vpop.xlane.xlu2 %1648 }
 0xc33   :  { %v1652_v6 = vmul.f32 %v1649_v5, %v4534_v18  ;;  %v3572_v5 = vor.u32 %v3975_v3, %v3571_v2 }
 0xc35   :  { %v4820_v21 = vsub.f32 %v4812_v1, %v1652_v6  ;;  %1900 = vmatpush.bf16.msra.mxu3 %v3572_v5  ;;  %v3551_v6 = vld [vmem:[%s5144_s19 + $0x18] sm:$0xf] }
 0xc37   :  { %v1656_v7 = vmul.f32 %v4820_v21, %v4820_v21 }
 0xc39   :  { %1658 = vadd.xlane.f32.xlu1 %v1656_v7  ;;  %v3971_v7 = vld [vmem:[%s5144_s19 + $0x20] sm:$0xf0]  ;;  %1901 = vmatpush.bf16.msra.mxu3 %v3560_v17 }
 0xc3a   :  { %v1651_v9 = vpop.xlane.xlu0 %1650 }
 0xc3b   :  { %v1653_v10 = vmul.f32 %v1651_v9, %v4534_v18  ;;  %v3970_v9 = vld [vmem:[%s5144_s19 + $0x1c] sm:$0xf] }
 0xc3d   :  { %v4826_v12 = vsub.f32 %v4815_v30, %v1653_v10  ;;  %v3552_v10 = vor.u32 %v3971_v7, %v3551_v6  ;;  %1902 = vmatpush.bf16.msra.mxu3 %v3548_v29 }
 0xc3f   :  { %v1657_v13 = vmul.f32 %v4826_v12, %v4826_v12  ;;  %1873 = vmatpush.bf16.msra.mxu2 %v3552_v10 }
 0xc41   :  { %1660 = vadd.xlane.f32.xlu2 %v1657_v13  ;;  %v3553_v13 = vld [vmem:[%s5144_s19 + $0x24] sm:$0xf0] }
 0xc42   :  { %v3556_v16 = vor.u32 %v3970_v9, %v3553_v13 }
 0xc43   :  { %1874 = vmatpush.bf16.msra.mxu2 %v3540_v24 }
 0xc44   :  { %1887 = vmatpush.bf16.msra.mxu1 %v3556_v16 }
 0xc48   :  { %1888 = vmatpush.bf16.msra.mxu1 %v3544_v28 }
 0xcac   :  { %v1659_v15 = vpop.xlane.xlu1 %1658 }
 0xcad   :  { %v1662_v23 = vmul.f32 %v1659_v15, %v4534_v18 }
 0xcaf   :  { %v1664_v32 = vadd.f32 1e-06, %v1662_v23 }
 0xcb1   :  { %4176 = vrsqrt.f32 %v1664_v32  ;;  %vm1672_vm2 = vweird.f32 %v1664_v32 }
 0xcb4   :  { %v1661_v34 = vpop.xlane.xlu2 %1660 }
 0xcb5   :  { %v1663_v8 = vmul.f32 %v1661_v34, %v4534_v18 }
 0xcb7   :  { %v4177_v37 = vpop.eup %4176  ;;  %v1665_v11 = vadd.f32 1e-06, %v1663_v8 }
 0xcb8   :  { %v1667_v39 = vmul.f32 %v4177_v37, %v1664_v32  ;;  %vm1673_vm1 = vweird.f32 %v4177_v37 }
 0xcb9   :  { %4178 = vrsqrt.f32 %v1665_v11  ;;  %vm1674_vm3 = vmor %vm1672_vm2, %vm1673_vm1  ;;  %vm1682_vm6 = vweird.f32 %v1665_v11 }
 0xcba   :  { %v1668_v40 = vmul.f32 %v4177_v37, %v1667_v39 }
 0xcbc   :  { %v1669_v41 = vmul.f32 0.5, %v1668_v40 }
 0xcbe   :  { %v1670_v42 = vsub.f32 1.5, %v1669_v41 }
 0xcbf   :  { %v4179_v33 = vpop.eup %4178 }
 0xcc0   :  { %v1671_v43 = vmul.f32 %v4177_v37, %v1670_v42  ;;  %v1677_v44 = vmul.f32 %v4179_v33, %v1665_v11  ;;  %vm1683_vm5 = vweird.f32 %v4179_v33 }
 0xcc1   :  { %vm1684_vm7 = vmor %vm1682_vm6, %vm1683_vm5 }
 0xcc2   :  { %v1678_v45 = vmul.f32 %v4179_v33, %v1677_v44  ;;  %v1675_v46 = vsel %vm1674_vm3, %v4177_v37, %v1671_v43 }
 0xcc3   :  { %v1686_v49 = vmul.f32 %v1675_v46, %v4820_v21 }
 0xcc4   :  { %v1679_v47 = vmul.f32 0.5, %v1678_v45 }
 0xcc5   :  { %v1691_v54 = vmul.f32 %v4111_v50, %v1686_v49 }
 0xcc6   :  { %v1680_v48 = vsub.f32 1.5, %v1679_v47 }
 0xcc7   :  { %v1696_v36 = vadd.f32 %v4112_v55, %v1691_v54 }
 0xcc8   :  { %v1681_v51 = vmul.f32 %v4179_v33, %v1680_v48 }
 0xcca   :  { %v1685_v52 = vsel %vm1684_vm7, %v4179_v33, %v1681_v51 }
 0xccb   :  { %v1687_v53 = vmul.f32 %v1685_v52, %v4826_v12 }
 0xccd   :  { %v1692_v56 = vmul.f32 %v4111_v50, %v1687_v53 }
 0xccf   :  { %v1697_v57 = vadd.f32 %v4112_v55, %v1692_v56 }
 0xcd1   :  { %v1698_v58 = vpack.c.bf16 %v1697_v57, %v1696_v36 }
 0xcd3   :  { %1875 = vmatmul.bf16.vlgmr.msra.gmra.mxu2 %v1698_v58  ;;  %1889 = vmatmul.bf16.vlgmr.msra.gmra.mxu1 %v1698_v58 }
 0xcd4   :  { %1903 = vmatmul.bf16.vlgmr.msra.gmra.mxu3 %v1698_v58 }
 0xd50   :  { %v1890_v21 = vpop.f32.mrf.mxu1 }
 0xd51   :  { %v1891_v60 = vadd.f32 %v1890_v21, %v1734_v59 }
 0xd53   :  { %v1913_v61 = vpack.c.bf16 %v1891_v60, %v1891_v60 }
 0xd55   :  { %v1919_v0 = vsel %vm488_vm8, %v1913_v61, 0  ;;  %v2025_v35 = vunpack.c.l.b16 %v1913_v61 }
 0xd56   :  { %v1876_v12 = vpop.f32.mrf.mxu2  ;;  %1928 = vmatpush.bf16.xpose.msrb.mxu0 %v1919_v0 }
 0xd57   :  { %v2026_v2 = vpack.c.b16 %v2025_v35, %v2025_v35  ;;  %v1877_v3 = vadd.f32 %v1876_v12, %v1733_v62  ;;  %v1904_v4 = vpop.f32.mrf.mxu3 }
 0xd58   :  { %v1905_v5 = vadd.f32 %v1904_v4, %v1735_v63  ;;  %v1892_v6 = vpop.f32.mrf.mxu1 }
 0xd59   :  { %v1909_v7 = vmul.f32 0.17677669, %v1877_v3  ;;  %v1893_v9 = vadd.f32 %v1892_v6, %v1734_v59  ;;  %2027 = vrot.lane.b32.xlu0 %v2026_v2, %s4297_s0 }
 0xd5a   :  { %v4887_v10 = vpack.c.bf16 %v1905_v5, %v1905_v5 }
 0xd5b   :  { %v1911_v13 = vpack.c.bf16 %v1909_v7, %v1909_v7  ;;  %v1914_v14 = vpack.c.bf16 %v1893_v9, %v1893_v9 }
 0xd5c   :  { %v1983_v25 = vsel %vm557_vm9, %v4887_v10, 0  ;;  %v2102_v6 = vunpack.c.l.b16 %v4887_v10 }
 0xd5d   :  { %v2020_v15 = vunpack.c.l.b16 %v1911_v13  ;;  %v1938_v16 = vsel %vm488_vm8, %v1914_v14, 0  ;;  %v2054_v17 = vunpack.c.l.b16 %v1914_v14  ;;  %3633 = vmatmul.msk.bf16.vlgmr.msrb.gmra.mxu0 %vm488_vm8, %v1911_v13 }
 0xd5e   :  { %1992 = vmatpush.bf16.msra.mxu0 %v1983_v25  ;;  %v1878_v19 = vpop.f32.mrf.mxu2  ;;  %1947 = vmatpush.bf16.xpose.msrb.mxu2 %v1938_v16  ;;  %v4929_v7 = vpack.c.b16 %v2102_v6, %v2102_v6 }
 0xd5f   :  { %v2055_v20 = vpack.c.b16 %v2054_v17, %v2054_v17  ;;  %v1879_v22 = vadd.f32 %v1878_v19, %v1733_v62  ;;  %v1906_v23 = vpop.f32.mrf.mxu3  ;;  %v2021_v24 = vpack.c.b16 %v2020_v15, %v2020_v15 }
 0xd60   :  { %v1907_v27 = vadd.f32 %v1906_v23, %v1735_v63 }
 0xd61   :  { %v1910_v31 = vmul.f32 0.17677669, %v1879_v22  ;;  %2056 = vrot.lane.b32.xlu1 %v2055_v20, %s4297_s0  ;;  %2022 = vrot.lane.b32.xlu2 %v2021_v24, %s4297_s0 }
 0xd62   :  { %v4895_v26 = vpack.c.bf16 %v1907_v27, %v1907_v27 }
 0xd63   :  { %v1912_v28 = vpack.c.bf16 %v1910_v31, %v1910_v31 }
 0xd64   :  { %v2002_v29 = vsel %vm557_vm9, %v4895_v26, 0  ;;  %v2126_v27 = vunpack.c.l.b16 %v4895_v26 }
 0xd65   :  { %v2049_v32 = vunpack.c.l.b16 %v1912_v28  ;;  %2011 = vmatpush.bf16.msrb.mxu1 %v2002_v29  ;;  %3634 = vmatmul.msk.bf16.vlgmr.msrb.gmra.mxu2 %vm488_vm8, %v1912_v28 }
 0xd66   :  { %v2127_v31 = vpack.c.b16 %v2126_v27, %v2126_v27 }
 0xd67   :  { %v2050_v34 = vpack.c.b16 %v2049_v32, %v2049_v32 }
 0xd69   :  { %2184 = vrot.lane.b32.xlu1 %v2055_v20, %s4298_s5  ;;  %2051 = vrot.lane.b32.xlu0 %v2050_v34, %s4297_s0 }
 0xd6a   :  { %2159 = vrot.lane.b32.xlu2 %v2021_v24, %s4298_s5 }
 0xd71   :  { %2283 = vrot.lane.b32.xlu1 %v2026_v2, %s4299_s9  ;;  %2161 = vrot.lane.b32.xlu0 %v2026_v2, %s4298_s5 }
 0xd72   :  { %2306 = vrot.lane.b32.xlu2 %v2055_v20, %s4299_s9 }
 0xd79   :  { %2304 = vrot.lane.b32.xlu1 %v2050_v34, %s4299_s9  ;;  %2182 = vrot.lane.b32.xlu0 %v2050_v34, %s4298_s5 }
 0xd81   :  { %2281 = vrot.lane.b32.xlu0 %v2021_v24, %s4299_s9 }
 0xdbb   :  { %v2023_v8 = vpop.permute.xlu2 %2022 }
 0xdc4   :  { %v2160_v39 = vpop.permute.xlu2 %2159 }
 0xdcb   :  { %v2028_v37 = vpop.permute.xlu0 %2027 }
 0xdcc   :  { %v2033_v11 = vsel %vm488_vm8, %v2028_v37, 0  ;;  %v2307_v42 = vpop.permute.xlu2 %2306 }
 0xdcd   :  { %2042 = vmatpush.bf16.xpose.msra.mxu2 %v2033_v11  ;;  %v2312_v47 = vsel %vm488_vm8, %v2307_v42, 0 }
 0xdd3   :  { %v2057_v40 = vpop.permute.xlu1 %2056 }
 0xdd4   :  { %v2062_v41 = vsel %vm488_vm8, %v2057_v40, 0  ;;  %3637 = vmatmul.msk.bf16.vlgmr.msra.gmra.mxu2 %vm488_vm8, %v2023_v8 }
 0xdd5   :  { %2071 = vmatpush.bf16.xpose.msrb.mxu3 %v2062_v41 }
 0xdda   :  { %v1930_v33 = vpop.f32.mrf.mxu0 }
 0xddb   :  { %v2185_v43 = vpop.permute.xlu1 %2184  ;;  %v2052_v45 = vpop.permute.xlu0 %2051  ;;  %v1953_v46 = vsel %vm527_vm10, %v1930_v33, -inf }
 0xddc   :  { %v2190_v44 = vsel %vm488_vm8, %v2185_v43, 0  ;;  %3638 = vmatmul.msk.bf16.vlgmr.msrb.gmra.mxu3 %vm488_vm8, %v2052_v45  ;;  %1954 = vmax.xlane.f32.xlu2 %v1953_v46 }
 0xddd   :  { %2199 = vmatpush.bf16.xpose.msra.mxu3 %v2190_v44 }
 0xde2   :  { %v1932_v48 = vpop.f32.mrf.mxu0 }
 0xde3   :  { %v2284_v49 = vpop.permute.xlu1 %2283  ;;  %v2162_v51 = vpop.permute.xlu0 %2161 }
 0xde4   :  { %v2289_v50 = vsel %vm488_vm8, %v2284_v49, 0  ;;  %v2167_v52 = vsel %vm488_vm8, %v2162_v51, 0 }
 0xde5   :  { %2321 = vmatpush.bf16.xpose.msrb.mxu3 %v2312_v47  ;;  %2176 = vmatpush.bf16.xpose.msrb.mxu2 %v2167_v52 }
 0xde8   :  { %v1949_v53 = vpop.f32.mrf.mxu2 }
 0xde9   :  { %v1956_v54 = vsel %vm527_vm10, %v1949_v53, -inf }
 0xdea   :  { %1957 = vmax.xlane.f32.xlu0 %v1956_v54 }
 0xdeb   :  { %v2183_v55 = vpop.permute.xlu0 %2182  ;;  %v2305_v36 = vpop.permute.xlu1 %2304 }
 0xdec   :  { %3641 = vmatmul.msk.bf16.vlgmr.msrb.gmra.mxu2 %vm488_vm8, %v2160_v39  ;;  %3642 = vmatmul.msk.bf16.vlgmr.msra.gmra.mxu3 %vm488_vm8, %v2183_v55 }
 0xded   :  { %2298 = vmatpush.bf16.xpose.msra.mxu2 %v2289_v50 }
 0xdf0   :  { %v1951_v56 = vpop.f32.mrf.mxu2 }
 0xdf3   :  { %v2282_v57 = vpop.permute.xlu0 %2281 }
 0xdfc   :  { %3645 = vmatmul.msk.bf16.vlgmr.msra.gmra.mxu2 %vm488_vm8, %v2282_v57  ;;  %3646 = vmatmul.msk.bf16.vlgmr.msrb.gmra.mxu3 %vm488_vm8, %v2305_v36 }
 0xe4f   :  { %v1955_v58 = vpop.xlane.xlu2 %1954 }
 0xe50   :  { %v1959_v38 = vsub.f32 %v1930_v33, %v1955_v58 }
 0xe52   :  { %v1961_v59 = vmul.f32 1.442695, %v1959_v38 }
 0xe54   :  { %4180 = vpow2.f32 %v1961_v59 }
 0xe57   :  { %v2044_v21 = vpop.f32.mrf.mxu2 }
 0xe58   :  { %v2077_v60 = vsel %vm527_vm10, %v2044_v21, -inf }
 0xe59   :  { %2078 = vmax.xlane.f32.xlu1 %v2077_v60 }
 0xe5a   :  { %v4181_v61 = vpop.eup %4180 }
 0xe5b   :  { %v1965_v0 = vsel %vm527_vm10, %v4181_v61, 0.0 }
 0xe5d   :  { %v1958_v19 = vpop.xlane.xlu0 %1957 }
 0xe5e   :  { %v1960_v10 = vsub.f32 %v1949_v53, %v1958_v19 }
 0xe5f   :  { %v2046_v62 = vpop.f32.mrf.mxu2  ;;  %v2073_v63 = vpop.f32.mrf.mxu3 }
 0xe60   :  { %v2080_v35 = vsel %vm527_vm10, %v2073_v63, -inf  ;;  %v1963_v20 = vmul.f32 1.442695, %v1960_v10 }
 0xe61   :  { %1966 = vadd.xlane.f32.xlu1 %v1965_v0  ;;  %2081 = vmax.xlane.f32.xlu2 %v2080_v35 }
 0xe62   :  { %4182 = vpow2.f32 %v1963_v20 }
 0xe67   :  { %v2075_v12 = vpop.f32.mrf.mxu3 }
 0xe68   :  { %v4183_v22 = vpop.eup %4182 }
 0xe69   :  { %v1968_v23 = vsel %vm527_vm10, %v4183_v22, 0.0 }
 0xe6f   :  { %v2178_v2 = vpop.f32.mrf.mxu2  ;;  %v2201_v3 = vpop.f32.mrf.mxu3 }
 0xe70   :  { %v2205_v4 = vsel %vm527_vm10, %v2178_v2, -inf  ;;  %v2208_v5 = vsel %vm527_vm10, %v2201_v3, -inf }
 0xe71   :  { %2206 = vmax.xlane.f32.xlu0 %v2205_v4  ;;  %2209 = vmax.xlane.f32.xlu1 %v2208_v5 }
 0xe77   :  { %v2180_v9 = vpop.f32.mrf.mxu2  ;;  %v2203_v13 = vpop.f32.mrf.mxu3 }
 0xe79   :  { %2104 = vrot.lane.b32.xlu2 %v4929_v7, %s4297_s0 }
 0xe7f   :  { %v4933_v14 = vpop.f32.mrf.mxu2  ;;  %v2323_v25 = vpop.f32.mrf.mxu3 }
 0xe80   :  { %v2330_v15 = vsel %vm527_vm10, %v2323_v25, -inf  ;;  %v2327_v24 = vsel %vm527_vm10, %v4933_v14, -inf }
 0xe81   :  { %2331 = vmax.xlane.f32.xlu0 %v2330_v15 }
 0xe87   :  { %v2302_v16 = vpop.f32.mrf.mxu2  ;;  %v2325_v17 = vpop.f32.mrf.mxu3 }
 0xe8a   :  { %2229 = vrot.lane.b32.xlu1 %v4929_v7, %s4298_s5 }
 0xea2   :  { %1969 = vadd.xlane.f32.xlu2 %v1968_v23 }
 0xeaa   :  { %2328 = vmax.xlane.f32.xlu2 %v2327_v24 }
 0xec2   :  { %2250 = vrot.lane.b32.xlu2 %v2127_v31, %s4298_s5 }
 0xecc   :  { %v2079_v28 = vpop.xlane.xlu1 %2078 }
 0xecd   :  { %v2083_v29 = vsub.f32 %v2044_v21, %v2079_v28 }
 0xecf   :  { %v2085_v32 = vmul.f32 1.442695, %v2083_v29 }
 0xed1   :  { %4184 = vpow2.f32 %v2085_v32 }
 0xed4   :  { %v1967_v34 = vpop.xlane.xlu1 %1966  ;;  %v2082_v8 = vpop.xlane.xlu2 %2081 }
 0xed5   :  { %4186 = vrcp.f32 %v1967_v34  ;;  %v2084_v37 = vsub.f32 %v2073_v63, %v2082_v8 }
 0xed7   :  { %v4185_v11 = vpop.eup %4184  ;;  %v2087_v39 = vmul.f32 1.442695, %v2084_v37 }
 0xed8   :  { %v2089_v40 = vsel %vm527_vm10, %v4185_v11, 0.0 }
 0xed9   :  { %2090 = vadd.xlane.f32.xlu0 %v2089_v40  ;;  %4188 = vpow2.f32 %v2087_v39 }
 0xedb   :  { %v4187_v41 = vpop.eup %4186 }
 0xedc   :  { %v1973_v42 = vmul.f32 %v4187_v41, %v4181_v61  ;;  %v2105_v26 = vpop.permute.xlu2 %2104 }
 0xedd   :  { %v2110_v43 = vsel %vm557_vm9, %v2105_v26, 0 }
 0xede   :  { %v1975_v33 = vpack.c.bf16 %v1973_v42, %v1973_v42  ;;  %2119 = vmatpush.bf16.msrb.mxu0 %v2110_v43 }
 0xedf   :  { %v4189_v44 = vpop.eup %4188 }
 0xee0   :  { %3635 = vmatmul.msk.bf16.vlgmr.msra.gmra.mxu0 %vm527_vm10, %v1975_v33  ;;  %v2092_v45 = vsel %vm527_vm10, %v4189_v44, 0.0 }
 0xee1   :  { %2093 = vadd.xlane.f32.xlu1 %v2092_v45 }
 0xee4   :  { %v2207_v46 = vpop.xlane.xlu0 %2206  ;;  %v2210_v47 = vpop.xlane.xlu1 %2209 }
 0xee5   :  { %v2211_v48 = vsub.f32 %v2178_v2, %v2207_v46  ;;  %v2212_v50 = vsub.f32 %v2201_v3, %v2210_v47 }
 0xee7   :  { %v2213_v49 = vmul.f32 1.442695, %v2211_v48  ;;  %v2215_v51 = vmul.f32 1.442695, %v2212_v50 }
 0xee9   :  { %4190 = vpow2.f32 %v2213_v49 }
 0xeea   :  { %4192 = vpow2.f32 %v2215_v51 }
 0xeed   :  { %2128 = vrot.lane.b32.xlu0 %v2127_v31, %s4297_s0 }
 0xeef   :  { %v4191_v52 = vpop.eup %4190 }
 0xef0   :  { %v2217_v53 = vsel %vm527_vm10, %v4191_v52, 0.0  ;;  %v4193_v55 = vpop.eup %4192 }
 0xef1   :  { %2218 = vadd.xlane.f32.xlu1 %v2217_v53  ;;  %v2220_v57 = vsel %vm527_vm10, %v4193_v55, 0.0 }
 0xef4   :  { %v2332_v54 = vpop.xlane.xlu0 %2331 }
 0xef5   :  { %v2334_v56 = vsub.f32 %v2323_v25, %v2332_v54 }
 0xef7   :  { %v2337_v36 = vmul.f32 1.442695, %v2334_v56 }
 0xef9   :  { %4194 = vpow2.f32 %v2337_v36  ;;  %2221 = vadd.xlane.f32.xlu1 %v2220_v57 }
 0xefc   :  { %v2230_v58 = vpop.permute.xlu1 %2229 }
 0xefd   :  { %v2235_v38 = vsel %vm557_vm9, %v2230_v58, 0 }
 0xefe   :  { %2244 = vmatpush.bf16.msra.mxu0 %v2235_v38 }
 0xeff   :  { %v4195_v59 = vpop.eup %4194 }
 0xf00   :  { %v2342_v21 = vsel %vm527_vm10, %v4195_v59, 0.0 }
 0xf01   :  { %2343 = vadd.xlane.f32.xlu2 %v2342_v21 }
 0xf12   :  { %2351 = vrot.lane.b32.xlu1 %v4929_v7, %s4299_s9 }
 0xf15   :  { %v1970_v60 = vpop.xlane.xlu2 %1969 }
 0xf16   :  { %4196 = vrcp.f32 %v1970_v60  ;;  %v3998_v60 = vld [vmem:[%s5148_s15 + $0x38] sm:$0xff] }
 0xf17   :  { %2474 = vmatpush.bf16.msrb.mxu2 %v3998_v60 }
 0xf1a   :  { %2372 = vrot.lane.b32.xlu1 %v2127_v31, %s4299_s9 }
 0xf1c   :  { %v4197_v61 = vpop.eup %4196 }
 0xf1d   :  { %v1974_v62 = vmul.f32 %v4197_v61, %v4183_v22  ;;  %v2329_v63 = vpop.xlane.xlu2 %2328  ;;  %v3997_v61 = vld [vmem:[%s5148_s15 + $0x30] sm:$0xff] }
 0xf1e   :  { %v2333_v0 = vsub.f32 %v4933_v14, %v2329_v63  ;;  %2475 = vmatpush.bf16.msrb.mxu2 %v3997_v61  ;;  %v3995_v63 = vld [vmem:[%s5148_s15 + $0x20] sm:$0xff]  ;;  %v3691_v61 = vld [vmem:[%s5150_s18 + $0x10] sm:$0xf] }
 0xf1f   :  { %v1976_v35 = vpack.c.bf16 %v1974_v62, %v1974_v62  ;;  %v3996_v62 = vld [vmem:[%s5148_s15 + $0x28] sm:$0xff] }
 0xf20   :  { %v2335_v12 = vmul.f32 1.442695, %v2333_v0  ;;  %v3994_v0 = vld [vmem:[%s5148_s15 + $0x18] sm:$0xff] }
 0xf21   :  { %3636 = vmatmul.msk.bf16.vlgmr.msrb.gmra.mxu1 %vm527_vm10, %v1976_v35  ;;  %v3993_v35 = vld [vmem:[%s5148_s15 + $0x10] sm:$0xff] }
 0xf22   :  { %4198 = vpow2.f32 %v2335_v12  ;;  %2476 = vmatpush.bf16.msrb.mxu2 %v3996_v62  ;;  %v3992_v12 = vld [vmem:[%s5148_s15 + $0x8] sm:$0xff]  ;;  %v4002_v62 = vld [vmem:[%s5150_s18 + $0x14] sm:$0xf0] }
 0xf25   :  { %v2251_v25 = vpop.permute.xlu2 %2250 }
 0xf26   :  { %v2256_v19 = vsel %vm557_vm9, %v2251_v25, 0  ;;  %2477 = vmatpush.bf16.msrb.mxu2 %v3995_v63  ;;  %v4001_v63 = vld [vmem:[%s5150_s18 + $0x14] sm:$0xf] }
 0xf28   :  { %v4199_v2 = vpop.eup %4198 }
 0xf29   :  { %v2339_v3 = vsel %vm527_vm10, %v4199_v2, 0.0 }
 0xf2a   :  { %2340 = vadd.xlane.f32.xlu0 %v2339_v3  ;;  %2478 = vmatpush.bf16.msrb.mxu2 %v3994_v0  ;;  %v3692_v0 = vor.u32 %v4002_v62, %v3691_v61 }
 0xf2e   :  { %2479 = vmatpush.bf16.msrb.mxu2 %v3993_v35  ;;  %v3693_v35 = vld [vmem:[%s5150_s18 + $0x18] sm:$0xf0] }
 0xf32   :  { %2480 = vmatpush.bf16.msrb.mxu2 %v3992_v12  ;;  %v3683_v12 = vld [vmem:[%s5150_s18] sm:$0xf] }
 0xf4c   :  { %v2091_v4 = vpop.xlane.xlu0 %2090 }
 0xf4d   :  { %4200 = vrcp.f32 %v2091_v4 }
 0xf53   :  { %v4201_v5 = vpop.eup %4200 }
 0xf54   :  { %v2097_v6 = vmul.f32 %v4201_v5, %v4185_v11  ;;  %v2094_v7 = vpop.xlane.xlu1 %2093 }
 0xf55   :  { %4202 = vrcp.f32 %v2094_v7 }
 0xf56   :  { %v2099_v9 = vpack.c.bf16 %v2097_v6, %v2097_v6 }
 0xf58   :  { %3639 = vmatmul.msk.bf16.vlgmr.msrb.gmra.mxu0 %vm527_vm10, %v2099_v9  ;;  %v4113_v9 = vld [vmem:[%s5149_s16] ss:$0 sm:$0xff] }
 0xf5b   :  { %v4203_v13 = vpop.eup %4202 }
 0xf5c   :  { %v2098_v15 = vmul.f32 %v4203_v13, %v4189_v44 }
 0xf5d   :  { %v1994_v14 = vpop.f32.mrf.mxu0 }
 0xf5e   :  { %2017 = vst.msk [vmem:[#allocation2] sm:$0xff] %vm488_vm8, %v1994_v14  ;;  %v2100_v10 = vpack.c.bf16 %v2098_v15, %v2098_v15 }
 0xf5f   :  { %v2129_v16 = vpop.permute.xlu0 %2128 }
 0xf60   :  { %v2134_v17 = vsel %vm557_vm9, %v2129_v16, 0 }
 0xf61   :  { %2143 = vmatpush.bf16.msra.mxu1 %v2134_v17 }
 0xf64   :  { %3640 = vmatmul.msk.bf16.vlgmr.msra.gmra.mxu1 %vm527_vm10, %v2100_v10  ;;  %v2219_v20 = vpop.xlane.xlu1 %2218 }
 0xf65   :  { %2265 = vmatpush.bf16.msrb.mxu1 %v2256_v19  ;;  %v1996_v22 = vpop.f32.mrf.mxu0  ;;  %4204 = vrcp.f32 %v2219_v20 }
 0xf6b   :  { %v4205_v23 = vpop.eup %4204 }
 0xf6c   :  { %v2225_v24 = vmul.f32 %v4205_v23, %v4191_v52  ;;  %v2222_v27 = vpop.xlane.xlu1 %2221 }
 0xf6d   :  { %4206 = vrcp.f32 %v2222_v27  ;;  %v3739_v27 = vld [vmem:[%s5150_s18 + $0x70] sm:$0xf] }
 0xf6e   :  { %v2227_v31 = vpack.c.bf16 %v2225_v24, %v2225_v24 }
 0xf70   :  { %3643 = vmatmul.msk.bf16.vlgmr.msra.gmra.mxu0 %vm527_vm10, %v2227_v31  ;;  %v4014_v31 = vld [vmem:[%s5150_s18 + $0x74] sm:$0xf0] }
 0xf73   :  { %v4207_v28 = vpop.eup %4206 }
 0xf74   :  { %v2226_v29 = vmul.f32 %v4207_v28, %v4193_v55  ;;  %v2344_v34 = vpop.xlane.xlu2 %2343  ;;  %v4013_v28 = vld [vmem:[%s5150_s18 + $0x74] sm:$0xf] }
 0xf75   :  { %4208 = vrcp.f32 %v2344_v34 }
 0xf76   :  { %v2228_v32 = vpack.c.bf16 %v2226_v29, %v2226_v29  ;;  %v3740_v29 = vor.u32 %v4014_v31, %v3739_v27 }
 0xf78   :  { %3644 = vmatmul.msk.bf16.vlgmr.msrb.gmra.mxu1 %vm527_vm10, %v2228_v32  ;;  %v3741_v32 = vld [vmem:[%s5150_s18 + $0x78] sm:$0xf0]  ;;  %2645 = vmatpush.bf16.msra.mxu3 %v3740_v29 }
 0xf79   :  { %v3744_v34 = vor.u32 %v4013_v28, %v3741_v32 }
 0xf7b   :  { %v4209_v11 = vpop.eup %4208 }
 0xf7c   :  { %v2348_v39 = vmul.f32 %v4209_v11, %v4195_v59  ;;  %v4011_v11 = vld [vmem:[%s5150_s18 + $0x64] sm:$0xf] }
 0xf7e   :  { %v2350_v42 = vpack.c.bf16 %v2348_v39, %v2348_v39 }
 0xf84   :  { %v2352_v8 = vpop.permute.xlu1 %2351 }
 0xf85   :  { %v2357_v37 = vsel %vm557_vm9, %v2352_v8, 0  ;;  %v3731_v8 = vld [vmem:[%s5150_s18 + $0x60] sm:$0xf] }
 0xf86   :  { %2366 = vmatpush.bf16.msrb.mxu0 %v2357_v37  ;;  %v4012_v37 = vld [vmem:[%s5150_s18 + $0x64] sm:$0xf0] }
 0xf87   :  { %v3732_v39 = vor.u32 %v4012_v37, %v3731_v8 }
 0xf89   :  { %2646 = vmatpush.bf16.msra.mxu3 %v3732_v39 }
 0xf8a   :  { %2659 = vmatpush.bf16.msra.mxu0 %v3744_v34 }
 0xf8c   :  { %v2373_v40 = vpop.permute.xlu1 %2372 }
 0xf8d   :  { %v2378_v41 = vsel %vm557_vm9, %v2373_v40, 0  ;;  %v3733_v40 = vld [vmem:[%s5150_s18 + $0x68] sm:$0xf0] }
 0xf8e   :  { %2387 = vmatpush.bf16.msra.mxu1 %v2378_v41  ;;  %v3736_v41 = vor.u32 %v4011_v11, %v3733_v40  ;;  %v4114_v11 = vld [vmem:[%s5151_s22] ss:$0 sm:$0xff] }
 0xf90   :  { %2660 = vmatpush.bf16.msra.mxu0 %v3736_v41 }
 0xf91   :  { %3648 = vmatmul.msk.bf16.vlgmr.msra.gmra.mxu1 %vm527_vm10, %v2350_v42  ;;  %v3723_v42 = vld [vmem:[%s5150_s18 + $0x50] sm:$0xf] }
 0xf9d   :  { %v2341_v26 = vpop.xlane.xlu0 %2340 }
 0xf9e   :  { %4210 = vrcp.f32 %v2341_v26  ;;  %v2013_v33 = vpop.f32.mrf.mxu1  ;;  %v4010_v26 = vld [vmem:[%s5150_s18 + $0x54] sm:$0xf0] }
 0xf9f   :  { %2018 = vst.msk [vmem:[#allocation2 + $0x8] sm:$0xff] %vm488_vm8, %v2013_v33  ;;  %v4009_v33 = vld [vmem:[%s5150_s18 + $0x54] sm:$0xf] }
 0xfa4   :  { %v4211_v43 = vpop.eup %4210 }
 0xfa5   :  { %v2347_v44 = vmul.f32 %v4211_v43, %v4199_v2  ;;  %v3991_v2 = vld [vmem:[%s5148_s15] sm:$0xff]  ;;  %v3724_v43 = vor.u32 %v4010_v26, %v3723_v42 }
 0xfa6   :  { %v2015_v45 = vpop.f32.mrf.mxu1  ;;  %2481 = vmatpush.bf16.msrb.mxu2 %v3991_v2  ;;  %v4000_v2 = vld [vmem:[%s5150_s18 + $0x4] sm:$0xf0]  ;;  %v4115_v26 = vld [vmem:[%s5152_s23] ss:$0 sm:$0xff] }
 0xfa7   :  { %v2349_v46 = vpack.c.bf16 %v2347_v44, %v2347_v44  ;;  %v3725_v44 = vld [vmem:[%s5150_s18 + $0x58] sm:$0xf0]  ;;  %2647 = vmatpush.bf16.msra.mxu3 %v3724_v43 }
 0xfa8   :  { %v3728_v45 = vor.u32 %v4009_v33, %v3725_v44 }
 0xfa9   :  { %3647 = vmatmul.msk.bf16.vlgmr.msrb.gmra.mxu0 %vm527_vm10, %v2349_v46  ;;  %v3715_v46 = vld [vmem:[%s5150_s18 + $0x40] sm:$0xf] }
 0xfaa   :  { %2661 = vmatpush.bf16.msra.mxu0 %v3728_v45 }
 0xfd5   :  { %v2121_v47 = vpop.f32.mrf.mxu0 }
 0xfd6   :  { %2151 = vrot.lane.b32.xlu1 %v2121_v47, %s4299_s9  ;;  %v4008_v47 = vld [vmem:[%s5150_s18 + $0x44] sm:$0xf0] }
 0xfdd   :  { %v2123_v48 = vpop.f32.mrf.mxu0 }
 0xfde   :  { %v4007_v48 = vld [vmem:[%s5150_s18 + $0x44] sm:$0xf] }
 0xfe1   :  { %v2145_v49 = vpop.f32.mrf.mxu1 }
 0xfe2   :  { %2153 = vrot.lane.b32.xlu0 %v2145_v49, %s4299_s9  ;;  %v3716_v49 = vor.u32 %v4008_v47, %v3715_v46  ;;  %v4029_v46 = vld [vmem:[%s5153_s26 + $0x70] sm:$0xff]  ;;  %v4022_v47 = vld [vmem:[%s5153_s26 + $0x38] sm:$0xff]  ;;  %s3157_s9 = sshll.u32 %s4521_s6, 4  ;;  %s3158_s9 = int_to_ptr.hbm [resolvable:$true] %s3157_s9 }
 0xfe3   :  { %2843 = vmatpush.bf16.msrb.mxu1 %v4022_v47 }
 0xfe4   :  { %2648 = vmatpush.bf16.msra.mxu3 %v3716_v49  ;;  %v4027_v49 = vld [vmem:[%s5153_s26 + $0x60] sm:$0xff] }
 0xfe9   :  { %v2147_v50 = vpop.f32.mrf.mxu1 }
 0xfea   :  { %v3717_v50 = vld [vmem:[%s5150_s18 + $0x48] sm:$0xf0] }
 0xfed   :  { %v2246_v51 = vpop.f32.mrf.mxu0 }
 0xfee   :  { %2273 = vrot.lane.b32.xlu1 %v2246_v51, %s4298_s5  ;;  %v3720_v51 = vor.u32 %v4007_v48, %v3717_v50  ;;  %v4021_v48 = vld [vmem:[%s5153_s26 + $0x30] sm:$0xff]  ;;  %v4020_v50 = vld [vmem:[%s5153_s26 + $0x28] sm:$0xff] }
 0xfef   :  { %2844 = vmatpush.bf16.msrb.mxu1 %v4021_v48 }
 0xff0   :  { %2662 = vmatpush.bf16.msra.mxu0 %v3720_v51  ;;  %v4026_v51 = vld [vmem:[%s5153_s26 + $0x58] sm:$0xff] }
 0xff3   :  { %2845 = vmatpush.bf16.msrb.mxu1 %v4020_v50 }
 0xff5   :  { %v2248_v52 = vpop.f32.mrf.mxu0  ;;  %v2267_v53 = vpop.f32.mrf.mxu1 }
 0xff6   :  { %2275 = vrot.lane.b32.xlu2 %v2267_v53, %s4298_s5  ;;  %v3707_v52 = vld [vmem:[%s5150_s18 + $0x30] sm:$0xf]  ;;  %v4006_v53 = vld [vmem:[%s5150_s18 + $0x34] sm:$0xf0] }
 0xffd   :  { %v2269_v54 = vpop.f32.mrf.mxu1 }
 0xffe   :  { %v4005_v54 = vld [vmem:[%s5150_s18 + $0x34] sm:$0xf] }
0x100e   :  { %v2389_v55 = vpop.f32.mrf.mxu1 }
0x100f   :  { %2397 = vrot.lane.b32.xlu0 %v2389_v55, %s4297_s0  ;;  %v3708_v55 = vor.u32 %v4006_v53, %v3707_v52  ;;  %v4019_v52 = vld [vmem:[%s5153_s26 + $0x20] sm:$0xff]  ;;  %v4025_v53 = vld [vmem:[%s5153_s26 + $0x50] sm:$0xff] }
0x1010   :  { %2846 = vmatpush.bf16.msrb.mxu1 %v4019_v52  ;;  %v4034_v52 = vld [vmem:[%s5155_s1 + $0x18] sm:$0xff] }
0x1011   :  { %2649 = vmatpush.bf16.msra.mxu3 %v3708_v55  ;;  %v2559_v55 = vld [vmem:[%s5154_s28] sm:$0x3] }
0x1012   :  { %v2561_v62 = vperm.slane %v2559_v55, 0 }
0x1016   :  { %v2391_v56 = vpop.f32.mrf.mxu1 }
0x1017   :  { %v3709_v56 = vld [vmem:[%s5150_s18 + $0x38] sm:$0xf0] }
0x1026   :  { %v2368_v36 = vpop.f32.mrf.mxu0 }
0x1027   :  { %2395 = vrot.lane.b32.xlu1 %v2368_v36, %s4297_s0  ;;  %v3712_v36 = vor.u32 %v4005_v54, %v3709_v56  ;;  %v4018_v54 = vld [vmem:[%s5153_s26 + $0x18] sm:$0xff]  ;;  %v4024_v56 = vld [vmem:[%s5153_s26 + $0x48] sm:$0xff]  ;;  %s5160_s0 = sld [smem:[#allocation30_spill]] }
0x1028   :  { %2847 = vmatpush.bf16.msrb.mxu1 %v4018_v54  ;;  %v4032_v54 = vld [vmem:[%s5155_s1 + $0x8] sm:$0xff] }
0x1029   :  { %2663 = vmatpush.bf16.msra.mxu0 %v3712_v36  ;;  %v4017_v36 = vld [vmem:[%s5153_s26 + $0x10] sm:$0xff] }
0x102c   :  { %2848 = vmatpush.bf16.msrb.mxu1 %v4017_v36 }
0x102e   :  { %v2370_v57 = vpop.f32.mrf.mxu0 }
0x102f   :  { %v3699_v57 = vld [vmem:[%s5150_s18 + $0x20] sm:$0xf] }
0x1048   :  { %v2152_v58 = vpop.permute.xlu1 %2151 }
0x1049   :  { %2157 = vst.msk [vmem:[#allocation2] sm:$0xff] %vm733_vm11, %v2152_v58  ;;  %v4004_v58 = vld [vmem:[%s5150_s18 + $0x24] sm:$0xf0] }
0x1050   :  { %v2276_v59 = vpop.permute.xlu2 %2275 }
0x1054   :  { %v2154_v38 = vpop.permute.xlu0 %2153 }
0x1055   :  { %2158 = vst.msk [vmem:[#allocation2 + $0x8] sm:$0xff] %vm733_vm11, %v2154_v38  ;;  %v4003_v38 = vld [vmem:[%s5150_s18 + $0x24] sm:$0xf] }
0x1056   :  { %2280 = vst.msk [vmem:[#allocation2 + $0x8] sm:$0xff] %vm856_vm12, %v2276_v59  ;;  %v3700_v59 = vor.u32 %v4004_v58, %v3699_v57  ;;  %v4023_v57 = vld [vmem:[%s5153_s26 + $0x40] sm:$0xff]  ;;  %v2562_v58 = vperm.slane %v2559_v55, 1 }
0x1057   :  { %v4031_v55 = vld [vmem:[%s5155_s1] sm:$0xff] }
0x1058   :  { %2650 = vmatpush.bf16.msra.mxu3 %v3700_v59 }
0x105c   :  { %2651 = vmatpush.bf16.msra.mxu3 %v3692_v0 }
0x1060   :  { %v2274_v21 = vpop.permute.xlu1 %2273 }
0x1061   :  { %2279 = vst.msk [vmem:[#allocation2] sm:$0xff] %vm856_vm12, %v2274_v21  ;;  %v3701_v21 = vld [vmem:[%s5150_s18 + $0x28] sm:$0xf0] }
0x1062   :  { %v3704_v60 = vor.u32 %v4003_v38, %v3701_v21  ;;  %v4016_v38 = vld [vmem:[%s5153_s26 + $0x8] sm:$0xff] }
0x1063   :  { %2849 = vmatpush.bf16.msrb.mxu1 %v4016_v38 }
0x1064   :  { %2664 = vmatpush.bf16.msra.mxu0 %v3704_v60  ;;  %v4015_v60 = vld [vmem:[%s5153_s26] sm:$0xff] }
0x1067   :  { %2850 = vmatpush.bf16.msrb.mxu1 %v4015_v60 }
0x1081   :  { %v2398_v3 = vpop.permute.xlu0 %2397 }
0x1082   :  { %2402 = vst.msk [vmem:[#allocation2 + $0x8] sm:$0xff] %vm979_vm13, %v2398_v3 }
0x1089   :  { %v2404_v6 = vld [vmem:[#allocation2 + $0x8] sm:$0xff] }
0x1099   :  { %v2396_v4 = vpop.permute.xlu1 %2395 }
0x109a   :  { %2401 = vst.msk [vmem:[#allocation2] sm:$0xff] %vm979_vm13, %v2396_v4  ;;  %v3696_v4 = vor.u32 %v4001_v63, %v3693_v35 }
0x109c   :  { %2665 = vmatpush.bf16.msra.mxu0 %v3696_v4 }
0x10a1   :  { %v2403_v5 = vld [vmem:[#allocation2] sm:$0xff] }
0x10a2   :  { %v2405_v7 = vpack.c.bf16 %v2404_v6, %v2403_v5  ;;  %v3999_v5 = vld [vmem:[%s5150_s18 + $0x4] sm:$0xf]  ;;  %v3685_v6 = vld [vmem:[%s5150_s18 + $0x8] sm:$0xf0] }
0x10a4   :  { %2482 = vmatmul.bf16.vlgmr.msrb.gmra.mxu2 %v2405_v7 }
0x1127   :  { %v2483_v13 = vpop.f32.mrf.mxu2 }
0x1128   :  { %v2484_v14 = vadd.f32 %v4113_v9, %v2483_v13  ;;  %v3688_v13 = vor.u32 %v3999_v5, %v3685_v6 }
0x112a   :  { %v4992_v25 = vadd.f32 %v2484_v14, %v4812_v1  ;;  %2666 = vmatpush.bf16.msra.mxu0 %v3688_v13 }
0x112c   :  { %2492 = vadd.xlane.f32.xlu1 %v4992_v25 }
0x112f   :  { %v2485_v15 = vpop.f32.mrf.mxu2 }
0x1130   :  { %v2486_v16 = vadd.f32 %v4113_v9, %v2485_v15  ;;  %v3684_v9 = vor.u32 %v4000_v2, %v3683_v12 }
0x1132   :  { %v4996_v17 = vadd.f32 %v2486_v16, %v4815_v30  ;;  %2652 = vmatpush.bf16.msra.mxu3 %v3684_v9 }
0x1134   :  { %2494 = vadd.xlane.f32.xlu0 %v4996_v17 }
0x119f   :  { %v2493_v19 = vpop.xlane.xlu1 %2492 }
0x11a0   :  { %v2496_v10 = vmul.f32 %v2493_v19, %v4534_v18 }
0x11a2   :  { %v5001_v20 = vsub.f32 %v4992_v25, %v2496_v10 }
0x11a4   :  { %v2500_v1 = vmul.f32 %v5001_v20, %v5001_v20 }
0x11a6   :  { %2502 = vadd.xlane.f32.xlu2 %v2500_v1 }
0x11a7   :  { %v2495_v22 = vpop.xlane.xlu0 %2494 }
0x11a8   :  { %v2497_v30 = vmul.f32 %v2495_v22, %v4534_v18 }
0x11aa   :  { %v5007_v23 = vsub.f32 %v4996_v17, %v2497_v30 }
0x11ac   :  { %v2501_v24 = vmul.f32 %v5007_v23, %v5007_v23 }
0x11ae   :  { %2504 = vadd.xlane.f32.xlu1 %v2501_v24 }
0x1219   :  { %v2503_v3 = vpop.xlane.xlu2 %2502 }
0x121a   :  { %v2506_v7 = vmul.f32 %v2503_v3, %v4534_v18  ;;  %v4038_v3 = vld [vmem:[%s5155_s1 + $0x38] sm:$0xff] }
0x121b   :  { %2942 = vmatpush.bf16.msrb.mxu3 %v4038_v3  ;;  %v4039_v3 = vld [vmem:[%s5157_s7] sm:$0xff] }
0x121c   :  { %v2508_v14 = vadd.f32 1e-06, %v2506_v7  ;;  %v4037_v7 = vld [vmem:[%s5155_s1 + $0x30] sm:$0xff] }
0x121e   :  { %4212 = vrsqrt.f32 %v2508_v14  ;;  %vm2516_vm9 = vweird.f32 %v2508_v14 }
0x121f   :  { %2943 = vmatpush.bf16.msrb.mxu3 %v4037_v7 }
0x1221   :  { %v2505_v15 = vpop.xlane.xlu1 %2504 }
0x1222   :  { %v2507_v16 = vmul.f32 %v2505_v15, %v4534_v18 }
0x1224   :  { %v4213_v19 = vpop.eup %4212  ;;  %v2509_v10 = vadd.f32 1e-06, %v2507_v16 }
0x1225   :  { %v2511_v1 = vmul.f32 %v4213_v19, %v2508_v14  ;;  %vm2517_vm8 = vweird.f32 %v4213_v19 }
0x1226   :  { %4214 = vrsqrt.f32 %v2509_v10  ;;  %vm2518_vm10 = vmor %vm2516_vm9, %vm2517_vm8  ;;  %vm2526_vm12 = vweird.f32 %v2509_v10 }
0x1227   :  { %v2512_v22 = vmul.f32 %v4213_v19, %v2511_v1 }
0x1229   :  { %v2513_v30 = vmul.f32 0.5, %v2512_v22 }
0x122b   :  { %v2514_v24 = vsub.f32 1.5, %v2513_v30 }
0x122c   :  { %v4215_v27 = vpop.eup %4214 }
0x122d   :  { %v2515_v31 = vmul.f32 %v4213_v19, %v2514_v24  ;;  %v2521_v28 = vmul.f32 %v4215_v27, %v2509_v10  ;;  %vm2527_vm11 = vweird.f32 %v4215_v27  ;;  %v4036_v10 = vld [vmem:[%s5155_s1 + $0x28] sm:$0xff] }
0x122e   :  { %vm2528_vm13 = vmor %vm2526_vm12, %vm2527_vm11  ;;  %2944 = vmatpush.bf16.msrb.mxu3 %v4036_v10 }
0x122f   :  { %v2522_v29 = vmul.f32 %v4215_v27, %v2521_v28  ;;  %v2519_v32 = vsel %vm2518_vm10, %v4213_v19, %v2515_v31  ;;  %v4035_v31 = vld [vmem:[%s5155_s1 + $0x20] sm:$0xff] }
0x1230   :  { %v2530_v37 = vmul.f32 %v2519_v32, %v5001_v20  ;;  %v4030_v20 = vld [vmem:[%s5153_s26 + $0x78] sm:$0xff] }
0x1231   :  { %v2523_v34 = vmul.f32 0.5, %v2522_v29  ;;  %2857 = vmatpush.bf16.msra.mxu2 %v4030_v20 }
0x1232   :  { %v2535_v42 = vmul.f32 %v4114_v11, %v2530_v37  ;;  %2945 = vmatpush.bf16.msrb.mxu3 %v4035_v31 }
0x1233   :  { %v2524_v8 = vsub.f32 1.5, %v2523_v34 }
0x1234   :  { %v2540_v43 = vadd.f32 %v4115_v26, %v2535_v42 }
0x1235   :  { %v2525_v39 = vmul.f32 %v4215_v27, %v2524_v8  ;;  %2858 = vmatpush.bf16.msra.mxu2 %v4029_v46 }
0x1236   :  { %2946 = vmatpush.bf16.msrb.mxu3 %v4034_v52 }
0x1237   :  { %v2529_v40 = vsel %vm2528_vm13, %v4215_v27, %v2525_v39 }
0x1238   :  { %v2531_v41 = vmul.f32 %v2529_v40, %v5007_v23  ;;  %v4028_v23 = vld [vmem:[%s5153_s26 + $0x68] sm:$0xff] }
0x1239   :  { %2859 = vmatpush.bf16.msra.mxu2 %v4028_v23 }
0x123a   :  { %v2536_v33 = vmul.f32 %v4114_v11, %v2531_v41 }
0x123c   :  { %v2541_v44 = vadd.f32 %v4115_v26, %v2536_v33 }
0x123d   :  { %2860 = vmatpush.bf16.msra.mxu2 %v4027_v49 }
0x123e   :  { %v2542_v45 = vpack.c.bf16 %v2541_v44, %v2540_v43 }
0x1240   :  { %2653 = vmatmul.bf16.vlgmr.msra.gmra.mxu3 %v2542_v45  ;;  %2667 = vmatmul.bf16.vlgmr.msra.gmra.mxu0 %v2542_v45 }
0x1241   :  { %2861 = vmatpush.bf16.msra.mxu2 %v4026_v51 }
0x1245   :  { %2862 = vmatpush.bf16.msra.mxu2 %v4025_v53  ;;  %v4033_v53 = vld [vmem:[%s5155_s1 + $0x10] sm:$0xff] }
0x1246   :  { %2947 = vmatpush.bf16.msrb.mxu3 %v4033_v53 }
0x1249   :  { %2863 = vmatpush.bf16.msra.mxu2 %v4024_v56 }
0x124a   :  { %2948 = vmatpush.bf16.msrb.mxu3 %v4032_v54 }
0x124d   :  { %2864 = vmatpush.bf16.msra.mxu2 %v4023_v57  ;;  %v4116_v57 = vld [vmem:[%s5156_s2] ss:$0 sm:$0xff] }
0x124e   :  { %2949 = vmatpush.bf16.msrb.mxu3 %v4031_v55 }
0x12bd   :  { %v2668_v59 = vpop.f32.mrf.mxu0 }
0x12be   :  { %v2669_v21 = vadd.f32 %v2668_v59, %v2562_v58 }
0x12c0   :  { %v2678_v61 = vmul.f32 0.044715, %v2669_v21  ;;  %v2674_v41 = vmul.f32 0.5, %v2669_v21 }
0x12c2   :  { %v2682_v63 = vmul.f32 %v2678_v61, %v2669_v21 }
0x12c3   :  { %v2654_v0 = vpop.f32.mrf.mxu3 }
0x12c4   :  { %v2686_v35 = vmul.f32 %v2682_v63, %v2669_v21  ;;  %v2655_v12 = vadd.f32 %v2654_v0, %v2561_v62 }
0x12c5   :  { %v2670_v2 = vpop.f32.mrf.mxu0 }
0x12c6   :  { %v2690_v4 = vadd.f32 %v2686_v35, %v2669_v21  ;;  %v2677_v5 = vmul.f32 0.044715, %v2655_v12  ;;  %v2671_v6 = vadd.f32 %v2670_v2, %v2562_v58  ;;  %v2673_v47 = vmul.f32 0.5, %v2655_v12  ;;  %v4042_v35 = vld [vmem:[%s5157_s7 + $0x18] sm:$0xff]  ;;  %v4040_v2 = vld [vmem:[%s5157_s7 + $0x8] sm:$0xff] }
0x12c7   :  { %3002 = vmatpush.bf16.msrb.mxu0 %v4042_v35  ;;  %v4121_v35 = vld [vmem:[%s4516_s4] ss:$0 sm:$0xff] }
0x12c8   :  { %v2681_v9 = vmul.f32 %v2677_v5, %v2655_v12  ;;  %v2680_v13 = vmul.f32 0.044715, %v2671_v6  ;;  %v2694_v14 = vmul.f32 0.7978846, %v2690_v4  ;;  %v2676_v42 = vmul.f32 0.5, %v2671_v6 }
0x12c9   :  { %v4117_v5 = vld [vmem:[%s5158_s10] ss:$0 sm:$0xff] }
0x12ca   :  { %v2685_v15 = vmul.f32 %v2681_v9, %v2655_v12  ;;  %v2684_v16 = vmul.f32 %v2680_v13, %v2671_v6  ;;  %4216 = vtanh.f32 %v2694_v14 }
0x12cb   :  { %v2656_v19 = vpop.f32.mrf.mxu3 }
0x12cc   :  { %v2689_v1 = vadd.f32 %v2685_v15, %v2655_v12  ;;  %v2688_v22 = vmul.f32 %v2684_v16, %v2671_v6  ;;  %v2657_v30 = vadd.f32 %v2656_v19, %v2561_v62  ;;  %v4041_v12 = vld [vmem:[%s5157_s7 + $0x10] sm:$0xff] }
0x12cd   :  { %3003 = vmatpush.bf16.msrb.mxu0 %v4041_v12 }
0x12ce   :  { %v2692_v24 = vadd.f32 %v2688_v22, %v2671_v6  ;;  %v2679_v27 = vmul.f32 0.044715, %v2657_v30  ;;  %v2693_v28 = vmul.f32 0.7978846, %v2689_v1  ;;  %v2675_v23 = vmul.f32 0.5, %v2657_v30 }
0x12d0   :  { %v2696_v29 = vmul.f32 0.7978846, %v2692_v24  ;;  %v2683_v32 = vmul.f32 %v2679_v27, %v2657_v30  ;;  %v4217_v8 = vpop.eup %4216 }
0x12d1   :  { %v2702_v39 = vadd.f32 1.0, %v4217_v8  ;;  %3004 = vmatpush.bf16.msrb.mxu0 %v4040_v2  ;;  %v4050_v8 = vld [vmem:[%s4511_s27 + $0x38] sm:$0xff] }
0x12d2   :  { %4218 = vtanh.f32 %v2696_v29  ;;  %v2687_v34 = vmul.f32 %v2683_v32, %v2657_v30  ;;  %3135 = vmatpush.bf16.msra.mxu1 %v4050_v8 }
0x12d3   :  { %4220 = vtanh.f32 %v2693_v28  ;;  %v2706_v43 = vmul.f32 %v2702_v39, %v2674_v41  ;;  %v4047_v39 = vld [vmem:[%s4511_s27 + $0x20] sm:$0xff]  ;;  %v4045_v41 = vld [vmem:[%s4511_s27 + $0x10] sm:$0xff] }
0x12d4   :  { %v2691_v37 = vadd.f32 %v2687_v34, %v2657_v30 }
0x12d5   :  { %3005 = vmatpush.bf16.msrb.mxu0 %v4039_v3 }
0x12d6   :  { %v2695_v11 = vmul.f32 0.7978846, %v2691_v37  ;;  %v4049_v37 = vld [vmem:[%s4511_s27 + $0x30] sm:$0xff] }
0x12d7   :  { %3136 = vmatpush.bf16.msra.mxu1 %v4049_v37 }
0x12d8   :  { %v4219_v40 = vpop.eup %4218  ;;  %4222 = vtanh.f32 %v2695_v11  ;;  %v4048_v11 = vld [vmem:[%s4511_s27 + $0x28] sm:$0xff] }
0x12d9   :  { %v2704_v26 = vadd.f32 1.0, %v4219_v40  ;;  %v4221_v33 = vpop.eup %4220  ;;  %v4046_v40 = vld [vmem:[%s4511_s27 + $0x18] sm:$0xff] }
0x12da   :  { %v2701_v20 = vadd.f32 1.0, %v4221_v33 }
0x12db   :  { %v2708_v44 = vmul.f32 %v2704_v26, %v2676_v42  ;;  %3137 = vmatpush.bf16.msra.mxu1 %v4048_v11  ;;  %v4044_v42 = vld [vmem:[%s4511_s27 + $0x8] sm:$0xff] }
0x12dc   :  { %v2705_v49 = vmul.f32 %v2701_v20, %v2673_v47 }
0x12dd   :  { %v2710_v45 = vpack.c.bf16 %v2708_v44, %v2706_v43  ;;  %v4043_v44 = vld [vmem:[%s4511_s27] sm:$0xff]  ;;  %s4300_s27 = smov [#allocation3]  }
0x12de   :  { %v4223_v46 = vpop.eup %4222  ;;  %s3155_s5 = sshll.u32 %s4300_s27, 4  ;;  %s3156_s5 = int_to_ptr.vmem [resolvable:$true] %s3155_s5 }
0x12df   :  { %2865 = vmatmul.bf16.vlgmr.msra.gmra.mxu2 %v2710_v45  ;;  %v2703_v48 = vadd.f32 1.0, %v4223_v46  ;;  %3138 = vmatpush.bf16.msra.mxu1 %v4047_v39 }
0x12e1   :  { %v2707_v50 = vmul.f32 %v2703_v48, %v2675_v23 }
0x12e3   :  { %v2709_v51 = vpack.c.bf16 %v2707_v50, %v2705_v49  ;;  %3139 = vmatpush.bf16.msra.mxu1 %v4046_v40 }
0x12e5   :  { %2851 = vmatmul.bf16.vlgmr.msrb.gmra.mxu1 %v2709_v51 }
0x12e7   :  { %3140 = vmatpush.bf16.msra.mxu1 %v4045_v41 }
0x12eb   :  { %3141 = vmatpush.bf16.msra.mxu1 %v4044_v42 }
0x12ef   :  { %3142 = vmatpush.bf16.msra.mxu1 %v4043_v44 }
0x1362   :  { %v2852_v56 = vpop.f32.mrf.mxu1  ;;  %v2866_v36 = vpop.f32.mrf.mxu2 }
0x1363   :  { %v2853_v58 = vadd.f32 %v4116_v57, %v2852_v56 }
0x1365   :  { %v2867_v59 = vadd.f32 %v2866_v36, %v2853_v58 }
0x1367   :  { %v2871_v62 = vadd.f32 %v2867_v59, %v4992_v25  ;;  %v4120_v59 = vld [vmem:[%s4506_s20] ss:$0 sm:$0xff]  ;;  %s4240_s20 = sshra.s32 %s3158_s9, 4  ;;  %s4241_s20 = int_to_ptr.hbm [resolvable:$true] %s4240_s20 }
0x1368   :  { %s4242_s13 = scalar_lea.hbm %s4241_s20, 16  ;;  %p4245_p1 = scmp.lt.s32.totalorder %s4241_s20, %s4521_s6 }
0x1369   :  { %p4243_p0 = scmp.ne.s32.totalorder %s4241_s20, %s4242_s13  ;;  %p4246_p2 = scmp.lt.s32.totalorder %s4244_s17, %s4242_s13 }
0x136a   :  { %v2854_v38 = vpop.f32.mrf.mxu1  ;;  %v2868_v60 = vpop.f32.mrf.mxu2 }
0x136b   :  { %v2855_v21 = vadd.f32 %v4116_v57, %v2854_v38  ;;  %p4247_p3 = por %p4246_p2, %p4245_p1 }
0x136d   :  { %v2869_v61 = vadd.f32 %v2868_v60, %v2855_v21  ;;  %p4248_p4 = pnand %p4247_p3, %p4243_p0 }
0x136f   :  { %v2872_v63 = vadd.f32 %v2869_v61, %v4996_v17  ;;  %v4118_v17 = vld [vmem:[%s5159_s11] ss:$0 sm:$0xff] }
0x1371   :  { %v2873_v0 = vpack.c.bf16 %v2872_v63, %v2871_v62 }
0x1373   :  { %2950 = vmatmul.bf16.vlgmr.msrb.gmra.mxu3 %v2873_v0 }
0x13f6   :  { %v2951_v4 = vpop.f32.mrf.mxu3 }
0x13f7   :  { %v2952_v6 = vadd.f32 %v4117_v5, %v2951_v4 }
0x13f9   :  { %v2956_v13 = vmax.f32 %v2952_v6, 0.0 }
0x13fe   :  { %v2953_v7 = vpop.f32.mrf.mxu3 }
0x13ff   :  { %v2954_v9 = vadd.f32 %v4117_v5, %v2953_v7 }
0x1401   :  { %v2957_v25 = vmax.f32 %v2954_v9, 0.0 }
0x1403   :  { %v2958_v14 = vpack.c.bf16 %v2957_v25, %v2956_v13 }
0x1405   :  { %3857 = vmatmul.msk.bf16.vlgmr.msrb.gmra.mxu0 %vm1574_vm4, %v2958_v14 }
0x1482   :  { %v3007_v15 = vpop.f32.mrf.mxu0 }
0x1483   :  { %v3008_v16 = vadd.f32 %v4118_v17, %v3007_v15 }
0x1485   :  { %v3012_v19 = vadd.f32 %v3008_v16, %v2871_v62 }
0x1487   :  { %3016 = vadd.xlane.f32.xlu0 %v3012_v19 }
0x148a   :  { %v3009_v10 = vpop.f32.mrf.mxu0 }
0x148b   :  { %v3010_v1 = vadd.f32 %v4118_v17, %v3009_v10 }
0x148d   :  { %v3013_v22 = vadd.f32 %v3010_v1, %v2872_v63 }
0x148f   :  { %3018 = vadd.xlane.f32.xlu2 %v3013_v22 }
0x14fa   :  { %v3017_v30 = vpop.xlane.xlu0 %3016 }
0x14fb   :  { %v3020_v24 = vmul.f32 %v3017_v30, %v4534_v18 }
0x14fd   :  { %v3022_v27 = vsub.f32 %v3012_v19, %v3020_v24 }
0x14ff   :  { %v3024_v31 = vmul.f32 %v3022_v27, %v3022_v27 }
0x1501   :  { %3026 = vadd.xlane.f32.xlu1 %v3024_v31 }
0x1502   :  { %v3019_v28 = vpop.xlane.xlu2 %3018 }
0x1503   :  { %v3021_v29 = vmul.f32 %v3019_v28, %v4534_v18 }
0x1505   :  { %v3023_v32 = vsub.f32 %v3013_v22, %v3021_v29 }
0x1507   :  { %v3025_v34 = vmul.f32 %v3023_v32, %v3023_v32 }
0x1509   :  { %3028 = vadd.xlane.f32.xlu0 %v3025_v34 }
0x1574   :  { %v3027_v26 = vpop.xlane.xlu1 %3026 }
0x1575   :  { %v3030_v33 = vmul.f32 %v3027_v26, %v4534_v18 }
0x1577   :  { %v3032_v43 = vadd.f32 1e-05, %v3030_v33 }
0x1579   :  { %4224 = vrsqrt.f32 %v3032_v43  ;;  %vm3040_vm14 = vweird.f32 %v3032_v43 }
0x157c   :  { %v3029_v45 = vpop.xlane.xlu0 %3028 }
0x157d   :  { %v3031_v20 = vmul.f32 %v3029_v45, %v4534_v18  ;;  %v4119_v18 = vld [vmem:[%s5160_s0] ss:$0 sm:$0xff] }
0x157f   :  { %v4225_v46 = vpop.eup %4224  ;;  %v3033_v47 = vadd.f32 1e-05, %v3031_v20 }
0x1580   :  { %v3035_v23 = vmul.f32 %v4225_v46, %v3032_v43  ;;  %vm3041_vm4 = vweird.f32 %v4225_v46 }
0x1581   :  { %4226 = vrsqrt.f32 %v3033_v47  ;;  %vm3042_vm15 = vmor %vm3040_vm14, %vm3041_vm4  ;;  %vm3050_vm1 = vweird.f32 %v3033_v47 }
0x1582   :  { %v3036_v48 = vmul.f32 %v4225_v46, %v3035_v23 }
0x1584   :  { %v3037_v49 = vmul.f32 0.5, %v3036_v48 }
0x1586   :  { %v3038_v50 = vsub.f32 1.5, %v3037_v49 }
0x1587   :  { %v4227_v51 = vpop.eup %4226 }
0x1588   :  { %v3039_v52 = vmul.f32 %v4225_v46, %v3038_v50  ;;  %v3045_v53 = vmul.f32 %v4227_v51, %v3033_v47  ;;  %vm3051_vm0 = vweird.f32 %v4227_v51 }
0x1589   :  { %vm3052_vm2 = vmor %vm3050_vm1, %vm3051_vm0 }
0x158a   :  { %v3046_v54 = vmul.f32 %v4227_v51, %v3045_v53  ;;  %v3043_v55 = vsel %vm3042_vm15, %v4225_v46, %v3039_v52 }
0x158b   :  { %v3054_v57 = vmul.f32 %v3043_v55, %v3022_v27 }
0x158c   :  { %v3047_v56 = vmul.f32 0.5, %v3046_v54 }
0x158d   :  { %v3059_v21 = vmul.f32 %v4119_v18, %v3054_v57 }
0x158e   :  { %v3048_v36 = vsub.f32 1.5, %v3047_v56 }
0x158f   :  { %v3064_v62 = vadd.f32 %v4120_v59, %v3059_v21 }
0x1590   :  { %v3049_v58 = vmul.f32 %v4227_v51, %v3048_v36 }
0x1592   :  { %v3053_v38 = vsel %vm3052_vm2, %v4227_v51, %v3049_v58 }
0x1593   :  { %v3055_v60 = vmul.f32 %v3053_v38, %v3023_v32 }
0x1595   :  { %v3060_v61 = vmul.f32 %v4119_v18, %v3055_v60 }
0x1597   :  { %v3065_v63 = vadd.f32 %v4120_v59, %v3060_v61 }
0x1599   :  { %v3066_v0 = vpack.c.bf16 %v3065_v63, %v3064_v62 }
0x159b   :  { %3143 = vmatmul.bf16.vlgmr.msra.gmra.mxu1 %v3066_v0 }
0x1618   :  { %v3144_v12 = vpop.f32.mrf.mxu1 }
0x1619   :  { %v3145_v2 = vadd.f32 %v4121_v35, %v3144_v12 }
0x161b   :  { %3149 = vst [vmem:[#allocation3] sm:$0xff] %v3145_v2 }
0x1620   :  { %v3146_v3 = vpop.f32.mrf.mxu1 }
0x1621   :  { %v3147_v4 = vadd.f32 %v4121_v35, %v3146_v3 }
0x1623   :  { %3150 = vst [vmem:[#allocation3 + $0x8] sm:$0xff] %v3147_v4 }
0x1624   :  { %4251 = shalt.err (!%p4248_p4)
}
0x1625   :  { %s4301_s4 = smov 128   ;;  %s4302_s21 = smov 8  }
0x1626   :  { %3163 = dma.vmem_to_hbm [thread:$0]  %s3156_s5, 256, %s3158_s9, [#allocation4], %s4301_s4, %s4301_s4, %s4302_s21  }
0x1627   :  { %4252 = dma.done.wait [#allocation4], 256  }
0x1628   :  { %4253 = vsyncadd [#allocation4], 4294967040 }
0x1629   :  { %3168 = vsyncpa [#allocation4], 1 }

</bundles_post_ra>
